<compile_context>
chip_gen: v6e
topology: v6e:2x2x1
jax: 0.10.0
libtpu: 0.0.40
codegen_flags: <defaults>
</compile_context>

<pallas_src>
import jax
import jax.numpy as jnp
from jax.experimental import pallas as pl
from jax.experimental.pallas import tpu as pltpu


def _matmul_bias_kernel(x_ref, w_ref, b_ref, o_ref):
    # (tm, KP) bf16 @ (KP, 128) bf16 -> f32 accumulate on the MXU, + (1, 128) f32 bias.
    o_ref[...] = (
        jnp.dot(x_ref[...], w_ref[...], preferred_element_type=jnp.float32)
        + b_ref[...]
    ).astype(o_ref.dtype)


def _num_row_tiles():
    # 1 tile on single-TensorCore chips (v5e/v6e): avoids per-grid-step overhead.
    # 4 tiles on dual-TC v7x: 2 "parallel" blocks per core, 2-deep pipeline each.
    try:
        kind = jax.devices()[0].device_kind.lower()
    except Exception:
        return 1
    return 4 if "v7" in kind else 1


def prepare_patch_embed_params(weight, bias, *, k_pad, lane_pad):
    """One-time (init-time) prep of Conv2d params for the Pallas matmul.

    weight: (E, C, KH, KW) f32, bias: (E,) f32.
    Returns w_mat (k_pad, lane_pad) bf16 with K ordered as (KH, KW, C) to match
    the activation-side im2col layout, and b_row (1, lane_pad) f32.
    """
    E, C, KH, KW = weight.shape
    K = C * KH * KW
    w_perm = jnp.transpose(weight, (2, 3, 1, 0)).reshape(K, E)  # K order = (KH, KW, C)
    w_mat = jnp.pad(w_perm.astype(jnp.bfloat16),
                    ((0, k_pad - K), (0, lane_pad - E)))        # (KP, NP) bf16
    b_row = jnp.pad(bias.astype(jnp.float32).reshape(1, E),
                    ((0, 0), (0, lane_pad - E)))                # (1, NP) f32
    return w_mat, b_row


def patch_embed_forward(x, w_mat, b_row, *, embed_dim, kernel_size,
                        img_size=(84, 84), patch_size=(4, 4)):
    B, C, H, W = x.shape
    assert H == img_size[0] and W == img_size[1], (
        f"Input image size ({H}*{W}) doesn't match model "
        f"({img_size[0]}*{img_size[1]})."
    )
    KH, KW = kernel_size
    sh, sw = patch_size
    OH = (H - KH) // sh + 1
    OW = (W - KW) // sw + 1
    rows = B * OH * OW
    K = C * KH * KW
    KP, NP = w_mat.shape

    # ---- im2col built directly in (rows, K) order; no 6-D transpose of the
    # activation.  Only the tiny NCHW->NHWC transpose (~113 KB bf16) remains.
    xb = jnp.transpose(x.astype(jnp.bfloat16), (0, 2, 3, 1))        # (B, H, W, C)
    i_idx = ((jnp.arange(OH) * sh)[:, None, None, None]
             + jnp.arange(KH)[None, None, :, None])                 # (OH, 1, KH, 1)
    j_idx = ((jnp.arange(OW) * sw)[None, :, None, None]
             + jnp.arange(KW)[None, None, None, :])                 # (1, OW, 1, KW)
    patches = xb[:, i_idx, j_idx, :]                                # (B, OH, OW, KH, KW, C)
    lhs = patches.reshape(rows, K)                                  # contiguous reshape

    num_tiles = _num_row_tiles()
    rows_pad = pl.cdiv(rows, num_tiles * 16) * (num_tiles * 16)     # 16-aligned tiles
    tm = rows_pad // num_tiles
    # Single fused pad: zero rows (bottom) and zero K columns (936 -> 1024).
    lhs = jnp.pad(lhs, ((0, rows_pad - rows), (0, KP - K)))

    out = pl.pallas_call(
        _matmul_bias_kernel,
        out_shape=jax.ShapeDtypeStruct((rows_pad, NP), jnp.float32),
        grid_spec=pltpu.PrefetchScalarGridSpec(
            num_scalar_prefetch=0,
            grid=(num_tiles,),
            in_specs=[
                pl.BlockSpec((tm, KP), lambda i: (i, 0)),   # lhs row tile (bf16)
                pl.BlockSpec((KP, NP), lambda i: (0, 0)),   # full weight, resident
                pl.BlockSpec((1, NP), lambda i: (0, 0)),    # bias row (f32)
            ],
            out_specs=pl.BlockSpec((tm, NP), lambda i: (i, 0)),
        ),
        compiler_params=pltpu.CompilerParams(
            dimension_semantics=("parallel",)),
    )(lhs, w_mat, b_row)

    # Drop row / lane padding, reshape to (B, num_patches_out, embed_dim).
    return out[:rows, :embed_dim].reshape(B, OH * OW, embed_dim)


if __name__ == "__main__":
    # Module config (PatchEmbed defaults): in_chans=4, embed_dim=32,
    # img_size=(84, 84), patch_size=(4, 4), conv kernel fixed at (18, 13).
    B, C, H, W = 2, 4, 84, 84
    E, KH, KW = 32, 18, 13

    key = jax.random.PRNGKey(0)
    kx, kw, kb = jax.random.split(key, 3)
    x = jax.random.normal(kx, (B, C, H, W), dtype=jnp.float32)
    weight = 0.02 * jax.random.normal(kw, (E, C, KH, KW), dtype=jnp.float32)
    bias = 0.01 * jax.random.normal(kb, (E,), dtype=jnp.float32)

    K = C * KH * KW
    KP = pl.cdiv(K, 128) * 128            # 936 -> 1024
    NP = max(128, pl.cdiv(E, 128) * 128)  # 32  -> 128 lanes
    # Init-time param prep (hoisted out of the per-call forward path).
    w_mat, b_row = prepare_patch_embed_params(weight, bias, k_pad=KP, lane_pad=NP)

    out = patch_embed_forward(x, w_mat, b_row, embed_dim=E, kernel_size=(KH, KW))
    out = jax.block_until_ready(out)

    # Reference: XLA conv at highest precision, PyTorch-equivalent semantics.
    ref = jax.lax.conv_general_dilated(
        x, weight, window_strides=(4, 4), padding="VALID",
        dimension_numbers=("NCHW", "OIHW", "NCHW"),
        precision=jax.lax.Precision.HIGHEST,
    ) + bias.reshape(1, E, 1, 1)
    ref = ref.reshape(B, E, -1).transpose(0, 2, 1)   # flatten(2).transpose(1, 2)

    assert out.shape == ref.shape == (B, 17 * 18, E), (out.shape, ref.shape)
    assert jnp.allclose(out, ref, atol=2e-2, rtol=2e-2), float(
        jnp.max(jnp.abs(out - ref)))

    print("KERNEL_OK")
</pallas_src>

<mosaic_0001>
module attributes {stable_mosaic.version = 11 : i64} {
  func.func @_matmul_bias_kernel(%arg0: i32, %arg1: memref<624x1024xbf16, #tpu.memory_space<vmem>>, %arg2: memref<1024x128xbf16, #tpu.memory_space<vmem>>, %arg3: memref<1x128xf32, #tpu.memory_space<vmem>>, %arg4: memref<624x128xf32, #tpu.memory_space<vmem>>) attributes {dimension_semantics = [#tpu.dimension_semantics<parallel>], iteration_bounds = array<i64: 1>, scalar_prefetch = 0 : i64, scratch_operands = 0 : i64, tpu.core_type = #tpu.core_type<tc>, window_params = [{transform_indices = @transform_0, window_bounds = array<i64: 624, 1024>}, {pipeline_mode = #tpu.pipeline_mode<synchronous>, transform_indices = @transform_1, window_bounds = array<i64: 1024, 128>}, {pipeline_mode = #tpu.pipeline_mode<synchronous>, transform_indices = @transform_2, window_bounds = array<i64: 1, 128>}, {transform_indices = @transform_3, window_bounds = array<i64: 624, 128>}]} {
    %c0 = arith.constant 0 : index
    %c0_0 = arith.constant 0 : index
    %0 = vector.load %arg1[%c0, %c0_0] : memref<624x1024xbf16, #tpu.memory_space<vmem>>, vector<624x1024xbf16>
    %c0_1 = arith.constant 0 : index
    %c0_2 = arith.constant 0 : index
    %1 = vector.load %arg2[%c0_1, %c0_2] : memref<1024x128xbf16, #tpu.memory_space<vmem>>, vector<1024x128xbf16>
    %cst = arith.constant dense<0.000000e+00> : vector<624x128xf32>
    %2 = tpu.matmul %0, %1, %cst {dimension_numbers = #tpu.dot_dimension_numbers<[1], [0], [0], [1], [0, 0, 1, 1], [], []>} : vector<624x1024xbf16>, vector<1024x128xbf16>, vector<624x128xf32> -> vector<624x128xf32>
    %c0_3 = arith.constant 0 : index
    %c0_4 = arith.constant 0 : index
    %3 = vector.load %arg3[%c0_3, %c0_4] : memref<1x128xf32, #tpu.memory_space<vmem>>, vector<1x128xf32>
    %4 = vector.broadcast %3 : vector<1x128xf32> to vector<624x128xf32>
    %5 = arith.addf %2, %4 : vector<624x128xf32>
    %c0_5 = arith.constant 0 : index
    %c0_6 = arith.constant 0 : index
    %6 = vector.load %arg4[%c0_5, %c0_6] : memref<624x128xf32, #tpu.memory_space<vmem>>, vector<624x128xf32>
    tpu.vector_store %arg4[%c0_5, %c0_6], %5 {strides = array<i32>} : memref<624x128xf32, #tpu.memory_space<vmem>>, vector<624x128xf32>,
    return
  }
  func.func @transform_0(%arg0: i32) -> (i32, i32) {
    %c0_i32 = arith.constant 0 : i32
    %c0_i32_0 = arith.constant 0 : i32
    return %arg0, %c0_i32 : i32, i32
  }
  func.func @transform_1(%arg0: i32) -> (i32, i32) {
    %c0_i32 = arith.constant 0 : i32
    %c0_i32_0 = arith.constant 0 : i32
    %c0_i32_1 = arith.constant 0 : i32
    return %c0_i32, %c0_i32_0 : i32, i32
  }
  func.func @transform_2(%arg0: i32) -> (i32, i32) {
    %c0_i32 = arith.constant 0 : i32
    %c0_i32_0 = arith.constant 0 : i32
    %c0_i32_1 = arith.constant 0 : i32
    return %c0_i32, %c0_i32_0 : i32, i32
  }
  func.func @transform_3(%arg0: i32) -> (i32, i32) {
    %c0_i32 = arith.constant 0 : i32
    %c0_i32_0 = arith.constant 0 : i32
    return %arg0, %c0_i32 : i32, i32
  }
}

</mosaic_0001>

<bundles_post_ra>
// kernel: tpu_custom_call.1
= control target key start
LH: loop header
LB: loop body
LE: loop exit
PB: predicated region body
PF: predicated region fallthrough
CT: control target
= control target key end

     0   :  { %8 = vsyncpa [#allocation3], 0  ;;  %s4896_s0 = inlined_call_operand.hbm [shape: bf16[624,1024], index: 0, kind: input, shape index: {}]   ;;  %s4897_s1 = inlined_call_operand.hbm [shape: bf16[1024,128], index: 1, kind: input, shape index: {}]   ;;  %s4898_s2 = inlined_call_operand.hbm [shape: f32[1,128], index: 2, kind: input, shape index: {}]   ;;  %s4899_s3 = inlined_call_operand.hbm [shape: f32[624,128], index: 3, kind: output, shape index: {}]  }
   0x1   :  { %9 = vsyncpa [#allocation6], 0 }
   0x2   :  { %10 = vsyncpa [#allocation4], 0  ;;  %s4461_s12 = smov [#allocation5]  }
   0x3   :  { %s28_s13 = sshll.u32 %s4461_s12, 4  ;;  %s29_s13 = int_to_ptr.vmem [resolvable:$true] %s28_s13 }
   0x4   :  { %s4383_s14 = scalar_lea.vmem %s29_s13, 8192  ;;  %p4388_p1 = scmp.lt.s32.totalorder %s29_s13, %s29_s13 }
   0x5   :  { %p4384_p0 = scmp.ne.s32.totalorder %s29_s13, %s4383_s14  ;;  %p4389_p2 = scmp.lt.s32.totalorder %s4383_s14, %s4383_s14 }
   0x7   :  { %p4390_p3 = por %p4389_p2, %p4388_p1 }
   0x9   :  { %p4391_p4 = pnand %p4390_p3, %p4384_p0 }
   0xb   :  { %4394 = shalt.err (!%p4391_p4)
}
   0xc   :  { %s4462_s15 = smov 64   ;;  %s4463_s16 = smov 4  }
   0xd   :  { %34 = dma.hbm_to_vmem [thread:$0]  %s4897_s1, 8192, %s29_s13, [#allocation6], %s4462_s15, %s4462_s15, %s4463_s16  }
   0xe   :  { %s4464_s19 = smov [#allocation2]  }
   0xf   :  { %s16_s20 = sshll.u32 %s4464_s19, 4  ;;  %s17_s20 = int_to_ptr.vmem [resolvable:$true] %s16_s20 }
  0x10   :  { %s4403_s21 = scalar_lea.vmem %s17_s20, 39936  ;;  %p4408_p6 = scmp.lt.s32.totalorder %s17_s20, %s17_s20 }
  0x11   :  { %p4404_p5 = scmp.ne.s32.totalorder %s17_s20, %s4403_s21  ;;  %p4409_p7 = scmp.lt.s32.totalorder %s4403_s21, %s4403_s21 }
  0x13   :  { %p4410_p8 = por %p4409_p7, %p4408_p6 }
  0x15   :  { %p4411_p9 = pnand %p4410_p8, %p4404_p5 }
  0x17   :  { %4414 = shalt.err (!%p4411_p9)
}
  0x18   :  { %s4465_s22 = smov 512   ;;  %s4466_s23 = smov 32  }
  0x19   :  { %22 = dma.hbm_to_vmem [thread:$0]  %s4896_s0, 39936, %s17_s20, [#allocation3], %s4465_s22, %s4465_s22, %s4466_s23  }
  0x1a   :  { %s4467_s26 = smov [#allocation7]  }
  0x1b   :  { %s41_s27 = sshll.u32 %s4467_s26, 4  ;;  %s42_s27 = int_to_ptr.vmem [resolvable:$true] %s41_s27 }
  0x1c   :  { %s4423_s1 = scalar_lea.vmem %s42_s27, 16  ;;  %s4427_s28 = scalar_lea.vmem %s42_s27, 32 }
  0x1d   :  { %p4424_p10 = scmp.ne.s32.totalorder %s42_s27, %s4423_s1  ;;  %p4428_p11 = scmp.lt.s32.totalorder %s42_s27, %s42_s27 }
  0x1e   :  { %p4429_p12 = scmp.lt.s32.totalorder %s4427_s28, %s4423_s1 }
  0x20   :  { %p4430_p13 = por %p4429_p12, %p4428_p11 }
  0x22   :  { %p4431_p0 = pnand %p4430_p13, %p4424_p10 }
  0x24   :  { %4434 = shalt.err (!%p4431_p0)
}
  0x25   :  { %44 = dma.hbm_to_vmem [thread:$0]  %s4898_s2, 16, %s42_s27, [#allocation6]  }
  0x26   :  { %4455 = dma.done.wait [#allocation3], 39936  }
  0x27   :  { %4456 = vsyncadd [#allocation3], 4294927360 }
  0x28   :  { %4457 = dma.done.wait [#allocation6], 8208  }
  0x29   :  { %4458 = vsyncadd [#allocation6], 4294959088  ;;  %v4468_v0 = vmov 0   ;;  %v4310_v1 = vld [vmem:[#allocation5 + $0x38] sm:$0xff]   ;;  %v4312_v3 = vld [vmem:[#allocation5 + $0x30] sm:$0xff]   ;;  %s4469_s0 = smov [#allocation8]  }
  0x2a   :  { %2446 = vmatprep.subr.bf16.mxu0 %v4468_v0  ;;  %2791 = vmatprep.subr.bf16.mxu1 %v4468_v0  ;;  %v4311_v2 = vld [vmem:[#allocation5 + $0xb8] sm:$0xff]   ;;  %v4313_v4 = vld [vmem:[#allocation5 + $0xb0] sm:$0xff]   ;;  %v4314_v5 = vld [vmem:[#allocation5 + $0x28] sm:$0xff]   ;;  %s3909_s2 = sshll.u32 %s4469_s0, 4  ;;  %s3910_s2 = int_to_ptr.vmem [resolvable:$true] %s3909_s2 }
  0x2b   :  { %2447 = vmatpush1.bf16.msra.mxu0 %v4310_v1  ;;  %2792 = vmatpush1.bf16.msra.mxu1 %v4311_v2  ;;  %v4315_v6 = vld [vmem:[#allocation5 + $0xa8] sm:$0xff]   ;;  %v4316_v7 = vld [vmem:[#allocation5 + $0x20] sm:$0xff]   ;;  %v4318_v9 = vld [vmem:[#allocation5 + $0x18] sm:$0xff]   ;;  %s4435_s4 = scalar_lea.vmem %s3910_s2, 9984  ;;  %p4440_p2 = scmp.lt.s32.totalorder %s3910_s2, %s3910_s2 }
  0x2c   :  { %2448 = vmatprep.subr.bf16.mxu0 %v4468_v0  ;;  %2793 = vmatprep.subr.bf16.mxu1 %v4468_v0  ;;  %v4317_v8 = vld [vmem:[#allocation5 + $0xa0] sm:$0xff]   ;;  %v4319_v10 = vld [vmem:[#allocation5 + $0x98] sm:$0xff]   ;;  %v4320_v11 = vld [vmem:[#allocation5 + $0x10] sm:$0xff]   ;;  %p4436_p1 = scmp.ne.s32.totalorder %s3910_s2, %s4435_s4  ;;  %p4441_p3 = scmp.lt.s32.totalorder %s4435_s4, %s4435_s4 }
  0x2d   :  { %v4321_v12 = vld [vmem:[#allocation5 + $0x90] sm:$0xff]   ;;  %v4322_v13 = vld [vmem:[#allocation5 + $0x8] sm:$0xff]   ;;  %v4324_v15 = vld [vmem:[#allocation5] sm:$0xff]  }
  0x2e   :  { %v4323_v14 = vld [vmem:[#allocation5 + $0x88] sm:$0xff]   ;;  %v4325_v16 = vld [vmem:[#allocation5 + $0x80] sm:$0xff]   ;;  %v4326_v17 = vld [vmem:[#allocation5 + $0x78] sm:$0xff]   ;;  %p4442_p4 = por %p4441_p3, %p4440_p2 }
  0x2f   :  { %2449 = vmatpush1.bf16.msra.mxu0 %v4312_v3  ;;  %2794 = vmatpush1.bf16.msra.mxu1 %v4313_v4  ;;  %v4327_v18 = vld [vmem:[#allocation5 + $0xf8] sm:$0xff]   ;;  %v4519_v19 = vld [vmem:[#allocation2] sm:$0xff]  ;;  %v4523_v21 = vld [vmem:[#allocation2 + $0x8] sm:$0xff] }
  0x30   :  { %2450 = vmatprep.subr.bf16.mxu0 %v4468_v0  ;;  %2795 = vmatprep.subr.bf16.mxu1 %v4468_v0  ;;  %v4521_v20 = vld [vmem:[#allocation2 + $0x20] sm:$0xff]  ;;  %v60_v23 = vld [vmem:[#allocation2 + $0x28] sm:$0xff]  ;;  %v4328_v24 = vld [vmem:[#allocation5 + $0x70] sm:$0xff]   ;;  %p4443_p5 = pnand %p4442_p4, %p4436_p1 }
  0x31   :  { %v3924_v22 = vcombine.high %v4519_v19, %v4521_v20  ;;  %v3926_v25 = vcombine.high %v4523_v21, %v60_v23  ;;  %v4329_v26 = vld [vmem:[#allocation5 + $0xf0] sm:$0xff]   ;;  %v4330_v27 = vld [vmem:[#allocation5 + $0x68] sm:$0xff]   ;;  %v4332_v29 = vld [vmem:[#allocation5 + $0x60] sm:$0xff]   ;;  %v3923_v41 = vcombine.low %v4519_v19, %v4521_v20  ;;  %v3925_v44 = vcombine.low %v4523_v21, %v60_v23 }
  0x32   :  { %v4331_v28 = vld [vmem:[#allocation5 + $0xe8] sm:$0xff]   ;;  %v4333_v30 = vld [vmem:[#allocation5 + $0xe0] sm:$0xff]   ;;  %v4334_v31 = vld [vmem:[#allocation5 + $0x58] sm:$0xff]  }
  0x33   :  { %2451 = vmatpush1.bf16.msra.mxu0 %v4314_v5  ;;  %2796 = vmatpush1.bf16.msra.mxu1 %v4315_v6  ;;  %v4335_v32 = vld [vmem:[#allocation5 + $0xd8] sm:$0xff]   ;;  %v4336_v33 = vld [vmem:[#allocation5 + $0x50] sm:$0xff]   ;;  %v4338_v35 = vld [vmem:[#allocation5 + $0x48] sm:$0xff]  }
  0x34   :  { %2452 = vmatprep.subr.bf16.mxu0 %v4468_v0  ;;  %2797 = vmatprep.subr.bf16.mxu1 %v4468_v0  ;;  %v4337_v34 = vld [vmem:[#allocation5 + $0xd0] sm:$0xff]   ;;  %v4339_v36 = vld [vmem:[#allocation5 + $0xc8] sm:$0xff]   ;;  %v4340_v37 = vld [vmem:[#allocation5 + $0x40] sm:$0xff]  }
  0x35   :  { %2478 = vmatprep.mubr.bf16.mxu0 %v3924_v22  ;;  %2823 = vmatprep.mubr.bf16.mxu1 %v3926_v25  ;;  %v4341_v38 = vld [vmem:[#allocation5 + $0xc0] sm:$0xff]   ;;  %v64_v42 = vld [vmem:[#allocation2 + $0x48] sm:$0xff]  ;;  %v4342_v45 = vld [vmem:[#allocation5 + $0x138] sm:$0xff]  }
  0x36   :  { %v63_v39 = vld [vmem:[#allocation2 + $0x40] sm:$0xff]  ;;  %v68_v43 = vld [vmem:[#allocation2 + $0x68] sm:$0xff]  ;;  %v4343_v46 = vld [vmem:[#allocation5 + $0x1b8] sm:$0xff]  }
  0x37   :  { %2453 = vmatpush1.bf16.msra.mxu0 %v4316_v7  ;;  %2798 = vmatpush1.bf16.msra.mxu1 %v4317_v8  ;;  %v67_v40 = vld [vmem:[#allocation2 + $0x60] sm:$0xff]  ;;  %v3934_v48 = vcombine.high %v64_v42, %v68_v43  ;;  %v4344_v49 = vld [vmem:[#allocation5 + $0x130] sm:$0xff]   ;;  %v72_v53 = vld [vmem:[#allocation2 + $0x88] sm:$0xff]  ;;  %v3933_v57 = vcombine.low %v64_v42, %v68_v43 }
  0x38   :  { %2454 = vmatprep.subr.bf16.mxu0 %v4468_v0  ;;  %2799 = vmatprep.subr.bf16.mxu1 %v4468_v0  ;;  %v3932_v47 = vcombine.high %v63_v39, %v67_v40  ;;  %v71_v50 = vld [vmem:[#allocation2 + $0x80] sm:$0xff]  ;;  %v4345_v52 = vld [vmem:[#allocation5 + $0x1b0] sm:$0xff]   ;;  %v76_v54 = vld [vmem:[#allocation2 + $0xa8] sm:$0xff]  ;;  %v3931_v55 = vcombine.low %v63_v39, %v67_v40 }
  0x39   :  { %v75_v51 = vld [vmem:[#allocation2 + $0xa0] sm:$0xff]  ;;  %v4346_v56 = vld [vmem:[#allocation5 + $0x128] sm:$0xff]   ;;  %v3942_v60 = vcombine.high %v72_v53, %v76_v54  ;;  %v4350_v5 = vld [vmem:[#allocation5 + $0x118] sm:$0xff]   ;;  %v3941_v6 = vcombine.low %v72_v53, %v76_v54 }
  0x3a   :  { %v3940_v58 = vcombine.high %v71_v50, %v75_v51  ;;  %v4347_v59 = vld [vmem:[#allocation5 + $0x1a8] sm:$0xff]   ;;  %v79_v61 = vld [vmem:[#allocation2 + $0xc0] sm:$0xff]  ;;  %v3939_v4 = vcombine.low %v71_v50, %v75_v51  ;;  %v4351_v8 = vld [vmem:[#allocation5 + $0x198] sm:$0xff]  }
  0x3b   :  { %2455 = vmatpush1.bf16.msra.mxu0 %v4318_v9  ;;  %2800 = vmatpush1.bf16.msra.mxu1 %v4319_v10  ;;  %v83_v62 = vld [vmem:[#allocation2 + $0xe0] sm:$0xff]  ;;  %v80_v63 = vld [vmem:[#allocation2 + $0xc8] sm:$0xff]  ;;  %v4360_v50 = vld [vmem:[#allocation5 + $0x170] sm:$0xff]  }
  0x3c   :  { %2456 = vmatprep.subr.bf16.mxu0 %v4468_v0  ;;  %2801 = vmatprep.subr.bf16.mxu1 %v4468_v0  ;;  %v84_v1 = vld [vmem:[#allocation2 + $0xe8] sm:$0xff]  ;;  %v4348_v2 = vld [vmem:[#allocation5 + $0x120] sm:$0xff]   ;;  %v3948_v7 = vcombine.high %v79_v61, %v83_v62  ;;  %v4361_v51 = vld [vmem:[#allocation5 + $0x1f0] sm:$0xff]  }
  0x3d   :  { %v4349_v3 = vld [vmem:[#allocation5 + $0x1a0] sm:$0xff]   ;;  %v3950_v9 = vcombine.high %v80_v63, %v84_v1  ;;  %v4354_v20 = vld [vmem:[#allocation5 + $0x108] sm:$0xff]  }
  0x3e   :  { %v87_v10 = vld [vmem:[#allocation2 + $0x100] sm:$0xff]  ;;  %v4355_v21 = vld [vmem:[#allocation5 + $0x188] sm:$0xff]  }
  0x3f   :  { %2457 = vmatpush1.bf16.msra.mxu0 %v4320_v11  ;;  %2802 = vmatpush1.bf16.msra.mxu1 %v4321_v12  ;;  %v91_v11 = vld [vmem:[#allocation2 + $0x120] sm:$0xff]  ;;  %v88_v12 = vld [vmem:[#allocation2 + $0x108] sm:$0xff] }
  0x40   :  { %2458 = vmatprep.subr.bf16.mxu0 %v4468_v0  ;;  %2803 = vmatprep.subr.bf16.mxu1 %v4468_v0  ;;  %v95_v22 = vld [vmem:[#allocation2 + $0x140] sm:$0xff]  ;;  %v96_v25 = vld [vmem:[#allocation2 + $0x148] sm:$0xff] }
  0x41   :  { %v99_v23 = vld [vmem:[#allocation2 + $0x160] sm:$0xff]  ;;  %v120_v54 = vld [vmem:[#allocation2 + $0x208] sm:$0xff] }
  0x42   :  { %v111_v42 = vld [vmem:[#allocation2 + $0x1c0] sm:$0xff] }
  0x43   :  { %2459 = vmatpush1.bf16.msra.mxu0 %v4322_v13  ;;  %2804 = vmatpush1.bf16.msra.mxu1 %v4323_v14  ;;  %v92_v13 = vld [vmem:[#allocation2 + $0x128] sm:$0xff]  ;;  %v4352_v14 = vld [vmem:[#allocation5 + $0x110] sm:$0xff]   ;;  %v115_v43 = vld [vmem:[#allocation2 + $0x1e0] sm:$0xff] }
  0x44   :  { %2460 = vmatprep.subr.bf16.mxu0 %v4468_v0  ;;  %2805 = vmatprep.subr.bf16.mxu1 %v4468_v0  ;;  %v3958_v19 = vcombine.high %v88_v12, %v92_v13  ;;  %v123_v53 = vld [vmem:[#allocation2 + $0x220] sm:$0xff] }
  0x47   :  { %2461 = vmatpush1.bf16.msra.mxu0 %v4324_v15  ;;  %2806 = vmatpush1.bf16.msra.mxu1 %v4325_v16  ;;  %v4353_v15 = vld [vmem:[#allocation5 + $0x190] sm:$0xff]   ;;  %v3947_v16 = vcombine.low %v79_v61, %v83_v62  ;;  %v131_v61 = vld [vmem:[#allocation2 + $0x260] sm:$0xff]  ;;  %v128_v62 = vld [vmem:[#allocation2 + $0x248] sm:$0xff] }
  0x48   :  { %2462 = vmatprep.subr.bf16.mxu0 %v4468_v0  ;;  %2807 = vmatprep.subr.bf16.mxu1 %v4468_v0 }
  0x4b   :  { %2463 = vmatpush2.bf16.msra.mxu0 %v4326_v17  ;;  %2808 = vmatpush2.bf16.msra.mxu1 %v4327_v18  ;;  %v3949_v17 = vcombine.low %v80_v63, %v84_v1  ;;  %v3956_v18 = vcombine.high %v87_v10, %v91_v11  ;;  %v132_v63 = vld [vmem:[#allocation2 + $0x268] sm:$0xff] }
  0x4c   :  { %2464 = vmatprep.subr.bf16.mxu0 %v4468_v0  ;;  %2809 = vmatprep.subr.bf16.mxu1 %v4468_v0 }
  0x4f   :  { %2465 = vmatpush2.bf16.msra.mxu0 %v4328_v24  ;;  %2810 = vmatpush2.bf16.msra.mxu1 %v4329_v26  ;;  %v4356_v24 = vld [vmem:[#allocation5 + $0x100] sm:$0xff]   ;;  %v100_v26 = vld [vmem:[#allocation2 + $0x168] sm:$0xff] }
  0x50   :  { %2466 = vmatprep.subr.bf16.mxu0 %v4468_v0  ;;  %2811 = vmatprep.subr.bf16.mxu1 %v4468_v0  ;;  %v3965_v39 = vcombine.low %v96_v25, %v100_v26 }
  0x53   :  { %2467 = vmatpush2.bf16.msra.mxu0 %v4330_v27  ;;  %2812 = vmatpush2.bf16.msra.mxu1 %v4331_v28  ;;  %v4357_v27 = vld [vmem:[#allocation5 + $0x180] sm:$0xff]   ;;  %v3955_v28 = vcombine.low %v87_v10, %v91_v11  ;;  %v3997_v10 = vcombine.low %v128_v62, %v132_v63 }
  0x54   :  { %2468 = vmatprep.subr.bf16.mxu0 %v4468_v0  ;;  %2813 = vmatprep.subr.bf16.mxu1 %v4468_v0 }
  0x57   :  { %2469 = vmatpush2.bf16.msra.mxu0 %v4332_v29  ;;  %2814 = vmatpush2.bf16.msra.mxu1 %v4333_v30  ;;  %v3957_v29 = vcombine.low %v88_v12, %v92_v13  ;;  %v3964_v30 = vcombine.high %v95_v22, %v99_v23  ;;  %v4362_v13 = vld [vmem:[#allocation5 + $0x168] sm:$0xff]  }
  0x58   :  { %2470 = vmatprep.subr.bf16.mxu0 %v4468_v0  ;;  %2815 = vmatprep.subr.bf16.mxu1 %v4468_v0 }
  0x5b   :  { %2471 = vmatpush2.bf16.msra.mxu0 %v4334_v31  ;;  %2816 = vmatpush2.bf16.msra.mxu1 %v4335_v32  ;;  %v3966_v31 = vcombine.high %v96_v25, %v100_v26  ;;  %v4358_v32 = vld [vmem:[#allocation5 + $0x178] sm:$0xff]   ;;  %v152_v25 = vld [vmem:[#allocation2 + $0x308] sm:$0xff] }
  0x5c   :  { %2472 = vmatprep.subr.bf16.mxu0 %v4468_v0  ;;  %2817 = vmatprep.subr.bf16.mxu1 %v4468_v0  ;;  %v156_v26 = vld [vmem:[#allocation2 + $0x328] sm:$0xff] }
  0x5f   :  { %2473 = vmatpush2.bf16.msra.mxu0 %v4336_v33  ;;  %2818 = vmatpush2.bf16.msra.mxu1 %v4337_v34  ;;  %v4359_v33 = vld [vmem:[#allocation5 + $0x1f8] sm:$0xff]   ;;  %v103_v34 = vld [vmem:[#allocation2 + $0x180] sm:$0xff] }
  0x60   :  { %2474 = vmatprep.subr.bf16.mxu0 %v4468_v0  ;;  %2819 = vmatprep.subr.bf16.mxu1 %v4468_v0 }
  0x63   :  { %2475 = vmatpush2.bf16.msra.mxu0 %v4338_v35  ;;  %2820 = vmatpush2.bf16.msra.mxu1 %v4339_v36  ;;  %v107_v35 = vld [vmem:[#allocation2 + $0x1a0] sm:$0xff]  ;;  %v104_v36 = vld [vmem:[#allocation2 + $0x188] sm:$0xff] }
  0x64   :  { %2476 = vmatprep.subr.bf16.mxu0 %v4468_v0  ;;  %2821 = vmatprep.subr.bf16.mxu1 %v4468_v0  ;;  %v3972_v40 = vcombine.high %v103_v34, %v107_v35 }
  0x67   :  { %2477 = vmatpush2.bf16.msra.mxu0 %v4340_v37  ;;  %2822 = vmatpush2.bf16.msra.mxu1 %v4341_v38  ;;  %v108_v37 = vld [vmem:[#allocation2 + $0x1a8] sm:$0xff]  ;;  %v3963_v38 = vcombine.low %v95_v22, %v99_v23  ;;  %v151_v23 = vld [vmem:[#allocation2 + $0x300] sm:$0xff] }
  0x68   :  { %3136 = vmatprep.subr.bf16.mxu0 %v4468_v0  ;;  %3481 = vmatprep.subr.bf16.mxu1 %v4468_v0 }
  0x6a   :  { %2479 = vmatmul.mubr.bf16.vlgmr.msra.gmra.mxu0 %v3923_v41  ;;  %2824 = vmatmul.mubr.bf16.vlgmr.msra.gmra.mxu1 %v3925_v44  ;;  %v3974_v41 = vcombine.high %v104_v36, %v108_v37  ;;  %v112_v44 = vld [vmem:[#allocation2 + $0x1c8] sm:$0xff] }
  0x6b   :  { %3137 = vmatpush1.bf16.msra.mxu0 %v4342_v45  ;;  %3482 = vmatpush1.bf16.msra.mxu1 %v4343_v46  ;;  %v116_v45 = vld [vmem:[#allocation2 + $0x1e8] sm:$0xff]  ;;  %v3971_v46 = vcombine.low %v103_v34, %v107_v35  ;;  %v4364_v35 = vld [vmem:[#allocation5 + $0x160] sm:$0xff]  }
  0x6c   :  { %2486 = vmatprep.mubr.bf16.mxu0 %v3932_v47  ;;  %2831 = vmatprep.mubr.bf16.mxu1 %v3934_v48  ;;  %v3973_v47 = vcombine.low %v104_v36, %v108_v37  ;;  %v3980_v48 = vcombine.high %v111_v42, %v115_v43  ;;  %v164_v34 = vld [vmem:[#allocation2 + $0x368] sm:$0xff]  ;;  %v4365_v36 = vld [vmem:[#allocation5 + $0x1e0] sm:$0xff]  }
  0x6d   :  { %3138 = vmatprep.subr.bf16.mxu0 %v4468_v0  ;;  %3483 = vmatprep.subr.bf16.mxu1 %v4468_v0 }
  0x6f   :  { %3139 = vmatpush1.bf16.msra.mxu0 %v4344_v49  ;;  %3484 = vmatpush1.bf16.msra.mxu1 %v4345_v52  ;;  %v3982_v49 = vcombine.high %v112_v44, %v116_v45  ;;  %v119_v52 = vld [vmem:[#allocation2 + $0x200] sm:$0xff] }
  0x70   :  { %3140 = vmatprep.subr.bf16.mxu0 %v4468_v0  ;;  %3485 = vmatprep.subr.bf16.mxu1 %v4468_v0  ;;  %v3987_v1 = vcombine.low %v119_v52, %v123_v53 }
  0x72   :  { %2487 = vmatmul.mubr.bf16.gmra.mxu0 %v3931_v55  ;;  %2832 = vmatmul.mubr.bf16.gmra.mxu1 %v3933_v57  ;;  %v124_v55 = vld [vmem:[#allocation2 + $0x228] sm:$0xff]  ;;  %v3981_v57 = vcombine.low %v112_v44, %v116_v45 }
  0x73   :  { %2494 = vmatprep.mubr.bf16.mxu0 %v3940_v58  ;;  %2839 = vmatprep.mubr.bf16.mxu1 %v3942_v60  ;;  %v3988_v58 = vcombine.high %v119_v52, %v123_v53  ;;  %v127_v60 = vld [vmem:[#allocation2 + $0x240] sm:$0xff]  ;;  %v172_v44 = vld [vmem:[#allocation2 + $0x3a8] sm:$0xff]  ;;  %v4366_v53 = vld [vmem:[#allocation5 + $0x158] sm:$0xff]  }
  0x74   :  { %3141 = vmatpush1.bf16.msra.mxu0 %v4346_v56  ;;  %3486 = vmatpush1.bf16.msra.mxu1 %v4347_v59  ;;  %v3979_v56 = vcombine.low %v111_v42, %v115_v43  ;;  %v3990_v59 = vcombine.high %v120_v54, %v124_v55  ;;  %v171_v42 = vld [vmem:[#allocation2 + $0x3a0] sm:$0xff]  ;;  %v168_v43 = vld [vmem:[#allocation2 + $0x388] sm:$0xff] }
  0x75   :  { %3142 = vmatprep.subr.bf16.mxu0 %v4468_v0  ;;  %3487 = vmatprep.subr.bf16.mxu1 %v4468_v0  ;;  %v180_v52 = vld [vmem:[#allocation2 + $0x3e8] sm:$0xff] }
  0x78   :  { %3143 = vmatpush1.bf16.msra.mxu0 %v4348_v2  ;;  %3488 = vmatpush1.bf16.msra.mxu1 %v4349_v3  ;;  %v3989_v2 = vcombine.low %v120_v54, %v124_v55  ;;  %v3996_v3 = vcombine.high %v127_v60, %v131_v61  ;;  %v4037_v55 = vcombine.low %v168_v43, %v172_v44 }
  0x79   :  { %3144 = vmatprep.subr.bf16.mxu0 %v4468_v0  ;;  %3489 = vmatprep.subr.bf16.mxu1 %v4468_v0 }
  0x7a   :  { %2495 = vmatmul.mubr.bf16.gmra.mxu0 %v3939_v4  ;;  %2840 = vmatmul.mubr.bf16.gmra.mxu1 %v3941_v6  ;;  %v3998_v4 = vcombine.high %v128_v62, %v132_v63  ;;  %v139_v6 = vld [vmem:[#allocation2 + $0x2a0] sm:$0xff]  ;;  %v188_v62 = vld [vmem:[#allocation2 + $0x428] sm:$0xff] }
  0x7b   :  { %2502 = vmatprep.mubr.bf16.mxu0 %v3948_v7  ;;  %2847 = vmatprep.mubr.bf16.mxu1 %v3950_v9  ;;  %v136_v7 = vld [vmem:[#allocation2 + $0x288] sm:$0xff]  ;;  %v3995_v9 = vcombine.low %v127_v60, %v131_v61  ;;  %v187_v60 = vld [vmem:[#allocation2 + $0x420] sm:$0xff] }
  0x7c   :  { %3145 = vmatpush1.bf16.msra.mxu0 %v4350_v5  ;;  %3490 = vmatpush1.bf16.msra.mxu1 %v4351_v8  ;;  %v135_v5 = vld [vmem:[#allocation2 + $0x280] sm:$0xff]  ;;  %v140_v8 = vld [vmem:[#allocation2 + $0x2a8] sm:$0xff] }
  0x7d   :  { %3146 = vmatprep.subr.bf16.mxu0 %v4468_v0  ;;  %3491 = vmatprep.subr.bf16.mxu1 %v4468_v0  ;;  %v4004_v11 = vcombine.high %v135_v5, %v139_v6  ;;  %v4006_v12 = vcombine.high %v136_v7, %v140_v8  ;;  %v184_v61 = vld [vmem:[#allocation2 + $0x408] sm:$0xff] }
  0x80   :  { %3147 = vmatpush1.bf16.msra.mxu0 %v4352_v14  ;;  %3492 = vmatpush1.bf16.msra.mxu1 %v4353_v15  ;;  %v4363_v14 = vld [vmem:[#allocation5 + $0x1e8] sm:$0xff]   ;;  %v143_v15 = vld [vmem:[#allocation2 + $0x2c0] sm:$0xff] }
  0x81   :  { %3148 = vmatprep.subr.bf16.mxu0 %v4468_v0  ;;  %3493 = vmatprep.subr.bf16.mxu1 %v4468_v0 }
  0x82   :  { %2503 = vmatmul.mubr.bf16.gmra.mxu0 %v3947_v16  ;;  %2848 = vmatmul.mubr.bf16.gmra.mxu1 %v3949_v17  ;;  %v147_v16 = vld [vmem:[#allocation2 + $0x2e0] sm:$0xff]  ;;  %v144_v17 = vld [vmem:[#allocation2 + $0x2c8] sm:$0xff] }
  0x83   :  { %2510 = vmatprep.mubr.bf16.mxu0 %v3956_v18  ;;  %2855 = vmatprep.mubr.bf16.mxu1 %v3958_v19  ;;  %v148_v18 = vld [vmem:[#allocation2 + $0x2e8] sm:$0xff]  ;;  %v4003_v19 = vcombine.low %v135_v5, %v139_v6  ;;  %v195_v5 = vld [vmem:[#allocation2 + $0x460] sm:$0xff] }
  0x84   :  { %3149 = vmatpush1.bf16.msra.mxu0 %v4354_v20  ;;  %3494 = vmatpush1.bf16.msra.mxu1 %v4355_v21  ;;  %v4005_v20 = vcombine.low %v136_v7, %v140_v8  ;;  %v4012_v21 = vcombine.high %v143_v15, %v147_v16  ;;  %v4014_v22 = vcombine.high %v144_v17, %v148_v18  ;;  %v192_v6 = vld [vmem:[#allocation2 + $0x448] sm:$0xff] }
  0x85   :  { %3150 = vmatprep.subr.bf16.mxu0 %v4468_v0  ;;  %3495 = vmatprep.subr.bf16.mxu1 %v4468_v0  ;;  %v196_v7 = vld [vmem:[#allocation2 + $0x468] sm:$0xff] }
  0x88   :  { %3151 = vmatpush1.bf16.msra.mxu0 %v4356_v24  ;;  %3496 = vmatpush1.bf16.msra.mxu1 %v4357_v27  ;;  %v155_v24 = vld [vmem:[#allocation2 + $0x320] sm:$0xff]  ;;  %v4011_v27 = vcombine.low %v143_v15, %v147_v16  ;;  %v200_v15 = vld [vmem:[#allocation2 + $0x488] sm:$0xff] }
  0x89   :  { %3152 = vmatprep.subr.bf16.mxu0 %v4468_v0  ;;  %3497 = vmatprep.subr.bf16.mxu1 %v4468_v0  ;;  %v4019_v37 = vcombine.low %v151_v23, %v155_v24  ;;  %v204_v16 = vld [vmem:[#allocation2 + $0x4a8] sm:$0xff] }
  0x8a   :  { %2511 = vmatmul.mubr.bf16.gmra.mxu0 %v3955_v28  ;;  %2856 = vmatmul.mubr.bf16.gmra.mxu1 %v3957_v29  ;;  %v4013_v28 = vcombine.low %v144_v17, %v148_v18  ;;  %v4020_v29 = vcombine.high %v151_v23, %v155_v24  ;;  %v4369_v17 = vld [vmem:[#allocation5 + $0x1d0] sm:$0xff]   ;;  %v211_v23 = vld [vmem:[#allocation2 + $0x4e0] sm:$0xff]  ;;  %v208_v24 = vld [vmem:[#allocation2 + $0x4c8] sm:$0xff] }
  0x8b   :  { %2518 = vmatprep.mubr.bf16.mxu0 %v3964_v30  ;;  %2863 = vmatprep.mubr.bf16.mxu1 %v3966_v31  ;;  %v4022_v30 = vcombine.high %v152_v25, %v156_v26  ;;  %v159_v31 = vld [vmem:[#allocation2 + $0x340] sm:$0xff] }
  0x8c   :  { %3153 = vmatpush2.bf16.msra.mxu0 %v4358_v32  ;;  %3498 = vmatpush2.bf16.msra.mxu1 %v4359_v33  ;;  %v163_v32 = vld [vmem:[#allocation2 + $0x360] sm:$0xff]  ;;  %v160_v33 = vld [vmem:[#allocation2 + $0x348] sm:$0xff] }
  0x8d   :  { %3154 = vmatprep.subr.bf16.mxu0 %v4468_v0  ;;  %3499 = vmatprep.subr.bf16.mxu1 %v4468_v0  ;;  %v4027_v45 = vcombine.low %v159_v31, %v163_v32 }
  0x90   :  { %3155 = vmatpush2.bf16.msra.mxu0 %v4360_v50  ;;  %3500 = vmatpush2.bf16.msra.mxu1 %v4361_v51  ;;  %v179_v50 = vld [vmem:[#allocation2 + $0x3e0] sm:$0xff]  ;;  %v176_v51 = vld [vmem:[#allocation2 + $0x3c8] sm:$0xff] }
  0x91   :  { %3156 = vmatprep.subr.bf16.mxu0 %v4468_v0  ;;  %3501 = vmatprep.subr.bf16.mxu1 %v4468_v0 }
  0x92   :  { %2519 = vmatmul.mubr.bf16.gmra.mxu0 %v3963_v38  ;;  %2864 = vmatmul.mubr.bf16.gmra.mxu1 %v3965_v39  ;;  %v4021_v38 = vcombine.low %v152_v25, %v156_v26  ;;  %v4028_v39 = vcombine.high %v159_v31, %v163_v32  ;;  %v212_v25 = vld [vmem:[#allocation2 + $0x4e8] sm:$0xff]  ;;  %v219_v31 = vld [vmem:[#allocation2 + $0x520] sm:$0xff] }
  0x93   :  { %2526 = vmatprep.mubr.bf16.mxu0 %v3972_v40  ;;  %2871 = vmatprep.mubr.bf16.mxu1 %v3974_v41  ;;  %v4030_v40 = vcombine.high %v160_v33, %v164_v34  ;;  %v167_v41 = vld [vmem:[#allocation2 + $0x380] sm:$0xff]  ;;  %v216_v32 = vld [vmem:[#allocation2 + $0x508] sm:$0xff] }
  0x94   :  { %3157 = vmatpush2.bf16.msra.mxu0 %v4362_v13  ;;  %3502 = vmatpush2.bf16.msra.mxu1 %v4363_v14  ;;  %v4035_v54 = vcombine.low %v167_v41, %v171_v42  ;;  %v199_v13 = vld [vmem:[#allocation2 + $0x480] sm:$0xff] }
  0x95   :  { %3158 = vmatprep.subr.bf16.mxu0 %v4468_v0  ;;  %3503 = vmatprep.subr.bf16.mxu1 %v4468_v0  ;;  %v203_v14 = vld [vmem:[#allocation2 + $0x4a0] sm:$0xff] }
  0x96   :  { %v4067_v26 = vcombine.low %v199_v13, %v203_v14 }
  0x98   :  { %3159 = vmatpush2.bf16.msra.mxu0 %v4364_v35  ;;  %3504 = vmatpush2.bf16.msra.mxu1 %v4365_v36  ;;  %v4077_v36 = vcombine.low %v208_v24, %v212_v25 }
  0x99   :  { %3160 = vmatprep.subr.bf16.mxu0 %v4468_v0  ;;  %3505 = vmatprep.subr.bf16.mxu1 %v4468_v0 }
  0x9a   :  { %2527 = vmatmul.mubr.bf16.gmra.mxu0 %v3971_v46  ;;  %2872 = vmatmul.mubr.bf16.gmra.mxu1 %v3973_v47  ;;  %v4029_v46 = vcombine.low %v160_v33, %v164_v34  ;;  %v4036_v47 = vcombine.high %v167_v41, %v171_v42  ;;  %v220_v33 = vld [vmem:[#allocation2 + $0x528] sm:$0xff]  ;;  %v227_v41 = vld [vmem:[#allocation2 + $0x560] sm:$0xff] }
  0x9b   :  { %2534 = vmatprep.mubr.bf16.mxu0 %v3980_v48  ;;  %2879 = vmatprep.mubr.bf16.mxu1 %v3982_v49  ;;  %v4038_v48 = vcombine.high %v168_v43, %v172_v44  ;;  %v175_v49 = vld [vmem:[#allocation2 + $0x3c0] sm:$0xff]  ;;  %v4370_v34 = vld [vmem:[#allocation5 + $0x148] sm:$0xff]  }
  0x9c   :  { %3161 = vmatpush2.bf16.msra.mxu0 %v4366_v53  ;;  %v4043_v63 = vcombine.low %v175_v49, %v179_v50  ;;  %v224_v42 = vld [vmem:[#allocation2 + $0x548] sm:$0xff] }
  0x9d   :  { %3162 = vmatprep.subr.bf16.mxu0 %v4468_v0  ;;  %v228_v43 = vld [vmem:[#allocation2 + $0x568] sm:$0xff] }
  0x9e   :  { %v4093_v53 = vcombine.low %v224_v42, %v228_v43 }
  0xa2   :  { %2535 = vmatmul.mubr.bf16.gmra.mxu0 %v3979_v56  ;;  %2880 = vmatmul.mubr.bf16.gmra.mxu1 %v3981_v57  ;;  %v4044_v56 = vcombine.high %v175_v49, %v179_v50  ;;  %v4046_v57 = vcombine.high %v176_v51, %v180_v52  ;;  %v235_v49 = vld [vmem:[#allocation2 + $0x5a0] sm:$0xff]  ;;  %v232_v50 = vld [vmem:[#allocation2 + $0x588] sm:$0xff] }
  0xa3   :  { %2542 = vmatprep.mubr.bf16.mxu0 %v3988_v58  ;;  %2887 = vmatprep.mubr.bf16.mxu1 %v3990_v59  ;;  %v4367_v58 = vld [vmem:[#allocation5 + $0x1d8] sm:$0xff]   ;;  %v183_v59 = vld [vmem:[#allocation2 + $0x400] sm:$0xff] }
  0xa4   :  { %3506 = vmatpush2.bf16.msra.mxu1 %v4367_v58  ;;  %v4051_v8 = vcombine.low %v183_v59, %v187_v60  ;;  %v240_v58 = vld [vmem:[#allocation2 + $0x5c8] sm:$0xff] }
  0xa5   :  { %3507 = vmatprep.subr.bf16.mxu1 %v4468_v0 }
  0xa8   :  { %3508 = vmatpush2.bf16.msra.mxu1 %v4369_v17  ;;  %v4577_v17 = vld [vmem:[#allocation7] ss:$0 sm:$0xff] }
  0xa9   :  { %3509 = vmatprep.subr.bf16.mxu1 %v4468_v0 }
  0xaa   :  { %2543 = vmatmul.mubr.bf16.gmra.mxu0 %v3987_v1  ;;  %2888 = vmatmul.mubr.bf16.gmra.mxu1 %v3989_v2  ;;  %v4045_v1 = vcombine.low %v176_v51, %v180_v52  ;;  %v4052_v2 = vcombine.high %v183_v59, %v187_v60  ;;  %v236_v51 = vld [vmem:[#allocation2 + $0x5a8] sm:$0xff]  ;;  %v4373_v60 = vld [vmem:[#allocation5 + $0x1c0] sm:$0xff]  }
  0xab   :  { %2550 = vmatprep.mubr.bf16.mxu0 %v3996_v3  ;;  %2895 = vmatprep.mubr.bf16.mxu1 %v3998_v4  ;;  %v4054_v3 = vcombine.high %v184_v61, %v188_v62  ;;  %v191_v4 = vld [vmem:[#allocation2 + $0x440] sm:$0xff]  ;;  %v244_v59 = vld [vmem:[#allocation2 + $0x5e8] sm:$0xff] }
  0xac   :  { %v4059_v18 = vcombine.low %v191_v4, %v195_v5 }
  0xb2   :  { %2551 = vmatmul.mubr.bf16.gmra.mxu0 %v3995_v9  ;;  %2896 = vmatmul.mubr.bf16.gmra.mxu1 %v3997_v10  ;;  %v4053_v9 = vcombine.low %v184_v61, %v188_v62  ;;  %v4060_v10 = vcombine.high %v191_v4, %v195_v5  ;;  %v4101_v62 = vcombine.low %v232_v50, %v236_v51  ;;  %v248_v4 = vld [vmem:[#allocation2 + $0x608] sm:$0xff] }
  0xb3   :  { %2558 = vmatprep.mubr.bf16.mxu0 %v4004_v11  ;;  %2903 = vmatprep.mubr.bf16.mxu1 %v4006_v12  ;;  %v4062_v11 = vcombine.high %v192_v6, %v196_v7  ;;  %v4368_v12 = vld [vmem:[#allocation5 + $0x150] sm:$0xff]   ;;  %v252_v5 = vld [vmem:[#allocation2 + $0x628] sm:$0xff] }
  0xb4   :  { %3163 = vmatpush2.bf16.msra.mxu0 %v4368_v12  ;;  %v256_v12 = vld [vmem:[#allocation2 + $0x648] sm:$0xff] }
  0xb5   :  { %3164 = vmatprep.subr.bf16.mxu0 %v4468_v0 }
  0xb8   :  { %3165 = vmatpush2.bf16.msra.mxu0 %v4370_v34 }
  0xb9   :  { %3166 = vmatprep.subr.bf16.mxu0 %v4468_v0 }
  0xba   :  { %2559 = vmatmul.mubr.bf16.gmra.mxu0 %v4003_v19  ;;  %2904 = vmatmul.mubr.bf16.gmra.mxu1 %v4005_v20  ;;  %v4061_v19 = vcombine.low %v192_v6, %v196_v7  ;;  %v4068_v20 = vcombine.high %v199_v13, %v203_v14  ;;  %v4109_v7 = vcombine.low %v240_v58, %v244_v59  ;;  %v260_v13 = vld [vmem:[#allocation2 + $0x668] sm:$0xff] }
  0xbb   :  { %2566 = vmatprep.mubr.bf16.mxu0 %v4012_v21  ;;  %2911 = vmatprep.mubr.bf16.mxu1 %v4014_v22  ;;  %v4070_v21 = vcombine.high %v200_v15, %v204_v16  ;;  %v207_v22 = vld [vmem:[#allocation2 + $0x4c0] sm:$0xff] }
  0xbc   :  { %v4075_v35 = vcombine.low %v207_v22, %v211_v23 }
  0xc2   :  { %2567 = vmatmul.mubr.bf16.gmra.mxu0 %v4011_v27  ;;  %2912 = vmatmul.mubr.bf16.gmra.mxu1 %v4013_v28  ;;  %v4069_v27 = vcombine.low %v200_v15, %v204_v16  ;;  %v4076_v28 = vcombine.high %v207_v22, %v211_v23  ;;  %v4117_v15 = vcombine.low %v248_v4, %v252_v5  ;;  %v263_v23 = vld [vmem:[#allocation2 + $0x680] sm:$0xff] }
  0xc3   :  { %2574 = vmatprep.mubr.bf16.mxu0 %v4020_v29  ;;  %2919 = vmatprep.mubr.bf16.mxu1 %v4022_v30  ;;  %v4078_v29 = vcombine.high %v208_v24, %v212_v25  ;;  %v215_v30 = vld [vmem:[#allocation2 + $0x500] sm:$0xff] }
  0xc4   :  { %v4083_v44 = vcombine.low %v215_v30, %v219_v31  ;;  %v267_v24 = vld [vmem:[#allocation2 + $0x6a0] sm:$0xff] }
  0xc5   :  { %v4132_v34 = vcombine.high %v263_v23, %v267_v24 }
  0xca   :  { %2575 = vmatmul.mubr.bf16.gmra.mxu0 %v4019_v37  ;;  %2920 = vmatmul.mubr.bf16.gmra.mxu1 %v4021_v38  ;;  %v4084_v37 = vcombine.high %v215_v30, %v219_v31  ;;  %v4086_v38 = vcombine.high %v216_v32, %v220_v33 }
  0xcb   :  { %2582 = vmatprep.mubr.bf16.mxu0 %v4028_v39  ;;  %2927 = vmatprep.mubr.bf16.mxu1 %v4030_v40  ;;  %v4371_v39 = vld [vmem:[#allocation5 + $0x1c8] sm:$0xff]   ;;  %v223_v40 = vld [vmem:[#allocation2 + $0x540] sm:$0xff] }
  0xcc   :  { %3510 = vmatpush2.bf16.msra.mxu1 %v4371_v39  ;;  %v4091_v52 = vcombine.low %v223_v40, %v227_v41 }
  0xcd   :  { %3511 = vmatprep.subr.bf16.mxu1 %v4468_v0  ;;  %v239_v0 = vld [vmem:[#allocation2 + $0x5c0] sm:$0xff] }
  0xd0   :  { %3512 = vmatpush2.bf16.msra.mxu1 %v4373_v60 }
  0xd2   :  { %2583 = vmatmul.mubr.bf16.gmra.mxu0 %v4027_v45  ;;  %2928 = vmatmul.mubr.bf16.gmra.mxu1 %v4029_v46  ;;  %v4085_v45 = vcombine.low %v216_v32, %v220_v33  ;;  %v4092_v46 = vcombine.high %v223_v40, %v227_v41  ;;  %v4125_v33 = vcombine.low %v256_v12, %v260_v13 }
  0xd3   :  { %2590 = vmatprep.mubr.bf16.mxu0 %v4036_v47  ;;  %2935 = vmatprep.mubr.bf16.mxu1 %v4038_v48  ;;  %v4094_v47 = vcombine.high %v224_v42, %v228_v43  ;;  %v231_v48 = vld [vmem:[#allocation2 + $0x580] sm:$0xff] }
  0xd4   :  { %v4099_v61 = vcombine.low %v231_v48, %v235_v49  ;;  %v271_v43 = vld [vmem:[#allocation2 + $0x6c0] sm:$0xff] }
  0xda   :  { %2591 = vmatmul.mubr.bf16.gmra.mxu0 %v4035_v54  ;;  %2936 = vmatmul.mubr.bf16.gmra.mxu1 %v4037_v55  ;;  %v4100_v54 = vcombine.high %v231_v48, %v235_v49  ;;  %v4102_v55 = vcombine.high %v232_v50, %v236_v51  ;;  %v276_v48 = vld [vmem:[#allocation2 + $0x6e8] sm:$0xff]  ;;  %v4131_v50 = vcombine.low %v263_v23, %v267_v24 }
  0xdb   :  { %2598 = vmatprep.mubr.bf16.mxu0 %v4044_v56  ;;  %2943 = vmatprep.mubr.bf16.mxu1 %v4046_v57  ;;  %v4372_v56 = vld [vmem:[#allocation5 + $0x140] sm:$0xff]   ;;  %v288_v24 = vld [vmem:[#allocation2 + $0x748] sm:$0xff] }
  0xdc   :  { %v243_v57 = vld [vmem:[#allocation2 + $0x5e0] sm:$0xff]  ;;  %3167 = vmatpush2.bf16.msra.mxu0 %v4372_v56 }
  0xdd   :  { %v4107_v6 = vcombine.low %v239_v0, %v243_v57 }
  0xe2   :  { %2599 = vmatmul.mubr.bf16.gmra.mxu0 %v4043_v63  ;;  %2944 = vmatmul.mubr.bf16.gmra.mxu1 %v4045_v1  ;;  %v4108_v63 = vcombine.high %v239_v0, %v243_v57  ;;  %v4110_v1 = vcombine.high %v240_v58, %v244_v59 }
  0xe3   :  { %2606 = vmatprep.mubr.bf16.mxu0 %v4052_v2  ;;  %2951 = vmatprep.mubr.bf16.mxu1 %v4054_v3  ;;  %v247_v2 = vld [vmem:[#allocation2 + $0x600] sm:$0xff] }
  0xe4   :  { %v251_v3 = vld [vmem:[#allocation2 + $0x620] sm:$0xff] }
  0xe5   :  { %v4115_v14 = vcombine.low %v247_v2, %v251_v3 }
  0xea   :  { %2607 = vmatmul.mubr.bf16.gmra.mxu0 %v4051_v8  ;;  %2952 = vmatmul.mubr.bf16.gmra.mxu1 %v4053_v9  ;;  %v4116_v8 = vcombine.high %v247_v2, %v251_v3  ;;  %v4118_v9 = vcombine.high %v248_v4, %v252_v5  ;;  %v280_v3 = vld [vmem:[#allocation2 + $0x708] sm:$0xff] }
  0xeb   :  { %2614 = vmatprep.mubr.bf16.mxu0 %v4060_v10  ;;  %2959 = vmatprep.mubr.bf16.mxu1 %v4062_v11  ;;  %v255_v10 = vld [vmem:[#allocation2 + $0x640] sm:$0xff]  ;;  %v284_v4 = vld [vmem:[#allocation2 + $0x728] sm:$0xff] }
  0xec   :  { %v259_v11 = vld [vmem:[#allocation2 + $0x660] sm:$0xff] }
  0xed   :  { %v4124_v16 = vcombine.high %v255_v10, %v259_v11  ;;  %v4123_v30 = vcombine.low %v255_v10, %v259_v11 }
  0xf2   :  { %2615 = vmatmul.mubr.bf16.gmra.mxu0 %v4059_v18  ;;  %2960 = vmatmul.mubr.bf16.gmra.mxu1 %v4061_v19  ;;  %v4126_v18 = vcombine.high %v256_v12, %v260_v13  ;;  %v4150_v12 = vcombine.high %v280_v3, %v284_v4 }
  0xf3   :  { %2622 = vmatprep.mubr.bf16.mxu0 %v4068_v20  ;;  %2967 = vmatprep.mubr.bf16.mxu1 %v4070_v21 }
  0xfa   :  { %2623 = vmatmul.mubr.bf16.gmra.mxu0 %v4067_v26  ;;  %2968 = vmatmul.mubr.bf16.gmra.mxu1 %v4069_v27  ;;  %v264_v27 = vld [vmem:[#allocation2 + $0x688] sm:$0xff] }
  0xfb   :  { %2630 = vmatprep.mubr.bf16.mxu0 %v4076_v28  ;;  %2975 = vmatprep.mubr.bf16.mxu1 %v4078_v29  ;;  %v268_v28 = vld [vmem:[#allocation2 + $0x6a8] sm:$0xff] }
 0x102   :  { %2631 = vmatmul.mubr.bf16.gmra.mxu0 %v4075_v35  ;;  %2976 = vmatmul.mubr.bf16.gmra.mxu1 %v4077_v36  ;;  %v4134_v36 = vcombine.high %v264_v27, %v268_v28 }
 0x103   :  { %2638 = vmatprep.mubr.bf16.mxu0 %v4084_v37  ;;  %2983 = vmatprep.mubr.bf16.mxu1 %v4086_v38 }
 0x10a   :  { %2639 = vmatmul.mubr.bf16.gmra.mxu0 %v4083_v44  ;;  %2984 = vmatmul.mubr.bf16.gmra.mxu1 %v4085_v45  ;;  %v275_v44 = vld [vmem:[#allocation2 + $0x6e0] sm:$0xff] }
 0x10b   :  { %2646 = vmatprep.mubr.bf16.mxu0 %v4092_v46  ;;  %2991 = vmatprep.mubr.bf16.mxu1 %v4094_v47  ;;  %v272_v47 = vld [vmem:[#allocation2 + $0x6c8] sm:$0xff] }
 0x10c   :  { %v4142_v56 = vcombine.high %v272_v47, %v276_v48 }
 0x112   :  { %2647 = vmatmul.mubr.bf16.gmra.mxu0 %v4091_v52  ;;  %2992 = vmatmul.mubr.bf16.gmra.mxu1 %v4093_v53  ;;  %v4133_v53 = vcombine.low %v264_v27, %v268_v28 }
 0x113   :  { %2654 = vmatprep.mubr.bf16.mxu0 %v4100_v54  ;;  %2999 = vmatprep.mubr.bf16.mxu1 %v4102_v55  ;;  %v4140_v54 = vcombine.high %v271_v43, %v275_v44 }
 0x11a   :  { %2655 = vmatmul.mubr.bf16.gmra.mxu0 %v4099_v61  ;;  %3000 = vmatmul.mubr.bf16.gmra.mxu1 %v4101_v62  ;;  %v279_v62 = vld [vmem:[#allocation2 + $0x700] sm:$0xff] }
 0x11b   :  { %2662 = vmatprep.mubr.bf16.mxu0 %v4108_v63  ;;  %3007 = vmatprep.mubr.bf16.mxu1 %v4110_v1  ;;  %v283_v63 = vld [vmem:[#allocation2 + $0x720] sm:$0xff] }
 0x11c   :  { %v4148_v10 = vcombine.high %v279_v62, %v283_v63  ;;  %v4147_v28 = vcombine.low %v279_v62, %v283_v63  ;;  %v303_v63 = vld [vmem:[#allocation2 + $0x7c0] sm:$0xff] }
 0x122   :  { %2663 = vmatmul.mubr.bf16.gmra.mxu0 %v4107_v6  ;;  %3008 = vmatmul.mubr.bf16.gmra.mxu1 %v4109_v7  ;;  %v4139_v6 = vcombine.low %v271_v43, %v275_v44  ;;  %v299_v43 = vld [vmem:[#allocation2 + $0x7a0] sm:$0xff] }
 0x123   :  { %2670 = vmatprep.mubr.bf16.mxu0 %v4116_v8  ;;  %3015 = vmatprep.mubr.bf16.mxu1 %v4118_v9  ;;  %v4141_v9 = vcombine.low %v272_v47, %v276_v48  ;;  %v296_v47 = vld [vmem:[#allocation2 + $0x788] sm:$0xff] }
 0x124   :  { %v300_v48 = vld [vmem:[#allocation2 + $0x7a8] sm:$0xff] }
 0x12a   :  { %v2480_v19 = vpop.f32.mrf.mxu0  ;;  %2671 = vmatmul.mubr.bf16.gmra.mxu0 %v4115_v14  ;;  %v2825_v21 = vpop.f32.mrf.mxu1  ;;  %3016 = vmatmul.mubr.bf16.gmra.mxu1 %v4117_v15 }
 0x12b   :  { %v2481_v20 = vadd.f32 %v4577_v17, %v2480_v19  ;;  %2678 = vmatprep.mubr.bf16.mxu0 %v4124_v16  ;;  %3023 = vmatprep.mubr.bf16.mxu1 %v4126_v18 }
 0x12c   :  { %v2482_v22 = vpop.f32.mrf.mxu0  ;;  %v2827_v26 = vpop.f32.mrf.mxu1 }
 0x12d   :  { %v4580_v25 = vadd.f32 %v2825_v21, %v2481_v20  ;;  %v287_v20 = vld [vmem:[#allocation2 + $0x740] sm:$0xff]  ;;  %v292_v26 = vld [vmem:[#allocation2 + $0x768] sm:$0xff] }
 0x12e   :  { %v2483_v29 = vpop.f32.mrf.mxu0  ;;  %v2828_v32 = vpop.f32.mrf.mxu1  ;;  %v291_v21 = vld [vmem:[#allocation2 + $0x760] sm:$0xff] }
 0x12f   :  { %v2484_v31 = vadd.f32 %v4577_v17, %v2483_v29 }
 0x130   :  { %v2485_v35 = vpop.f32.mrf.mxu0  ;;  %v2830_v38 = vpop.f32.mrf.mxu1 }
 0x131   :  { %v4583_v37 = vadd.f32 %v2828_v32, %v2484_v31  ;;  %v4149_v31 = vcombine.low %v280_v3, %v284_v4  ;;  %v4156_v32 = vcombine.high %v287_v20, %v291_v21 }
 0x132   :  { %v2488_v39 = vpop.f32.mrf.mxu0  ;;  %2679 = vmatmul.mubr.bf16.gmra.mxu0 %v4123_v30  ;;  %v2833_v41 = vpop.f32.mrf.mxu1  ;;  %3024 = vmatmul.mubr.bf16.gmra.mxu1 %v4125_v33 }
 0x133   :  { %v2489_v40 = vadd.f32 %v4577_v17, %v2488_v39  ;;  %2686 = vmatprep.mubr.bf16.mxu0 %v4132_v34  ;;  %3031 = vmatprep.mubr.bf16.mxu1 %v4134_v36  ;;  %v4158_v34 = vcombine.high %v288_v24, %v292_v26 }
 0x134   :  { %v2490_v42 = vpop.f32.mrf.mxu0  ;;  %v2835_v46 = vpop.f32.mrf.mxu1 }
 0x135   :  { %v4586_v45 = vadd.f32 %v2833_v41, %v2489_v40  ;;  %v295_v42 = vld [vmem:[#allocation2 + $0x780] sm:$0xff] }
 0x136   :  { %v2491_v49 = vpop.f32.mrf.mxu0  ;;  %v2836_v52 = vpop.f32.mrf.mxu1 }
 0x137   :  { %v2492_v51 = vadd.f32 %v4577_v17, %v2491_v49 }
 0x138   :  { %v2493_v55 = vpop.f32.mrf.mxu0  ;;  %v2838_v57 = vpop.f32.mrf.mxu1 }
 0x139   :  { %v4589_v0 = vadd.f32 %v2836_v52, %v2492_v51 }
 0x13a   :  { %v2496_v58 = vpop.f32.mrf.mxu0  ;;  %2687 = vmatmul.mubr.bf16.gmra.mxu0 %v4131_v50  ;;  %v2841_v60 = vpop.f32.mrf.mxu1  ;;  %3032 = vmatmul.mubr.bf16.gmra.mxu1 %v4133_v53  ;;  %v4155_v50 = vcombine.low %v287_v20, %v291_v21  ;;  %v4157_v53 = vcombine.low %v288_v24, %v292_v26  ;;  %v311_v24 = vld [vmem:[#allocation2 + $0x800] sm:$0xff] }
 0x13b   :  { %v2497_v59 = vadd.f32 %v4577_v17, %v2496_v58  ;;  %2694 = vmatprep.mubr.bf16.mxu0 %v4140_v54  ;;  %3039 = vmatprep.mubr.bf16.mxu1 %v4142_v56  ;;  %v4164_v54 = vcombine.high %v295_v42, %v299_v43  ;;  %v4166_v56 = vcombine.high %v296_v47, %v300_v48  ;;  %v315_v26 = vld [vmem:[#allocation2 + $0x820] sm:$0xff] }
 0x13c   :  { %v2498_v61 = vpop.f32.mrf.mxu0  ;;  %v2843_v2 = vpop.f32.mrf.mxu1 }
 0x13d   :  { %v4592_v1 = vadd.f32 %v2841_v60, %v2497_v59  ;;  %v307_v2 = vld [vmem:[#allocation2 + $0x7e0] sm:$0xff] }
 0x13e   :  { %v2499_v5 = vpop.f32.mrf.mxu0  ;;  %v2844_v8 = vpop.f32.mrf.mxu1 }
 0x13f   :  { %v2500_v7 = vadd.f32 %v4577_v17, %v2499_v5  ;;  %v304_v5 = vld [vmem:[#allocation2 + $0x7c8] sm:$0xff] }
 0x140   :  { %v2501_v11 = vpop.f32.mrf.mxu0  ;;  %v2846_v14 = vpop.f32.mrf.mxu1 }
 0x141   :  { %v4595_v13 = vadd.f32 %v2844_v8, %v2500_v7  ;;  %v4163_v8 = vcombine.low %v295_v42, %v299_v43  ;;  %v4165_v11 = vcombine.low %v296_v47, %v300_v48 }
 0x142   :  { %v2504_v15 = vpop.f32.mrf.mxu0  ;;  %2695 = vmatmul.mubr.bf16.gmra.mxu0 %v4139_v6  ;;  %v2849_v18 = vpop.f32.mrf.mxu1  ;;  %3040 = vmatmul.mubr.bf16.gmra.mxu1 %v4141_v9  ;;  %v308_v6 = vld [vmem:[#allocation2 + $0x7e8] sm:$0xff] }
 0x143   :  { %v2505_v16 = vadd.f32 %v4577_v17, %v2504_v15  ;;  %2702 = vmatprep.mubr.bf16.mxu0 %v4148_v10  ;;  %3047 = vmatprep.mubr.bf16.mxu1 %v4150_v12  ;;  %v4172_v12 = vcombine.high %v303_v63, %v307_v2  ;;  %v4174_v15 = vcombine.high %v304_v5, %v308_v6 }
 0x144   :  { %v2506_v19 = vpop.f32.mrf.mxu0  ;;  %v2851_v23 = vpop.f32.mrf.mxu1 }
 0x145   :  { %v4598_v22 = vadd.f32 %v2849_v18, %v2505_v16 }
 0x146   :  { %v2507_v27 = vpop.f32.mrf.mxu0  ;;  %v2852_v30 = vpop.f32.mrf.mxu1 }
 0x147   :  { %v2508_v29 = vadd.f32 %v4577_v17, %v2507_v27 }
 0x148   :  { %v2509_v33 = vpop.f32.mrf.mxu0  ;;  %v2854_v36 = vpop.f32.mrf.mxu1 }
 0x149   :  { %v4601_v35 = vadd.f32 %v2852_v30, %v2508_v29  ;;  %v312_v29 = vld [vmem:[#allocation2 + $0x808] sm:$0xff]  ;;  %v4173_v36 = vcombine.low %v304_v5, %v308_v6 }
 0x14a   :  { %v2512_v38 = vpop.f32.mrf.mxu0  ;;  %2703 = vmatmul.mubr.bf16.gmra.mxu0 %v4147_v28  ;;  %v2857_v40 = vpop.f32.mrf.mxu1  ;;  %3048 = vmatmul.mubr.bf16.gmra.mxu1 %v4149_v31  ;;  %v316_v30 = vld [vmem:[#allocation2 + $0x828] sm:$0xff] }
 0x14b   :  { %v2513_v39 = vadd.f32 %v4577_v17, %v2512_v38  ;;  %2710 = vmatprep.mubr.bf16.mxu0 %v4156_v32  ;;  %3055 = vmatprep.mubr.bf16.mxu1 %v4158_v34  ;;  %v4171_v32 = vcombine.low %v303_v63, %v307_v2  ;;  %v4180_v38 = vcombine.high %v311_v24, %v315_v26 }
 0x14c   :  { %v2514_v41 = vpop.f32.mrf.mxu0  ;;  %v2859_v46 = vpop.f32.mrf.mxu1 }
 0x14d   :  { %v4604_v44 = vadd.f32 %v2857_v40, %v2513_v39  ;;  %v4182_v40 = vcombine.high %v312_v29, %v316_v30 }
 0x14e   :  { %v2515_v49 = vpop.f32.mrf.mxu0  ;;  %v2860_v52 = vpop.f32.mrf.mxu1 }
 0x14f   :  { %v2516_v51 = vadd.f32 %v4577_v17, %v2515_v49  ;;  %v319_v49 = vld [vmem:[#allocation2 + $0x840] sm:$0xff] }
 0x150   :  { %v2517_v55 = vpop.f32.mrf.mxu0  ;;  %v2862_v58 = vpop.f32.mrf.mxu1 }
 0x151   :  { %v4607_v57 = vadd.f32 %v2860_v52, %v2516_v51 }
 0x152   :  { %v2520_v59 = vpop.f32.mrf.mxu0  ;;  %2711 = vmatmul.mubr.bf16.gmra.mxu0 %v4155_v50  ;;  %v2865_v61 = vpop.f32.mrf.mxu1  ;;  %3056 = vmatmul.mubr.bf16.gmra.mxu1 %v4157_v53  ;;  %v323_v50 = vld [vmem:[#allocation2 + $0x860] sm:$0xff]  ;;  %v320_v53 = vld [vmem:[#allocation2 + $0x848] sm:$0xff] }
 0x153   :  { %v2521_v60 = vadd.f32 %v4577_v17, %v2520_v59  ;;  %2718 = vmatprep.mubr.bf16.mxu0 %v4164_v54  ;;  %3063 = vmatprep.mubr.bf16.mxu1 %v4166_v56  ;;  %v324_v54 = vld [vmem:[#allocation2 + $0x868] sm:$0xff]  ;;  %v4179_v56 = vcombine.low %v311_v24, %v315_v26 }
 0x154   :  { %v2522_v62 = vpop.f32.mrf.mxu0  ;;  %v2867_v4 = vpop.f32.mrf.mxu1  ;;  %v4190_v63 = vcombine.high %v320_v53, %v324_v54 }
 0x155   :  { %v4610_v3 = vadd.f32 %v2865_v61, %v2521_v60  ;;  %v4181_v60 = vcombine.low %v312_v29, %v316_v30  ;;  %v4188_v61 = vcombine.high %v319_v49, %v323_v50 }
 0x156   :  { %v2523_v7 = vpop.f32.mrf.mxu0  ;;  %v2868_v10 = vpop.f32.mrf.mxu1 }
 0x157   :  { %v2524_v9 = vadd.f32 %v4577_v17, %v2523_v7 }
 0x158   :  { %v2525_v14 = vpop.f32.mrf.mxu0  ;;  %v2870_v18 = vpop.f32.mrf.mxu1 }
 0x159   :  { %v4613_v16 = vadd.f32 %v2868_v10, %v2524_v9  ;;  %v327_v9 = vld [vmem:[#allocation2 + $0x880] sm:$0xff]  ;;  %v328_v14 = vld [vmem:[#allocation2 + $0x888] sm:$0xff] }
 0x15a   :  { %v2528_v19 = vpop.f32.mrf.mxu0  ;;  %2719 = vmatmul.mubr.bf16.gmra.mxu0 %v4163_v8  ;;  %v2873_v21 = vpop.f32.mrf.mxu1  ;;  %3064 = vmatmul.mubr.bf16.gmra.mxu1 %v4165_v11  ;;  %v331_v10 = vld [vmem:[#allocation2 + $0x8a0] sm:$0xff] }
 0x15b   :  { %v2529_v20 = vadd.f32 %v4577_v17, %v2528_v19  ;;  %2726 = vmatprep.mubr.bf16.mxu0 %v4172_v12  ;;  %3071 = vmatprep.mubr.bf16.mxu1 %v4174_v15  ;;  %v332_v15 = vld [vmem:[#allocation2 + $0x8a8] sm:$0xff]  ;;  %v4187_v19 = vcombine.low %v319_v49, %v323_v50  ;;  %v4196_v24 = vcombine.high %v327_v9, %v331_v10 }
 0x15c   :  { %v2530_v23 = vpop.f32.mrf.mxu0  ;;  %v2875_v28 = vpop.f32.mrf.mxu1  ;;  %v4197_v50 = vcombine.low %v328_v14, %v332_v15 }
 0x15d   :  { %v4616_v27 = vadd.f32 %v2873_v21, %v2529_v20  ;;  %v4189_v23 = vcombine.low %v320_v53, %v324_v54  ;;  %v4198_v28 = vcombine.high %v328_v14, %v332_v15 }
 0x15e   :  { %v2531_v31 = vpop.f32.mrf.mxu0  ;;  %v2876_v34 = vpop.f32.mrf.mxu1 }
 0x15f   :  { %v2532_v33 = vadd.f32 %v4577_v17, %v2531_v31 }
 0x160   :  { %v2533_v39 = vpop.f32.mrf.mxu0  ;;  %v2878_v42 = vpop.f32.mrf.mxu1 }
 0x161   :  { %v4619_v41 = vadd.f32 %v2876_v34, %v2532_v33  ;;  %v336_v42 = vld [vmem:[#allocation2 + $0x8c8] sm:$0xff] }
 0x162   :  { %v2536_v43 = vpop.f32.mrf.mxu0  ;;  %2727 = vmatmul.mubr.bf16.gmra.mxu0 %v4171_v32  ;;  %v2881_v47 = vpop.f32.mrf.mxu1  ;;  %3072 = vmatmul.mubr.bf16.gmra.mxu1 %v4173_v36  ;;  %v335_v36 = vld [vmem:[#allocation2 + $0x8c0] sm:$0xff] }
 0x163   :  { %v2537_v46 = vadd.f32 %v4577_v17, %v2536_v43  ;;  %2734 = vmatprep.mubr.bf16.mxu0 %v4180_v38  ;;  %3079 = vmatprep.mubr.bf16.mxu1 %v4182_v40  ;;  %v339_v38 = vld [vmem:[#allocation2 + $0x8e0] sm:$0xff]  ;;  %v340_v43 = vld [vmem:[#allocation2 + $0x8e8] sm:$0xff] }
 0x164   :  { %v2538_v48 = vpop.f32.mrf.mxu0  ;;  %v2883_v52 = vpop.f32.mrf.mxu1  ;;  %v4206_v54 = vcombine.high %v336_v42, %v340_v43  ;;  %v4205_v14 = vcombine.low %v336_v42, %v340_v43 }
 0x165   :  { %v4622_v51 = vadd.f32 %v2881_v47, %v2537_v46  ;;  %v4195_v47 = vcombine.low %v327_v9, %v331_v10  ;;  %v4204_v52 = vcombine.high %v335_v36, %v339_v38  ;;  %v4203_v9 = vcombine.low %v335_v36, %v339_v38  ;;  %v356_v36 = vld [vmem:[#allocation2 + $0x968] sm:$0xff] }
 0x166   :  { %v2539_v55 = vpop.f32.mrf.mxu0  ;;  %v2884_v59 = vpop.f32.mrf.mxu1 }
 0x167   :  { %v2540_v58 = vadd.f32 %v4577_v17, %v2539_v55 }
 0x168   :  { %v2541_v62 = vpop.f32.mrf.mxu0  ;;  %v2886_v4 = vpop.f32.mrf.mxu1 }
 0x169   :  { %v4625_v2 = vadd.f32 %v2884_v59, %v2540_v58  ;;  %v343_v62 = vld [vmem:[#allocation2 + $0x900] sm:$0xff] }
 0x16a   :  { %v2544_v5 = vpop.f32.mrf.mxu0  ;;  %2735 = vmatmul.mubr.bf16.gmra.mxu0 %v4179_v56  ;;  %v2889_v7 = vpop.f32.mrf.mxu1  ;;  %3080 = vmatmul.mubr.bf16.gmra.mxu1 %v4181_v60 }
 0x16b   :  { %v2545_v6 = vadd.f32 %v4577_v17, %v2544_v5  ;;  %2742 = vmatprep.mubr.bf16.mxu0 %v4188_v61  ;;  %3087 = vmatprep.mubr.bf16.mxu1 %v4190_v63  ;;  %v347_v63 = vld [vmem:[#allocation2 + $0x920] sm:$0xff] }
 0x16c   :  { %v2546_v8 = vpop.f32.mrf.mxu0  ;;  %v2891_v12 = vpop.f32.mrf.mxu1  ;;  %v4212_v15 = vcombine.high %v343_v62, %v347_v63 }
 0x16d   :  { %v4628_v11 = vadd.f32 %v2889_v7, %v2545_v6  ;;  %v344_v6 = vld [vmem:[#allocation2 + $0x908] sm:$0xff] }
 0x16e   :  { %v2547_v18 = vpop.f32.mrf.mxu0  ;;  %v2892_v21 = vpop.f32.mrf.mxu1  ;;  %v348_v7 = vld [vmem:[#allocation2 + $0x928] sm:$0xff] }
 0x16f   :  { %v2548_v20 = vadd.f32 %v4577_v17, %v2547_v18 }
 0x170   :  { %v2549_v26 = vpop.f32.mrf.mxu0  ;;  %v2894_v30 = vpop.f32.mrf.mxu1 }
 0x171   :  { %v4631_v29 = vadd.f32 %v2892_v21, %v2548_v20  ;;  %v351_v30 = vld [vmem:[#allocation2 + $0x940] sm:$0xff] }
 0x172   :  { %v2552_v31 = vpop.f32.mrf.mxu0  ;;  %2743 = vmatmul.mubr.bf16.gmra.mxu0 %v4187_v19  ;;  %v2897_v33 = vpop.f32.mrf.mxu1  ;;  %3088 = vmatmul.mubr.bf16.gmra.mxu1 %v4189_v23  ;;  %v4214_v19 = vcombine.high %v344_v6, %v348_v7 }
 0x173   :  { %v2553_v32 = vadd.f32 %v4577_v17, %v2552_v31  ;;  %2750 = vmatprep.mubr.bf16.mxu0 %v4196_v24  ;;  %3095 = vmatprep.mubr.bf16.mxu1 %v4198_v28  ;;  %v355_v31 = vld [vmem:[#allocation2 + $0x960] sm:$0xff] }
 0x174   :  { %v2554_v34 = vpop.f32.mrf.mxu0  ;;  %v2899_v40 = vpop.f32.mrf.mxu1 }
 0x175   :  { %v4634_v39 = vadd.f32 %v2897_v33, %v2553_v32  ;;  %v352_v34 = vld [vmem:[#allocation2 + $0x948] sm:$0xff]  ;;  %v4211_v40 = vcombine.low %v343_v62, %v347_v63 }
 0x176   :  { %v2555_v46 = vpop.f32.mrf.mxu0  ;;  %v2900_v49 = vpop.f32.mrf.mxu1  ;;  %v360_v63 = vld [vmem:[#allocation2 + $0x988] sm:$0xff] }
 0x177   :  { %v2556_v48 = vadd.f32 %v4577_v17, %v2555_v46  ;;  %v4213_v46 = vcombine.low %v344_v6, %v348_v7  ;;  %v4219_v7 = vcombine.low %v351_v30, %v355_v31 }
 0x178   :  { %v2557_v53 = vpop.f32.mrf.mxu0  ;;  %v2902_v56 = vpop.f32.mrf.mxu1 }
 0x179   :  { %v4637_v55 = vadd.f32 %v2900_v49, %v2556_v48  ;;  %v4222_v49 = vcombine.high %v352_v34, %v356_v36 }
 0x17a   :  { %v2560_v58 = vpop.f32.mrf.mxu0  ;;  %2751 = vmatmul.mubr.bf16.gmra.mxu0 %v4195_v47  ;;  %v2905_v60 = vpop.f32.mrf.mxu1  ;;  %3096 = vmatmul.mubr.bf16.gmra.mxu1 %v4197_v50  ;;  %v4220_v47 = vcombine.high %v351_v30, %v355_v31  ;;  %v61_v30 = vld [vmem:[#allocation2 + $0x30] sm:$0xff] }
 0x17b   :  { %v2561_v59 = vadd.f32 %v4577_v17, %v2560_v58  ;;  %2758 = vmatprep.mubr.bf16.mxu0 %v4204_v52  ;;  %3103 = vmatprep.mubr.bf16.mxu1 %v4206_v54 }
 0x17c   :  { %v2562_v61 = vpop.f32.mrf.mxu0  ;;  %v2907_v5 = vpop.f32.mrf.mxu1 }
 0x17d   :  { %v4640_v4 = vadd.f32 %v2905_v60, %v2561_v59  ;;  %v359_v59 = vld [vmem:[#allocation2 + $0x980] sm:$0xff]  ;;  %v364_v5 = vld [vmem:[#allocation2 + $0x9a8] sm:$0xff] }
 0x17e   :  { %v2563_v8 = vpop.f32.mrf.mxu0  ;;  %v2908_v12 = vpop.f32.mrf.mxu1  ;;  %v363_v60 = vld [vmem:[#allocation2 + $0x9a0] sm:$0xff] }
 0x17f   :  { %v2564_v10 = vadd.f32 %v4577_v17, %v2563_v8 }
 0x180   :  { %v2565_v18 = vpop.f32.mrf.mxu0  ;;  %v2910_v21 = vpop.f32.mrf.mxu1 }
 0x181   :  { %v4643_v20 = vadd.f32 %v2908_v12, %v2564_v10  ;;  %v4221_v10 = vcombine.low %v352_v34, %v356_v36  ;;  %v4228_v12 = vcombine.high %v359_v59, %v363_v60  ;;  %v58_v34 = vld [vmem:[#allocation2 + $0x18] sm:$0xff] }
 0x182   :  { %v2568_v23 = vpop.f32.mrf.mxu0  ;;  %2759 = vmatmul.mubr.bf16.gmra.mxu0 %v4203_v9  ;;  %v2913_v26 = vpop.f32.mrf.mxu1  ;;  %3104 = vmatmul.mubr.bf16.gmra.mxu1 %v4205_v14  ;;  %v62_v36 = vld [vmem:[#allocation2 + $0x38] sm:$0xff] }
 0x183   :  { %v2569_v24 = vadd.f32 %v4577_v17, %v2568_v23  ;;  %2766 = vmatprep.mubr.bf16.mxu0 %v4212_v15  ;;  %3111 = vmatprep.mubr.bf16.mxu1 %v4214_v19  ;;  %v4230_v15 = vcombine.high %v360_v63, %v364_v5 }
 0x184   :  { %v2570_v28 = vpop.f32.mrf.mxu0  ;;  %v2915_v33 = vpop.f32.mrf.mxu1 }
 0x185   :  { %v4646_v32 = vadd.f32 %v2913_v26, %v2569_v24  ;;  %v57_v28 = vld [vmem:[#allocation2 + $0x10] sm:$0xff] }
 0x186   :  { %v2571_v38 = vpop.f32.mrf.mxu0  ;;  %v2916_v43 = vpop.f32.mrf.mxu1 }
 0x187   :  { %v2572_v42 = vadd.f32 %v4577_v17, %v2571_v38 }
 0x188   :  { %v2573_v48 = vpop.f32.mrf.mxu0  ;;  %v2918_v52 = vpop.f32.mrf.mxu1 }
 0x189   :  { %v4649_v50 = vadd.f32 %v2916_v43, %v2572_v42 }
 0x18a   :  { %v2576_v53 = vpop.f32.mrf.mxu0  ;;  %2767 = vmatmul.mubr.bf16.gmra.mxu0 %v4211_v40  ;;  %v2921_v56 = vpop.f32.mrf.mxu1  ;;  %3112 = vmatmul.mubr.bf16.gmra.mxu1 %v4213_v46  ;;  %v4227_v40 = vcombine.low %v359_v59, %v363_v60  ;;  %v4229_v46 = vcombine.low %v360_v63, %v364_v5  ;;  %v65_v59 = vld [vmem:[#allocation2 + $0x50] sm:$0xff]  ;;  %v66_v5 = vld [vmem:[#allocation2 + $0x58] sm:$0xff] }
 0x18b   :  { %v2577_v54 = vadd.f32 %v4577_v17, %v2576_v53  ;;  %2774 = vmatprep.mubr.bf16.mxu0 %v4220_v47  ;;  %3119 = vmatprep.mubr.bf16.mxu1 %v4222_v49  ;;  %v3928_v47 = vcombine.high %v57_v28, %v61_v30  ;;  %v3930_v49 = vcombine.high %v58_v34, %v62_v36  ;;  %v69_v60 = vld [vmem:[#allocation2 + $0x70] sm:$0xff] }
 0x18c   :  { %v2578_v58 = vpop.f32.mrf.mxu0  ;;  %v2923_v62 = vpop.f32.mrf.mxu1 }
 0x18d   :  { %v4652_v61 = vadd.f32 %v2921_v56, %v2577_v54 }
 0x18e   :  { %v2579_v6 = vpop.f32.mrf.mxu0  ;;  %v2924_v9 = vpop.f32.mrf.mxu1 }
 0x18f   :  { %v2580_v8 = vadd.f32 %v4577_v17, %v2579_v6 }
 0x190   :  { %v2581_v14 = vpop.f32.mrf.mxu0  ;;  %v2926_v19 = vpop.f32.mrf.mxu1 }
 0x191   :  { %v4655_v18 = vadd.f32 %v2924_v9, %v2580_v8  ;;  %v3927_v9 = vcombine.low %v57_v28, %v61_v30  ;;  %v3929_v14 = vcombine.low %v58_v34, %v62_v36  ;;  %v73_v28 = vld [vmem:[#allocation2 + $0x90] sm:$0xff]  ;;  %v74_v36 = vld [vmem:[#allocation2 + $0x98] sm:$0xff] }
 0x192   :  { %v2584_v21 = vpop.f32.mrf.mxu0  ;;  %2775 = vmatmul.mubr.bf16.gmra.mxu0 %v4219_v7  ;;  %v2929_v24 = vpop.f32.mrf.mxu1  ;;  %3120 = vmatmul.mubr.bf16.gmra.mxu1 %v4221_v10  ;;  %v70_v7 = vld [vmem:[#allocation2 + $0x78] sm:$0xff]  ;;  %v77_v30 = vld [vmem:[#allocation2 + $0xb0] sm:$0xff] }
 0x193   :  { %v2585_v23 = vadd.f32 %v4577_v17, %v2584_v21  ;;  %2782 = vmatprep.mubr.bf16.mxu0 %v4228_v12  ;;  %3127 = vmatprep.mubr.bf16.mxu1 %v4230_v15  ;;  %v3936_v15 = vcombine.high %v65_v59, %v69_v60  ;;  %v3938_v21 = vcombine.high %v66_v5, %v70_v7 }
 0x194   :  { %v2586_v26 = vpop.f32.mrf.mxu0  ;;  %v2931_v33 = vpop.f32.mrf.mxu1 }
 0x195   :  { %v4658_v31 = vadd.f32 %v2929_v24, %v2585_v23 }
 0x196   :  { %v2587_v38 = vpop.f32.mrf.mxu0  ;;  %v2932_v43 = vpop.f32.mrf.mxu1 }
 0x197   :  { %v2588_v42 = vadd.f32 %v4577_v17, %v2587_v38 }
 0x198   :  { %v2589_v48 = vpop.f32.mrf.mxu0  ;;  %v2934_v53 = vpop.f32.mrf.mxu1 }
 0x199   :  { %v4661_v52 = vadd.f32 %v2932_v43, %v2588_v42  ;;  %v78_v43 = vld [vmem:[#allocation2 + $0xb8] sm:$0xff]  ;;  %v3937_v53 = vcombine.low %v66_v5, %v70_v7 }
 0x19a   :  { %v2592_v54 = vpop.f32.mrf.mxu0  ;;  %2783 = vmatmul.mubr.bf16.gmra.mxu0 %v4227_v40  ;;  %v2937_v58 = vpop.f32.mrf.mxu1  ;;  %3128 = vmatmul.mubr.bf16.gmra.mxu1 %v4229_v46  ;;  %v82_v7 = vld [vmem:[#allocation2 + $0xd8] sm:$0xff] }
 0x19b   :  { %v2593_v56 = vadd.f32 %v4577_v17, %v2592_v54  ;;  %3168 = vmatprep.mubr.bf16.mxu0 %v3928_v47  ;;  %3513 = vmatprep.mubr.bf16.mxu1 %v3930_v49  ;;  %v3935_v47 = vcombine.low %v65_v59, %v69_v60  ;;  %v3944_v54 = vcombine.high %v73_v28, %v77_v30  ;;  %v81_v59 = vld [vmem:[#allocation2 + $0xd0] sm:$0xff] }
 0x19c   :  { %v2594_v62 = vpop.f32.mrf.mxu0  ;;  %v2939_v63 = vpop.f32.mrf.mxu1  ;;  %v85_v60 = vld [vmem:[#allocation2 + $0xf0] sm:$0xff] }
 0x19d   :  { %v4664_v6 = vadd.f32 %v2937_v58, %v2593_v56  ;;  %v3946_v58 = vcombine.high %v74_v36, %v78_v43 }
 0x19e   :  { %v2595_v8 = vpop.f32.mrf.mxu0  ;;  %v2940_v12 = vpop.f32.mrf.mxu1 }
 0x19f   :  { %v2596_v10 = vadd.f32 %v4577_v17, %v2595_v8 }
 0x1a0   :  { %v2597_v19 = vpop.f32.mrf.mxu0  ;;  %v2942_v24 = vpop.f32.mrf.mxu1 }
 0x1a1   :  { %v4667_v23 = vadd.f32 %v2940_v12, %v2596_v10 }
 0x1a2   :  { %v2600_v26 = vpop.f32.mrf.mxu0  ;;  %3169 = vmatmul.mubr.bf16.vlgmr.msra.gmra.mxu0 %v3927_v9  ;;  %v2945_v38 = vpop.f32.mrf.mxu1  ;;  %3514 = vmatmul.mubr.bf16.vlgmr.msra.gmra.mxu1 %v3929_v14 }
 0x1a3   :  { %v2601_v33 = vadd.f32 %v4577_v17, %v2600_v26  ;;  %3176 = vmatprep.mubr.bf16.mxu0 %v3936_v15  ;;  %3521 = vmatprep.mubr.bf16.mxu1 %v3938_v21  ;;  %v86_v15 = vld [vmem:[#allocation2 + $0xf8] sm:$0xff]  ;;  %v3943_v21 = vcombine.low %v73_v28, %v77_v30  ;;  %v89_v28 = vld [vmem:[#allocation2 + $0x110] sm:$0xff] }
 0x1a4   :  { %v2602_v40 = vpop.f32.mrf.mxu0  ;;  %v2947_v34 = vpop.f32.mrf.mxu1  ;;  %v93_v30 = vld [vmem:[#allocation2 + $0x130] sm:$0xff] }
 0x1a5   :  { %v4670_v42 = vadd.f32 %v2945_v38, %v2601_v33  ;;  %v3945_v33 = vcombine.low %v74_v36, %v78_v43  ;;  %v3952_v38 = vcombine.high %v81_v59, %v85_v60  ;;  %v3954_v34 = vcombine.high %v82_v7, %v86_v15  ;;  %v90_v43 = vld [vmem:[#allocation2 + $0x118] sm:$0xff] }
 0x1a6   :  { %v2603_v46 = vpop.f32.mrf.mxu0  ;;  %v2948_v49 = vpop.f32.mrf.mxu1 }
 0x1a7   :  { %v2604_v48 = vadd.f32 %v4577_v17, %v2603_v46 }
 0x1a8   :  { %v2605_v56 = vpop.f32.mrf.mxu0  ;;  %v2950_v63 = vpop.f32.mrf.mxu1 }
 0x1a9   :  { %v4673_v62 = vadd.f32 %v2948_v49, %v2604_v48 }
 0x1aa   :  { %v2608_v8 = vpop.f32.mrf.mxu0  ;;  %3177 = vmatmul.mubr.bf16.gmra.mxu0 %v3935_v47  ;;  %v2953_v10 = vpop.f32.mrf.mxu1  ;;  %3522 = vmatmul.mubr.bf16.gmra.mxu1 %v3937_v53 }
 0x1ab   :  { %v2609_v9 = vadd.f32 %v4577_v17, %v2608_v8  ;;  %3184 = vmatprep.mubr.bf16.mxu0 %v3944_v54  ;;  %3529 = vmatprep.mubr.bf16.mxu1 %v3946_v58  ;;  %v94_v58 = vld [vmem:[#allocation2 + $0x138] sm:$0xff]  ;;  %v3951_v8 = vcombine.low %v81_v59, %v85_v60  ;;  %v97_v59 = vld [vmem:[#allocation2 + $0x150] sm:$0xff] }
 0x1ac   :  { %v2610_v12 = vpop.f32.mrf.mxu0  ;;  %v2955_v5 = vpop.f32.mrf.mxu1  ;;  %v101_v60 = vld [vmem:[#allocation2 + $0x170] sm:$0xff] }
 0x1ad   :  { %v4676_v14 = vadd.f32 %v2953_v10, %v2609_v9  ;;  %v3953_v12 = vcombine.low %v82_v7, %v86_v15  ;;  %v3960_v5 = vcombine.high %v89_v28, %v93_v30  ;;  %v98_v15 = vld [vmem:[#allocation2 + $0x158] sm:$0xff] }
 0x1ae   :  { %v2611_v19 = vpop.f32.mrf.mxu0  ;;  %v2956_v26 = vpop.f32.mrf.mxu1 }
 0x1af   :  { %v2612_v24 = vadd.f32 %v4577_v17, %v2611_v19 }
 0x1b0   :  { %v2613_v40 = vpop.f32.mrf.mxu0  ;;  %v2958_v47 = vpop.f32.mrf.mxu1 }
 0x1b1   :  { %v4679_v46 = vadd.f32 %v2956_v26, %v2612_v24 }
 0x1b2   :  { %v2616_v48 = vpop.f32.mrf.mxu0  ;;  %3185 = vmatmul.mubr.bf16.gmra.mxu0 %v3943_v21  ;;  %v2961_v53 = vpop.f32.mrf.mxu1  ;;  %3530 = vmatmul.mubr.bf16.gmra.mxu1 %v3945_v33  ;;  %v3962_v21 = vcombine.high %v90_v43, %v94_v58 }
 0x1b3   :  { %v2617_v49 = vadd.f32 %v4577_v17, %v2616_v48  ;;  %3192 = vmatprep.mubr.bf16.mxu0 %v3952_v38  ;;  %3537 = vmatprep.mubr.bf16.mxu1 %v3954_v34  ;;  %v102_v48 = vld [vmem:[#allocation2 + $0x178] sm:$0xff] }
 0x1b4   :  { %v2618_v54 = vpop.f32.mrf.mxu0  ;;  %v2963_v36 = vpop.f32.mrf.mxu1 }
 0x1b5   :  { %v4682_v56 = vadd.f32 %v2961_v53, %v2617_v49  ;;  %v3959_v53 = vcombine.low %v89_v28, %v93_v30  ;;  %v105_v28 = vld [vmem:[#allocation2 + $0x190] sm:$0xff] }
 0x1b6   :  { %v2619_v63 = vpop.f32.mrf.mxu0  ;;  %v2964_v10 = vpop.f32.mrf.mxu1  ;;  %v109_v30 = vld [vmem:[#allocation2 + $0x1b0] sm:$0xff] }
 0x1b7   :  { %v2620_v9 = vadd.f32 %v4577_v17, %v2619_v63  ;;  %v3961_v63 = vcombine.low %v90_v43, %v94_v58  ;;  %v106_v58 = vld [vmem:[#allocation2 + $0x198] sm:$0xff] }
 0x1b8   :  { %v2621_v19 = vpop.f32.mrf.mxu0  ;;  %v2966_v26 = vpop.f32.mrf.mxu1 }
 0x1b9   :  { %v4685_v24 = vadd.f32 %v2964_v10, %v2620_v9  ;;  %v3970_v10 = vcombine.high %v98_v15, %v102_v48 }
 0x1ba   :  { %v2624_v33 = vpop.f32.mrf.mxu0  ;;  %3193 = vmatmul.mubr.bf16.gmra.mxu0 %v3951_v8  ;;  %v2969_v40 = vpop.f32.mrf.mxu1  ;;  %3538 = vmatmul.mubr.bf16.gmra.mxu1 %v3953_v12  ;;  %v3968_v8 = vcombine.high %v97_v59, %v101_v60 }
 0x1bb   :  { %v2625_v38 = vadd.f32 %v4577_v17, %v2624_v33  ;;  %3200 = vmatprep.mubr.bf16.mxu0 %v3960_v5  ;;  %3545 = vmatprep.mubr.bf16.mxu1 %v3962_v21 }
 0x1bc   :  { %v2626_v34 = vpop.f32.mrf.mxu0  ;;  %v2971_v7 = vpop.f32.mrf.mxu1 }
 0x1bd   :  { %v4688_v47 = vadd.f32 %v2969_v40, %v2625_v38  ;;  %v110_v40 = vld [vmem:[#allocation2 + $0x1b8] sm:$0xff]  ;;  %v3967_v7 = vcombine.low %v97_v59, %v101_v60  ;;  %v113_v59 = vld [vmem:[#allocation2 + $0x1d0] sm:$0xff] }
 0x1be   :  { %v2627_v49 = vpop.f32.mrf.mxu0  ;;  %v2972_v36 = vpop.f32.mrf.mxu1  ;;  %v117_v60 = vld [vmem:[#allocation2 + $0x1f0] sm:$0xff] }
 0x1bf   :  { %v2628_v54 = vadd.f32 %v4577_v17, %v2627_v49 }
 0x1c0   :  { %v2629_v9 = vpop.f32.mrf.mxu0  ;;  %v2974_v5 = vpop.f32.mrf.mxu1 }
 0x1c1   :  { %v4691_v12 = vadd.f32 %v2972_v36, %v2628_v54  ;;  %v3976_v36 = vcombine.high %v105_v28, %v109_v30  ;;  %v3978_v5 = vcombine.high %v106_v58, %v110_v40 }
 0x1c2   :  { %v2632_v19 = vpop.f32.mrf.mxu0  ;;  %3201 = vmatmul.mubr.bf16.gmra.mxu0 %v3959_v53  ;;  %v2977_v26 = vpop.f32.mrf.mxu1  ;;  %3546 = vmatmul.mubr.bf16.gmra.mxu1 %v3961_v63  ;;  %v3969_v53 = vcombine.low %v98_v15, %v102_v48  ;;  %v114_v48 = vld [vmem:[#allocation2 + $0x1d8] sm:$0xff] }
 0x1c3   :  { %v2633_v21 = vadd.f32 %v4577_v17, %v2632_v19  ;;  %3208 = vmatprep.mubr.bf16.mxu0 %v3968_v8  ;;  %3553 = vmatprep.mubr.bf16.mxu1 %v3970_v10 }
 0x1c4   :  { %v2634_v33 = vpop.f32.mrf.mxu0  ;;  %v2979_v43 = vpop.f32.mrf.mxu1 }
 0x1c5   :  { %v4694_v38 = vadd.f32 %v2977_v26, %v2633_v21  ;;  %v118_v43 = vld [vmem:[#allocation2 + $0x1f8] sm:$0xff] }
 0x1c6   :  { %v2635_v34 = vpop.f32.mrf.mxu0  ;;  %v2980_v54 = vpop.f32.mrf.mxu1 }
 0x1c7   :  { %v2636_v49 = vadd.f32 %v4577_v17, %v2635_v34 }
 0x1c8   :  { %v2637_v9 = vpop.f32.mrf.mxu0  ;;  %v2982_v8 = vpop.f32.mrf.mxu1 }
 0x1c9   :  { %v4697_v63 = vadd.f32 %v2980_v54, %v2636_v49  ;;  %v3975_v49 = vcombine.low %v105_v28, %v109_v30  ;;  %v3984_v8 = vcombine.high %v113_v59, %v117_v60  ;;  %v121_v28 = vld [vmem:[#allocation2 + $0x210] sm:$0xff] }
 0x1ca   :  { %v2640_v10 = vpop.f32.mrf.mxu0  ;;  %3209 = vmatmul.mubr.bf16.gmra.mxu0 %v3967_v7  ;;  %v2985_v21 = vpop.f32.mrf.mxu1  ;;  %3554 = vmatmul.mubr.bf16.gmra.mxu1 %v3969_v53  ;;  %v3977_v7 = vcombine.low %v106_v58, %v110_v40  ;;  %v125_v30 = vld [vmem:[#allocation2 + $0x230] sm:$0xff]  ;;  %v122_v40 = vld [vmem:[#allocation2 + $0x218] sm:$0xff] }
 0x1cb   :  { %4900 = vst [vmem:[#allocation12_spill] sm:$0xff] %v4697_v63  ;;  %v2641_v19 = vadd.f32 %v4577_v17, %v2640_v10  ;;  %3216 = vmatprep.mubr.bf16.mxu0 %v3976_v36  ;;  %3561 = vmatprep.mubr.bf16.mxu1 %v3978_v5  ;;  %v3986_v63 = vcombine.high %v114_v48, %v118_v43 }
 0x1cc   :  { %v2642_v26 = vpop.f32.mrf.mxu0  ;;  %v2987_v15 = vpop.f32.mrf.mxu1 }
 0x1cd   :  { %v4700_v33 = vadd.f32 %v2985_v21, %v2641_v19 }
 0x1ce   :  { %v2643_v34 = vpop.f32.mrf.mxu0  ;;  %v2988_v9 = vpop.f32.mrf.mxu1 }
 0x1cf   :  { %4901 = vst [vmem:[#allocation13_spill] sm:$0xff] %v4700_v33  ;;  %v2644_v54 = vadd.f32 %v4577_v17, %v2643_v34  ;;  %v126_v34 = vld [vmem:[#allocation2 + $0x238] sm:$0xff] }
 0x1d0   :  { %v2645_v10 = vpop.f32.mrf.mxu0  ;;  %v2990_v36 = vpop.f32.mrf.mxu1 }
 0x1d1   :  { %v4703_v53 = vadd.f32 %v2988_v9, %v2644_v54  ;;  %v3983_v54 = vcombine.low %v113_v59, %v117_v60  ;;  %v4708_v9 = vld [vmem:[#allocation7] ss:$0 sm:$0xff]  ;;  %v129_v60 = vld [vmem:[#allocation2 + $0x250] sm:$0xff] }
 0x1d2   :  { %v2648_v5 = vpop.f32.mrf.mxu0  ;;  %3217 = vmatmul.mubr.bf16.gmra.mxu0 %v3975_v49  ;;  %v2993_v21 = vpop.f32.mrf.mxu1  ;;  %3562 = vmatmul.mubr.bf16.gmra.mxu1 %v3977_v7 }
 0x1d3   :  { %4902 = vst [vmem:[#allocation14_spill] sm:$0xff] %v4703_v53  ;;  %v2649_v19 = vadd.f32 %v4577_v17, %v2648_v5  ;;  %3224 = vmatprep.mubr.bf16.mxu0 %v3984_v8  ;;  %3569 = vmatprep.mubr.bf16.mxu1 %v3986_v63  ;;  %v3985_v17 = vcombine.low %v114_v48, %v118_v43  ;;  %v130_v43 = vld [vmem:[#allocation2 + $0x258] sm:$0xff] }
 0x1d4   :  { %v2650_v26 = vpop.f32.mrf.mxu0  ;;  %v2995_v58 = vpop.f32.mrf.mxu1  ;;  %v3992_v5 = vcombine.high %v121_v28, %v125_v30  ;;  %v3994_v8 = vcombine.high %v122_v40, %v126_v34 }
 0x1d5   :  { %v4706_v15 = vadd.f32 %v2993_v21, %v2649_v19  ;;  %v133_v58 = vld [vmem:[#allocation2 + $0x270] sm:$0xff] }
 0x1d6   :  { %v2651_v10 = vpop.f32.mrf.mxu0  ;;  %v2996_v36 = vpop.f32.mrf.mxu1 }
 0x1d7   :  { %4903 = vst [vmem:[#allocation15_spill] sm:$0xff] %v4706_v15  ;;  %v2652_v49 = vadd.f32 %v4708_v9, %v2651_v10 }
 0x1d8   :  { %v2653_v7 = vpop.f32.mrf.mxu0  ;;  %v2998_v63 = vpop.f32.mrf.mxu1 }
 0x1d9   :  { %v4711_v26 = vadd.f32 %v2996_v36, %v2652_v49  ;;  %v134_v7 = vld [vmem:[#allocation2 + $0x278] sm:$0xff]  ;;  %v3991_v49 = vcombine.low %v121_v28, %v125_v30  ;;  %v137_v28 = vld [vmem:[#allocation2 + $0x290] sm:$0xff] }
 0x1da   :  { %v2656_v53 = vpop.f32.mrf.mxu0  ;;  %3225 = vmatmul.mubr.bf16.gmra.mxu0 %v3983_v54  ;;  %v3001_v21 = vpop.f32.mrf.mxu1  ;;  %3570 = vmatmul.mubr.bf16.gmra.mxu1 %v3985_v17  ;;  %v3993_v54 = vcombine.low %v122_v40, %v126_v34  ;;  %v4002_v33 = vcombine.high %v130_v43, %v134_v7  ;;  %v141_v30 = vld [vmem:[#allocation2 + $0x2b0] sm:$0xff]  ;;  %v138_v34 = vld [vmem:[#allocation2 + $0x298] sm:$0xff] }
 0x1db   :  { %4904 = vst [vmem:[#allocation16_spill] sm:$0xff] %v4711_v26  ;;  %v2657_v19 = vadd.f32 %v4708_v9, %v2656_v53  ;;  %3232 = vmatprep.mubr.bf16.mxu0 %v3992_v5  ;;  %3577 = vmatprep.mubr.bf16.mxu1 %v3994_v8  ;;  %v4000_v26 = vcombine.high %v129_v60, %v133_v58 }
 0x1dc   :  { %v2658_v59 = vpop.f32.mrf.mxu0  ;;  %v3003_v48 = vpop.f32.mrf.mxu1 }
 0x1dd   :  { %v4714_v10 = vadd.f32 %v3001_v21, %v2657_v19  ;;  %v142_v48 = vld [vmem:[#allocation2 + $0x2b8] sm:$0xff] }
 0x1de   :  { %v2659_v15 = vpop.f32.mrf.mxu0  ;;  %v3004_v63 = vpop.f32.mrf.mxu1 }
 0x1df   :  { %4905 = vst [vmem:[#allocation17_spill] sm:$0xff] %v4714_v10  ;;  %v2660_v36 = vadd.f32 %v4708_v9, %v2659_v15  ;;  %v4010_v10 = vcombine.high %v138_v34, %v142_v48 }
 0x1e0   :  { %v2661_v53 = vpop.f32.mrf.mxu0  ;;  %v3006_v5 = vpop.f32.mrf.mxu1 }
 0x1e1   :  { %v4717_v17 = vadd.f32 %v3004_v63, %v2660_v36  ;;  %v3999_v36 = vcombine.low %v129_v60, %v133_v58  ;;  %v145_v60 = vld [vmem:[#allocation2 + $0x2d0] sm:$0xff] }
 0x1e2   :  { %v2664_v8 = vpop.f32.mrf.mxu0  ;;  %3233 = vmatmul.mubr.bf16.gmra.mxu0 %v3991_v49  ;;  %v3009_v21 = vpop.f32.mrf.mxu1  ;;  %3578 = vmatmul.mubr.bf16.gmra.mxu1 %v3993_v54  ;;  %v4001_v49 = vcombine.low %v130_v43, %v134_v7  ;;  %v149_v58 = vld [vmem:[#allocation2 + $0x2f0] sm:$0xff]  ;;  %v146_v7 = vld [vmem:[#allocation2 + $0x2d8] sm:$0xff] }
 0x1e3   :  { %4906 = vst [vmem:[#allocation18_spill] sm:$0xff] %v4717_v17  ;;  %v2665_v19 = vadd.f32 %v4708_v9, %v2664_v8  ;;  %3240 = vmatprep.mubr.bf16.mxu0 %v4000_v26  ;;  %3585 = vmatprep.mubr.bf16.mxu1 %v4002_v33  ;;  %v4008_v17 = vcombine.high %v137_v28, %v141_v30 }
 0x1e4   :  { %v2666_v59 = vpop.f32.mrf.mxu0  ;;  %v3011_v40 = vpop.f32.mrf.mxu1 }
 0x1e5   :  { %v4720_v15 = vadd.f32 %v3009_v21, %v2665_v19 }
 0x1e6   :  { %v2667_v53 = vpop.f32.mrf.mxu0  ;;  %v3012_v5 = vpop.f32.mrf.mxu1 }
 0x1e7   :  { %4907 = vst [vmem:[#allocation19_spill] sm:$0xff] %v4720_v15  ;;  %v2668_v63 = vadd.f32 %v4708_v9, %v2667_v53  ;;  %v150_v53 = vld [vmem:[#allocation2 + $0x2f8] sm:$0xff] }
 0x1e8   :  { %v2669_v8 = vpop.f32.mrf.mxu0  ;;  %v3014_v26 = vpop.f32.mrf.mxu1  ;;  %v4018_v15 = vcombine.high %v146_v7, %v150_v53 }
 0x1e9   :  { %v4723_v54 = vadd.f32 %v3012_v5, %v2668_v63  ;;  %v4007_v63 = vcombine.low %v137_v28, %v141_v30  ;;  %v153_v28 = vld [vmem:[#allocation2 + $0x310] sm:$0xff] }
 0x1ea   :  { %v2672_v33 = vpop.f32.mrf.mxu0  ;;  %3241 = vmatmul.mubr.bf16.gmra.mxu0 %v3999_v36  ;;  %v3017_v21 = vpop.f32.mrf.mxu1  ;;  %3586 = vmatmul.mubr.bf16.gmra.mxu1 %v4001_v49  ;;  %v4009_v36 = vcombine.low %v138_v34, %v142_v48  ;;  %v157_v30 = vld [vmem:[#allocation2 + $0x330] sm:$0xff]  ;;  %v154_v48 = vld [vmem:[#allocation2 + $0x318] sm:$0xff] }
 0x1eb   :  { %4908 = vst [vmem:[#allocation20_spill] sm:$0xff] %v4723_v54  ;;  %v2673_v19 = vadd.f32 %v4708_v9, %v2672_v33  ;;  %3248 = vmatprep.mubr.bf16.mxu0 %v4008_v17  ;;  %3593 = vmatprep.mubr.bf16.mxu1 %v4010_v10  ;;  %v4016_v54 = vcombine.high %v145_v60, %v149_v58 }
 0x1ec   :  { %v2674_v59 = vpop.f32.mrf.mxu0  ;;  %v3019_v43 = vpop.f32.mrf.mxu1 }
 0x1ed   :  { %v4726_v40 = vadd.f32 %v3017_v21, %v2673_v19 }
 0x1ee   :  { %v2675_v8 = vpop.f32.mrf.mxu0  ;;  %v3020_v26 = vpop.f32.mrf.mxu1 }
 0x1ef   :  { %4909 = vst [vmem:[#allocation21_spill] sm:$0xff] %v4726_v40  ;;  %v2676_v5 = vadd.f32 %v4708_v9, %v2675_v8  ;;  %v158_v8 = vld [vmem:[#allocation2 + $0x338] sm:$0xff] }
 0x1f0   :  { %v2677_v33 = vpop.f32.mrf.mxu0  ;;  %v3022_v17 = vpop.f32.mrf.mxu1  ;;  %v4026_v40 = vcombine.high %v154_v48, %v158_v8 }
 0x1f1   :  { %v4729_v49 = vadd.f32 %v3020_v26, %v2676_v5  ;;  %v4015_v5 = vcombine.low %v145_v60, %v149_v58  ;;  %v161_v60 = vld [vmem:[#allocation2 + $0x350] sm:$0xff] }
 0x1f2   :  { %v2680_v10 = vpop.f32.mrf.mxu0  ;;  %3249 = vmatmul.mubr.bf16.gmra.mxu0 %v4007_v63  ;;  %v3025_v21 = vpop.f32.mrf.mxu1  ;;  %3594 = vmatmul.mubr.bf16.gmra.mxu1 %v4009_v36  ;;  %v4017_v63 = vcombine.low %v146_v7, %v150_v53  ;;  %v165_v58 = vld [vmem:[#allocation2 + $0x370] sm:$0xff]  ;;  %v162_v53 = vld [vmem:[#allocation2 + $0x358] sm:$0xff] }
 0x1f3   :  { %4910 = vst [vmem:[#allocation22_spill] sm:$0xff] %v4729_v49  ;;  %v2681_v19 = vadd.f32 %v4708_v9, %v2680_v10  ;;  %3256 = vmatprep.mubr.bf16.mxu0 %v4016_v54  ;;  %3601 = vmatprep.mubr.bf16.mxu1 %v4018_v15  ;;  %v4024_v49 = vcombine.high %v153_v28, %v157_v30 }
 0x1f4   :  { %v2682_v59 = vpop.f32.mrf.mxu0  ;;  %v3027_v34 = vpop.f32.mrf.mxu1 }
 0x1f5   :  { %v4732_v43 = vadd.f32 %v3025_v21, %v2681_v19 }
 0x1f6   :  { %v2683_v33 = vpop.f32.mrf.mxu0  ;;  %v3028_v17 = vpop.f32.mrf.mxu1 }
 0x1f7   :  { %4911 = vst [vmem:[#allocation23_spill] sm:$0xff] %v4732_v43  ;;  %v2684_v26 = vadd.f32 %v4708_v9, %v2683_v33  ;;  %v166_v33 = vld [vmem:[#allocation2 + $0x378] sm:$0xff] }
 0x1f8   :  { %v2685_v10 = vpop.f32.mrf.mxu0  ;;  %v3030_v54 = vpop.f32.mrf.mxu1  ;;  %v4034_v43 = vcombine.high %v162_v53, %v166_v33 }
 0x1f9   :  { %v4735_v36 = vadd.f32 %v3028_v17, %v2684_v26  ;;  %v4023_v26 = vcombine.low %v153_v28, %v157_v30  ;;  %v169_v28 = vld [vmem:[#allocation2 + $0x390] sm:$0xff] }
 0x1fa   :  { %v2688_v15 = vpop.f32.mrf.mxu0  ;;  %3257 = vmatmul.mubr.bf16.gmra.mxu0 %v4015_v5  ;;  %v3033_v21 = vpop.f32.mrf.mxu1  ;;  %3602 = vmatmul.mubr.bf16.gmra.mxu1 %v4017_v63  ;;  %v4025_v5 = vcombine.low %v154_v48, %v158_v8  ;;  %v173_v30 = vld [vmem:[#allocation2 + $0x3b0] sm:$0xff]  ;;  %v170_v8 = vld [vmem:[#allocation2 + $0x398] sm:$0xff] }
 0x1fb   :  { %4912 = vst [vmem:[#allocation24_spill] sm:$0xff] %v4735_v36  ;;  %v2689_v19 = vadd.f32 %v4708_v9, %v2688_v15  ;;  %3264 = vmatprep.mubr.bf16.mxu0 %v4024_v49  ;;  %3609 = vmatprep.mubr.bf16.mxu1 %v4026_v40  ;;  %v4032_v36 = vcombine.high %v161_v60, %v165_v58 }
 0x1fc   :  { %v2690_v59 = vpop.f32.mrf.mxu0  ;;  %v3035_v7 = vpop.f32.mrf.mxu1 }
 0x1fd   :  { %v4738_v34 = vadd.f32 %v3033_v21, %v2689_v19 }
 0x1fe   :  { %v2691_v10 = vpop.f32.mrf.mxu0  ;;  %v3036_v54 = vpop.f32.mrf.mxu1 }
 0x1ff   :  { %4913 = vst [vmem:[#allocation25_spill] sm:$0xff] %v4738_v34  ;;  %v2692_v17 = vadd.f32 %v4708_v9, %v2691_v10  ;;  %v174_v10 = vld [vmem:[#allocation2 + $0x3b8] sm:$0xff] }
 0x200   :  { %v2693_v15 = vpop.f32.mrf.mxu0  ;;  %v3038_v49 = vpop.f32.mrf.mxu1  ;;  %v4042_v34 = vcombine.high %v170_v8, %v174_v10 }
 0x201   :  { %v4741_v63 = vadd.f32 %v3036_v54, %v2692_v17  ;;  %v4031_v17 = vcombine.low %v161_v60, %v165_v58  ;;  %v177_v60 = vld [vmem:[#allocation2 + $0x3d0] sm:$0xff] }
 0x202   :  { %v2696_v40 = vpop.f32.mrf.mxu0  ;;  %3265 = vmatmul.mubr.bf16.gmra.mxu0 %v4023_v26  ;;  %v3041_v21 = vpop.f32.mrf.mxu1  ;;  %3610 = vmatmul.mubr.bf16.gmra.mxu1 %v4025_v5  ;;  %v4033_v26 = vcombine.low %v162_v53, %v166_v33  ;;  %v181_v58 = vld [vmem:[#allocation2 + $0x3f0] sm:$0xff]  ;;  %v178_v33 = vld [vmem:[#allocation2 + $0x3d8] sm:$0xff] }
 0x203   :  { %4914 = vst [vmem:[#allocation26_spill] sm:$0xff] %v4741_v63  ;;  %v2697_v19 = vadd.f32 %v4708_v9, %v2696_v40  ;;  %3272 = vmatprep.mubr.bf16.mxu0 %v4032_v36  ;;  %3617 = vmatprep.mubr.bf16.mxu1 %v4034_v43  ;;  %v4040_v63 = vcombine.high %v169_v28, %v173_v30 }
 0x204   :  { %v2698_v59 = vpop.f32.mrf.mxu0  ;;  %v3043_v48 = vpop.f32.mrf.mxu1 }
 0x205   :  { %v4744_v7 = vadd.f32 %v3041_v21, %v2697_v19 }
 0x206   :  { %v2699_v15 = vpop.f32.mrf.mxu0  ;;  %v3044_v49 = vpop.f32.mrf.mxu1 }
 0x207   :  { %4915 = vst [vmem:[#allocation27_spill] sm:$0xff] %v4744_v7  ;;  %v2700_v54 = vadd.f32 %v4708_v9, %v2699_v15  ;;  %v182_v15 = vld [vmem:[#allocation2 + $0x3f8] sm:$0xff] }
 0x208   :  { %v2701_v40 = vpop.f32.mrf.mxu0  ;;  %v3046_v36 = vpop.f32.mrf.mxu1  ;;  %v4050_v7 = vcombine.high %v178_v33, %v182_v15 }
 0x209   :  { %v4747_v5 = vadd.f32 %v3044_v49, %v2700_v54  ;;  %v4039_v54 = vcombine.low %v169_v28, %v173_v30  ;;  %v185_v28 = vld [vmem:[#allocation2 + $0x410] sm:$0xff] }
 0x20a   :  { %v2704_v43 = vpop.f32.mrf.mxu0  ;;  %3273 = vmatmul.mubr.bf16.gmra.mxu0 %v4031_v17  ;;  %v3049_v21 = vpop.f32.mrf.mxu1  ;;  %3618 = vmatmul.mubr.bf16.gmra.mxu1 %v4033_v26  ;;  %v4041_v17 = vcombine.low %v170_v8, %v174_v10  ;;  %v189_v30 = vld [vmem:[#allocation2 + $0x430] sm:$0xff]  ;;  %v186_v10 = vld [vmem:[#allocation2 + $0x418] sm:$0xff] }
 0x20b   :  { %4916 = vst [vmem:[#allocation28_spill] sm:$0xff] %v4747_v5  ;;  %v2705_v19 = vadd.f32 %v4708_v9, %v2704_v43  ;;  %3280 = vmatprep.mubr.bf16.mxu0 %v4040_v63  ;;  %3625 = vmatprep.mubr.bf16.mxu1 %v4042_v34  ;;  %v4048_v5 = vcombine.high %v177_v60, %v181_v58 }
 0x20c   :  { %v2706_v59 = vpop.f32.mrf.mxu0  ;;  %v3051_v53 = vpop.f32.mrf.mxu1 }
 0x20d   :  { %v4750_v48 = vadd.f32 %v3049_v21, %v2705_v19 }
 0x20e   :  { %v2707_v40 = vpop.f32.mrf.mxu0  ;;  %v3052_v36 = vpop.f32.mrf.mxu1 }
 0x20f   :  { %4917 = vst [vmem:[#allocation29_spill] sm:$0xff] %v4750_v48  ;;  %v2708_v49 = vadd.f32 %v4708_v9, %v2707_v40  ;;  %v190_v40 = vld [vmem:[#allocation2 + $0x438] sm:$0xff] }
 0x210   :  { %v2709_v43 = vpop.f32.mrf.mxu0  ;;  %v3054_v63 = vpop.f32.mrf.mxu1  ;;  %v4058_v48 = vcombine.high %v186_v10, %v190_v40 }
 0x211   :  { %v4753_v26 = vadd.f32 %v3052_v36, %v2708_v49  ;;  %v4047_v49 = vcombine.low %v177_v60, %v181_v58  ;;  %v193_v60 = vld [vmem:[#allocation2 + $0x450] sm:$0xff] }
 0x212   :  { %v2712_v34 = vpop.f32.mrf.mxu0  ;;  %3281 = vmatmul.mubr.bf16.gmra.mxu0 %v4039_v54  ;;  %v3057_v21 = vpop.f32.mrf.mxu1  ;;  %3626 = vmatmul.mubr.bf16.gmra.mxu1 %v4041_v17  ;;  %v4049_v54 = vcombine.low %v178_v33, %v182_v15  ;;  %v197_v58 = vld [vmem:[#allocation2 + $0x470] sm:$0xff]  ;;  %v194_v15 = vld [vmem:[#allocation2 + $0x458] sm:$0xff] }
 0x213   :  { %4918 = vst [vmem:[#allocation30_spill] sm:$0xff] %v4753_v26  ;;  %v2713_v19 = vadd.f32 %v4708_v9, %v2712_v34  ;;  %3288 = vmatprep.mubr.bf16.mxu0 %v4048_v5  ;;  %3633 = vmatprep.mubr.bf16.mxu1 %v4050_v7  ;;  %v4056_v26 = vcombine.high %v185_v28, %v189_v30 }
 0x214   :  { %v2714_v59 = vpop.f32.mrf.mxu0  ;;  %v3059_v8 = vpop.f32.mrf.mxu1 }
 0x215   :  { %v4756_v53 = vadd.f32 %v3057_v21, %v2713_v19 }
 0x216   :  { %v2715_v43 = vpop.f32.mrf.mxu0  ;;  %v3060_v63 = vpop.f32.mrf.mxu1 }
 0x217   :  { %4919 = vst [vmem:[#allocation31_spill] sm:$0xff] %v4756_v53  ;;  %v2716_v36 = vadd.f32 %v4708_v9, %v2715_v43  ;;  %v198_v43 = vld [vmem:[#allocation2 + $0x478] sm:$0xff] }
 0x218   :  { %v2717_v34 = vpop.f32.mrf.mxu0  ;;  %v3062_v5 = vpop.f32.mrf.mxu1  ;;  %v4066_v53 = vcombine.high %v194_v15, %v198_v43 }
 0x219   :  { %v4759_v17 = vadd.f32 %v3060_v63, %v2716_v36  ;;  %v4055_v36 = vcombine.low %v185_v28, %v189_v30  ;;  %v201_v28 = vld [vmem:[#allocation2 + $0x490] sm:$0xff] }
 0x21a   :  { %v2720_v7 = vpop.f32.mrf.mxu0  ;;  %3289 = vmatmul.mubr.bf16.gmra.mxu0 %v4047_v49  ;;  %v3065_v21 = vpop.f32.mrf.mxu1  ;;  %3634 = vmatmul.mubr.bf16.gmra.mxu1 %v4049_v54  ;;  %v4057_v49 = vcombine.low %v186_v10, %v190_v40  ;;  %v205_v30 = vld [vmem:[#allocation2 + $0x4b0] sm:$0xff]  ;;  %v202_v40 = vld [vmem:[#allocation2 + $0x498] sm:$0xff] }
 0x21b   :  { %4920 = vst [vmem:[#allocation32_spill] sm:$0xff] %v4759_v17  ;;  %v2721_v19 = vadd.f32 %v4708_v9, %v2720_v7  ;;  %3296 = vmatprep.mubr.bf16.mxu0 %v4056_v26  ;;  %3641 = vmatprep.mubr.bf16.mxu1 %v4058_v48  ;;  %v4064_v17 = vcombine.high %v193_v60, %v197_v58 }
 0x21c   :  { %v2722_v59 = vpop.f32.mrf.mxu0  ;;  %v3067_v33 = vpop.f32.mrf.mxu1 }
 0x21d   :  { %v4762_v8 = vadd.f32 %v3065_v21, %v2721_v19 }
 0x21e   :  { %v2723_v34 = vpop.f32.mrf.mxu0  ;;  %v3068_v5 = vpop.f32.mrf.mxu1 }
 0x21f   :  { %4921 = vst [vmem:[#allocation33_spill] sm:$0xff] %v4762_v8  ;;  %v2724_v63 = vadd.f32 %v4708_v9, %v2723_v34  ;;  %v206_v34 = vld [vmem:[#allocation2 + $0x4b8] sm:$0xff] }
 0x220   :  { %v2725_v7 = vpop.f32.mrf.mxu0  ;;  %v3070_v26 = vpop.f32.mrf.mxu1  ;;  %v4074_v8 = vcombine.high %v202_v40, %v206_v34 }
 0x221   :  { %v4765_v54 = vadd.f32 %v3068_v5, %v2724_v63  ;;  %v4063_v63 = vcombine.low %v193_v60, %v197_v58  ;;  %v209_v60 = vld [vmem:[#allocation2 + $0x4d0] sm:$0xff] }
 0x222   :  { %v2728_v48 = vpop.f32.mrf.mxu0  ;;  %3297 = vmatmul.mubr.bf16.gmra.mxu0 %v4055_v36  ;;  %v3073_v21 = vpop.f32.mrf.mxu1  ;;  %3642 = vmatmul.mubr.bf16.gmra.mxu1 %v4057_v49  ;;  %v4065_v36 = vcombine.low %v194_v15, %v198_v43  ;;  %v213_v58 = vld [vmem:[#allocation2 + $0x4f0] sm:$0xff]  ;;  %v210_v43 = vld [vmem:[#allocation2 + $0x4d8] sm:$0xff] }
 0x223   :  { %4922 = vst [vmem:[#allocation34_spill] sm:$0xff] %v4765_v54  ;;  %v2729_v19 = vadd.f32 %v4708_v9, %v2728_v48  ;;  %3304 = vmatprep.mubr.bf16.mxu0 %v4064_v17  ;;  %3649 = vmatprep.mubr.bf16.mxu1 %v4066_v53  ;;  %v4072_v54 = vcombine.high %v201_v28, %v205_v30 }
 0x224   :  { %v2730_v59 = vpop.f32.mrf.mxu0  ;;  %v3075_v10 = vpop.f32.mrf.mxu1 }
 0x225   :  { %v4768_v33 = vadd.f32 %v3073_v21, %v2729_v19 }
 0x226   :  { %v2731_v7 = vpop.f32.mrf.mxu0  ;;  %v3076_v26 = vpop.f32.mrf.mxu1 }
 0x227   :  { %4923 = vst [vmem:[#allocation35_spill] sm:$0xff] %v4768_v33  ;;  %v2732_v5 = vadd.f32 %v4708_v9, %v2731_v7  ;;  %v214_v7 = vld [vmem:[#allocation2 + $0x4f8] sm:$0xff] }
 0x228   :  { %v2733_v48 = vpop.f32.mrf.mxu0  ;;  %v3078_v17 = vpop.f32.mrf.mxu1  ;;  %v4082_v33 = vcombine.high %v210_v43, %v214_v7 }
 0x229   :  { %v4771_v49 = vadd.f32 %v3076_v26, %v2732_v5  ;;  %v4071_v5 = vcombine.low %v201_v28, %v205_v30  ;;  %v217_v28 = vld [vmem:[#allocation2 + $0x510] sm:$0xff] }
 0x22a   :  { %v2736_v53 = vpop.f32.mrf.mxu0  ;;  %3305 = vmatmul.mubr.bf16.gmra.mxu0 %v4063_v63  ;;  %v3081_v21 = vpop.f32.mrf.mxu1  ;;  %3650 = vmatmul.mubr.bf16.gmra.mxu1 %v4065_v36  ;;  %v4073_v63 = vcombine.low %v202_v40, %v206_v34  ;;  %v221_v30 = vld [vmem:[#allocation2 + $0x530] sm:$0xff]  ;;  %v218_v34 = vld [vmem:[#allocation2 + $0x518] sm:$0xff] }
 0x22b   :  { %4924 = vst [vmem:[#allocation36_spill] sm:$0xff] %v4771_v49  ;;  %v2737_v19 = vadd.f32 %v4708_v9, %v2736_v53  ;;  %3312 = vmatprep.mubr.bf16.mxu0 %v4072_v54  ;;  %3657 = vmatprep.mubr.bf16.mxu1 %v4074_v8  ;;  %v4080_v49 = vcombine.high %v209_v60, %v213_v58 }
 0x22c   :  { %v2738_v59 = vpop.f32.mrf.mxu0  ;;  %v3083_v15 = vpop.f32.mrf.mxu1 }
 0x22d   :  { %v4774_v10 = vadd.f32 %v3081_v21, %v2737_v19 }
 0x22e   :  { %v2739_v48 = vpop.f32.mrf.mxu0  ;;  %v3084_v17 = vpop.f32.mrf.mxu1 }
 0x22f   :  { %4925 = vst [vmem:[#allocation37_spill] sm:$0xff] %v4774_v10  ;;  %v2740_v26 = vadd.f32 %v4708_v9, %v2739_v48  ;;  %v222_v48 = vld [vmem:[#allocation2 + $0x538] sm:$0xff] }
 0x230   :  { %v2741_v53 = vpop.f32.mrf.mxu0  ;;  %v3086_v54 = vpop.f32.mrf.mxu1  ;;  %v4090_v10 = vcombine.high %v218_v34, %v222_v48 }
 0x231   :  { %v4777_v36 = vadd.f32 %v3084_v17, %v2740_v26  ;;  %v4079_v26 = vcombine.low %v209_v60, %v213_v58  ;;  %v225_v60 = vld [vmem:[#allocation2 + $0x550] sm:$0xff] }
 0x232   :  { %v2744_v8 = vpop.f32.mrf.mxu0  ;;  %3313 = vmatmul.mubr.bf16.gmra.mxu0 %v4071_v5  ;;  %v3089_v21 = vpop.f32.mrf.mxu1  ;;  %3658 = vmatmul.mubr.bf16.gmra.mxu1 %v4073_v63  ;;  %v4081_v5 = vcombine.low %v210_v43, %v214_v7  ;;  %v229_v58 = vld [vmem:[#allocation2 + $0x570] sm:$0xff]  ;;  %v226_v7 = vld [vmem:[#allocation2 + $0x558] sm:$0xff] }
 0x233   :  { %4926 = vst [vmem:[#allocation38_spill] sm:$0xff] %v4777_v36  ;;  %v2745_v19 = vadd.f32 %v4708_v9, %v2744_v8  ;;  %3320 = vmatprep.mubr.bf16.mxu0 %v4080_v49  ;;  %3665 = vmatprep.mubr.bf16.mxu1 %v4082_v33  ;;  %v4088_v36 = vcombine.high %v217_v28, %v221_v30 }
 0x234   :  { %v2746_v59 = vpop.f32.mrf.mxu0  ;;  %v3091_v40 = vpop.f32.mrf.mxu1 }
 0x235   :  { %v4780_v15 = vadd.f32 %v3089_v21, %v2745_v19 }
 0x236   :  { %v2747_v53 = vpop.f32.mrf.mxu0  ;;  %v3092_v54 = vpop.f32.mrf.mxu1 }
 0x237   :  { %4927 = vst [vmem:[#allocation39_spill] sm:$0xff] %v4780_v15  ;;  %v2748_v17 = vadd.f32 %v4708_v9, %v2747_v53  ;;  %v230_v53 = vld [vmem:[#allocation2 + $0x578] sm:$0xff] }
 0x238   :  { %v2749_v8 = vpop.f32.mrf.mxu0  ;;  %v3094_v49 = vpop.f32.mrf.mxu1  ;;  %v4098_v15 = vcombine.high %v226_v7, %v230_v53 }
 0x239   :  { %v4783_v63 = vadd.f32 %v3092_v54, %v2748_v17  ;;  %v4087_v17 = vcombine.low %v217_v28, %v221_v30  ;;  %v233_v28 = vld [vmem:[#allocation2 + $0x590] sm:$0xff] }
 0x23a   :  { %v2752_v33 = vpop.f32.mrf.mxu0  ;;  %3321 = vmatmul.mubr.bf16.gmra.mxu0 %v4079_v26  ;;  %v3097_v21 = vpop.f32.mrf.mxu1  ;;  %3666 = vmatmul.mubr.bf16.gmra.mxu1 %v4081_v5  ;;  %v4089_v26 = vcombine.low %v218_v34, %v222_v48  ;;  %v237_v30 = vld [vmem:[#allocation2 + $0x5b0] sm:$0xff]  ;;  %v234_v48 = vld [vmem:[#allocation2 + $0x598] sm:$0xff] }
 0x23b   :  { %4928 = vst [vmem:[#allocation40_spill] sm:$0xff] %v4783_v63  ;;  %v2753_v19 = vadd.f32 %v4708_v9, %v2752_v33  ;;  %3328 = vmatprep.mubr.bf16.mxu0 %v4088_v36  ;;  %3673 = vmatprep.mubr.bf16.mxu1 %v4090_v10  ;;  %v4096_v63 = vcombine.high %v225_v60, %v229_v58 }
 0x23c   :  { %v2754_v59 = vpop.f32.mrf.mxu0  ;;  %v3099_v43 = vpop.f32.mrf.mxu1 }
 0x23d   :  { %v4786_v40 = vadd.f32 %v3097_v21, %v2753_v19 }
 0x23e   :  { %v2755_v8 = vpop.f32.mrf.mxu0  ;;  %v3100_v49 = vpop.f32.mrf.mxu1 }
 0x23f   :  { %4929 = vst [vmem:[#allocation41_spill] sm:$0xff] %v4786_v40  ;;  %v2756_v54 = vadd.f32 %v4708_v9, %v2755_v8  ;;  %v238_v8 = vld [vmem:[#allocation2 + $0x5b8] sm:$0xff] }
 0x240   :  { %v2757_v33 = vpop.f32.mrf.mxu0  ;;  %v3102_v36 = vpop.f32.mrf.mxu1  ;;  %v4106_v40 = vcombine.high %v234_v48, %v238_v8 }
 0x241   :  { %v4789_v5 = vadd.f32 %v3100_v49, %v2756_v54  ;;  %v4095_v54 = vcombine.low %v225_v60, %v229_v58  ;;  %v241_v60 = vld [vmem:[#allocation2 + $0x5d0] sm:$0xff] }
 0x242   :  { %v2760_v10 = vpop.f32.mrf.mxu0  ;;  %3329 = vmatmul.mubr.bf16.gmra.mxu0 %v4087_v17  ;;  %v3105_v21 = vpop.f32.mrf.mxu1  ;;  %3674 = vmatmul.mubr.bf16.gmra.mxu1 %v4089_v26  ;;  %v4097_v17 = vcombine.low %v226_v7, %v230_v53  ;;  %v245_v58 = vld [vmem:[#allocation2 + $0x5f0] sm:$0xff]  ;;  %v242_v53 = vld [vmem:[#allocation2 + $0x5d8] sm:$0xff] }
 0x243   :  { %4930 = vst [vmem:[#allocation42_spill] sm:$0xff] %v4789_v5  ;;  %v2761_v19 = vadd.f32 %v4708_v9, %v2760_v10  ;;  %3336 = vmatprep.mubr.bf16.mxu0 %v4096_v63  ;;  %3681 = vmatprep.mubr.bf16.mxu1 %v4098_v15  ;;  %v4104_v5 = vcombine.high %v233_v28, %v237_v30 }
 0x244   :  { %v2762_v59 = vpop.f32.mrf.mxu0  ;;  %v3107_v34 = vpop.f32.mrf.mxu1 }
 0x245   :  { %v4792_v43 = vadd.f32 %v3105_v21, %v2761_v19 }
 0x246   :  { %v2763_v33 = vpop.f32.mrf.mxu0  ;;  %v3108_v36 = vpop.f32.mrf.mxu1 }
 0x247   :  { %4931 = vst [vmem:[#allocation43_spill] sm:$0xff] %v4792_v43  ;;  %v2764_v49 = vadd.f32 %v4708_v9, %v2763_v33  ;;  %v246_v33 = vld [vmem:[#allocation2 + $0x5f8] sm:$0xff] }
 0x248   :  { %v2765_v10 = vpop.f32.mrf.mxu0  ;;  %v3110_v63 = vpop.f32.mrf.mxu1  ;;  %v4114_v43 = vcombine.high %v242_v53, %v246_v33 }
 0x249   :  { %v4795_v26 = vadd.f32 %v3108_v36, %v2764_v49  ;;  %v4103_v49 = vcombine.low %v233_v28, %v237_v30  ;;  %v249_v28 = vld [vmem:[#allocation2 + $0x610] sm:$0xff] }
 0x24a   :  { %v2768_v15 = vpop.f32.mrf.mxu0  ;;  %3337 = vmatmul.mubr.bf16.gmra.mxu0 %v4095_v54  ;;  %v3113_v21 = vpop.f32.mrf.mxu1  ;;  %3682 = vmatmul.mubr.bf16.gmra.mxu1 %v4097_v17  ;;  %v4105_v54 = vcombine.low %v234_v48, %v238_v8  ;;  %v253_v30 = vld [vmem:[#allocation2 + $0x630] sm:$0xff]  ;;  %v250_v8 = vld [vmem:[#allocation2 + $0x618] sm:$0xff] }
 0x24b   :  { %4932 = vst [vmem:[#allocation44_spill] sm:$0xff] %v4795_v26  ;;  %v2769_v19 = vadd.f32 %v4708_v9, %v2768_v15  ;;  %3344 = vmatprep.mubr.bf16.mxu0 %v4104_v5  ;;  %3689 = vmatprep.mubr.bf16.mxu1 %v4106_v40  ;;  %v4112_v26 = vcombine.high %v241_v60, %v245_v58 }
 0x24c   :  { %v2770_v59 = vpop.f32.mrf.mxu0  ;;  %v3115_v7 = vpop.f32.mrf.mxu1 }
 0x24d   :  { %v4798_v34 = vadd.f32 %v3113_v21, %v2769_v19 }
 0x24e   :  { %v2771_v10 = vpop.f32.mrf.mxu0  ;;  %v3116_v63 = vpop.f32.mrf.mxu1 }
 0x24f   :  { %4933 = vst [vmem:[#allocation45_spill] sm:$0xff] %v4798_v34  ;;  %v2772_v36 = vadd.f32 %v4708_v9, %v2771_v10  ;;  %v254_v10 = vld [vmem:[#allocation2 + $0x638] sm:$0xff] }
 0x250   :  { %v2773_v15 = vpop.f32.mrf.mxu0  ;;  %v3118_v5 = vpop.f32.mrf.mxu1  ;;  %v4122_v34 = vcombine.high %v250_v8, %v254_v10 }
 0x251   :  { %v4801_v17 = vadd.f32 %v3116_v63, %v2772_v36  ;;  %v4111_v36 = vcombine.low %v241_v60, %v245_v58  ;;  %v257_v60 = vld [vmem:[#allocation2 + $0x650] sm:$0xff] }
 0x252   :  { %v2776_v40 = vpop.f32.mrf.mxu0  ;;  %3345 = vmatmul.mubr.bf16.gmra.mxu0 %v4103_v49  ;;  %v3121_v21 = vpop.f32.mrf.mxu1  ;;  %3690 = vmatmul.mubr.bf16.gmra.mxu1 %v4105_v54  ;;  %v4113_v49 = vcombine.low %v242_v53, %v246_v33  ;;  %v261_v58 = vld [vmem:[#allocation2 + $0x670] sm:$0xff]  ;;  %v258_v33 = vld [vmem:[#allocation2 + $0x658] sm:$0xff] }
 0x253   :  { %4934 = vst [vmem:[#allocation46_spill] sm:$0xff] %v4801_v17  ;;  %v2777_v19 = vadd.f32 %v4708_v9, %v2776_v40  ;;  %3352 = vmatprep.mubr.bf16.mxu0 %v4112_v26  ;;  %3697 = vmatprep.mubr.bf16.mxu1 %v4114_v43  ;;  %v4120_v17 = vcombine.high %v249_v28, %v253_v30 }
 0x254   :  { %v2778_v59 = vpop.f32.mrf.mxu0  ;;  %v3123_v48 = vpop.f32.mrf.mxu1 }
 0x255   :  { %v4804_v7 = vadd.f32 %v3121_v21, %v2777_v19 }
 0x256   :  { %v2779_v15 = vpop.f32.mrf.mxu0  ;;  %v3124_v5 = vpop.f32.mrf.mxu1 }
 0x257   :  { %4935 = vst [vmem:[#allocation47_spill] sm:$0xff] %v4804_v7  ;;  %v2780_v63 = vadd.f32 %v4708_v9, %v2779_v15  ;;  %v262_v15 = vld [vmem:[#allocation2 + $0x678] sm:$0xff] }
 0x258   :  { %v2781_v40 = vpop.f32.mrf.mxu0  ;;  %v3126_v26 = vpop.f32.mrf.mxu1  ;;  %v4130_v7 = vcombine.high %v258_v33, %v262_v15 }
 0x259   :  { %v4807_v54 = vadd.f32 %v3124_v5, %v2780_v63  ;;  %v4119_v63 = vcombine.low %v249_v28, %v253_v30  ;;  %v265_v28 = vld [vmem:[#allocation2 + $0x690] sm:$0xff] }
 0x25a   :  { %v2784_v43 = vpop.f32.mrf.mxu0  ;;  %3353 = vmatmul.mubr.bf16.gmra.mxu0 %v4111_v36  ;;  %v3129_v21 = vpop.f32.mrf.mxu1  ;;  %3698 = vmatmul.mubr.bf16.gmra.mxu1 %v4113_v49  ;;  %v4121_v36 = vcombine.low %v250_v8, %v254_v10  ;;  %v269_v30 = vld [vmem:[#allocation2 + $0x6b0] sm:$0xff]  ;;  %v266_v8 = vld [vmem:[#allocation2 + $0x698] sm:$0xff] }
 0x25b   :  { %4936 = vst [vmem:[#allocation48_spill] sm:$0xff] %v4807_v54  ;;  %v2785_v19 = vadd.f32 %v4708_v9, %v2784_v43  ;;  %3360 = vmatprep.mubr.bf16.mxu0 %v4120_v17  ;;  %3705 = vmatprep.mubr.bf16.mxu1 %v4122_v34  ;;  %v4128_v54 = vcombine.high %v257_v60, %v261_v58  ;;  %v270_v10 = vld [vmem:[#allocation2 + $0x6b8] sm:$0xff] }
 0x25c   :  { %v2786_v59 = vpop.f32.mrf.mxu0  ;;  %v3131_v53 = vpop.f32.mrf.mxu1 }
 0x25d   :  { %v4810_v48 = vadd.f32 %v3129_v21, %v2785_v19 }
 0x25e   :  { %v2787_v40 = vpop.f32.mrf.mxu0  ;;  %v3132_v26 = vpop.f32.mrf.mxu1 }
 0x25f   :  { %v2788_v5 = vadd.f32 %v4708_v9, %v2787_v40 }
 0x260   :  { %v2789_v43 = vpop.f32.mrf.mxu0  ;;  %v3134_v17 = vpop.f32.mrf.mxu1 }
 0x261   :  { %v4813_v49 = vadd.f32 %v3132_v26, %v2788_v5  ;;  %v4127_v43 = vcombine.low %v257_v60, %v261_v58  ;;  %v4136_v17 = vcombine.high %v265_v28, %v269_v30  ;;  %v273_v60 = vld [vmem:[#allocation2 + $0x6d0] sm:$0xff] }
 0x262   :  { %v3170_v34 = vpop.f32.mrf.mxu0  ;;  %3361 = vmatmul.mubr.bf16.gmra.mxu0 %v4119_v63  ;;  %v3515_v21 = vpop.f32.mrf.mxu1  ;;  %3706 = vmatmul.mubr.bf16.gmra.mxu1 %v4121_v36  ;;  %v4129_v63 = vcombine.low %v258_v33, %v262_v15  ;;  %v277_v58 = vld [vmem:[#allocation2 + $0x6f0] sm:$0xff]  ;;  %v274_v33 = vld [vmem:[#allocation2 + $0x6d8] sm:$0xff] }
 0x263   :  { %v3171_v19 = vadd.f32 %v3170_v34, %v4580_v25  ;;  %3368 = vmatprep.mubr.bf16.mxu0 %v4128_v54  ;;  %3713 = vmatprep.mubr.bf16.mxu1 %v4130_v7  ;;  %v4138_v34 = vcombine.high %v266_v8, %v270_v10  ;;  %v278_v15 = vld [vmem:[#allocation2 + $0x6f8] sm:$0xff] }
 0x264   :  { %v3172_v59 = vpop.f32.mrf.mxu0  ;;  %v3517_v53 = vpop.f32.mrf.mxu1 }
 0x265   :  { %v3516_v9 = vadd.f32 %v3515_v21, %v3171_v19 }
 0x266   :  { %v3173_v40 = vpop.f32.mrf.mxu0  ;;  %v3518_v26 = vpop.f32.mrf.mxu1 }
 0x267   :  { %3826 = vst [vmem:[#allocation8] sm:$0xff] %v3516_v9  ;;  %v3174_v5 = vadd.f32 %v3173_v40, %v4583_v37  ;;  %v4135_v40 = vcombine.low %v265_v28, %v269_v30  ;;  %v281_v28 = vld [vmem:[#allocation2 + $0x710] sm:$0xff] }
 0x268   :  { %v3175_v25 = vpop.f32.mrf.mxu0  ;;  %v3520_v54 = vpop.f32.mrf.mxu1  ;;  %v285_v30 = vld [vmem:[#allocation2 + $0x730] sm:$0xff] }
 0x269   :  { %v3519_v36 = vadd.f32 %v3518_v26, %v3174_v5  ;;  %v4137_v26 = vcombine.low %v266_v8, %v270_v10  ;;  %v4144_v25 = vcombine.high %v273_v60, %v277_v58  ;;  %v282_v8 = vld [vmem:[#allocation2 + $0x718] sm:$0xff] }
 0x26a   :  { %v3178_v59 = vpop.f32.mrf.mxu0  ;;  %3369 = vmatmul.mubr.bf16.gmra.mxu0 %v4127_v43  ;;  %v3523_v19 = vpop.f32.mrf.mxu1  ;;  %3714 = vmatmul.mubr.bf16.gmra.mxu1 %v4129_v63  ;;  %v286_v10 = vld [vmem:[#allocation2 + $0x738] sm:$0xff] }
 0x26b   :  { %3827 = vst [vmem:[#allocation8 + $0x8] sm:$0xff] %v3519_v36  ;;  %v3179_v7 = vadd.f32 %v3178_v59, %v4586_v45  ;;  %3376 = vmatprep.mubr.bf16.mxu0 %v4136_v17  ;;  %3721 = vmatprep.mubr.bf16.mxu1 %v4138_v34  ;;  %v4146_v36 = vcombine.high %v274_v33, %v278_v15 }
 0x26c   :  { %v3180_v21 = vpop.f32.mrf.mxu0  ;;  %v3525_v9 = vpop.f32.mrf.mxu1 }
 0x26d   :  { %v3524_v37 = vadd.f32 %v3523_v19, %v3179_v7 }
 0x26e   :  { %v3181_v53 = vpop.f32.mrf.mxu0  ;;  %v3526_v43 = vpop.f32.mrf.mxu1 }
 0x26f   :  { %3828 = vst [vmem:[#allocation8 + $0x10] sm:$0xff] %v3524_v37  ;;  %v3182_v5 = vadd.f32 %v3181_v53, %v4589_v0  ;;  %v4143_v37 = vcombine.low %v273_v60, %v277_v58  ;;  %v289_v60 = vld [vmem:[#allocation2 + $0x750] sm:$0xff] }
 0x270   :  { %v3183_v45 = vpop.f32.mrf.mxu0  ;;  %v3528_v17 = vpop.f32.mrf.mxu1  ;;  %v293_v58 = vld [vmem:[#allocation2 + $0x770] sm:$0xff] }
 0x271   :  { %v3527_v63 = vadd.f32 %v3526_v43, %v3182_v5  ;;  %v4152_v5 = vcombine.high %v281_v28, %v285_v30  ;;  %v4154_v43 = vcombine.high %v282_v8, %v286_v10 }
 0x272   :  { %v3186_v54 = vpop.f32.mrf.mxu0  ;;  %3377 = vmatmul.mubr.bf16.gmra.mxu0 %v4135_v40  ;;  %v3531_v59 = vpop.f32.mrf.mxu1  ;;  %3722 = vmatmul.mubr.bf16.gmra.mxu1 %v4137_v26  ;;  %v4145_v40 = vcombine.low %v274_v33, %v278_v15  ;;  %v290_v33 = vld [vmem:[#allocation2 + $0x758] sm:$0xff] }
 0x273   :  { %3829 = vst [vmem:[#allocation8 + $0x18] sm:$0xff] %v3527_v63  ;;  %v3187_v34 = vadd.f32 %v3186_v54, %v4592_v1  ;;  %3384 = vmatprep.mubr.bf16.mxu0 %v4144_v25  ;;  %3729 = vmatprep.mubr.bf16.mxu1 %v4146_v36  ;;  %v294_v15 = vld [vmem:[#allocation2 + $0x778] sm:$0xff] }
 0x274   :  { %v3188_v7 = vpop.f32.mrf.mxu0  ;;  %v3533_v19 = vpop.f32.mrf.mxu1 }
 0x275   :  { %v3532_v0 = vadd.f32 %v3531_v59, %v3187_v34  ;;  %v4151_v59 = vcombine.low %v281_v28, %v285_v30  ;;  %v4153_v19 = vcombine.low %v282_v8, %v286_v10  ;;  %v297_v28 = vld [vmem:[#allocation2 + $0x790] sm:$0xff]  ;;  %v298_v8 = vld [vmem:[#allocation2 + $0x798] sm:$0xff] }
 0x276   :  { %v3189_v21 = vpop.f32.mrf.mxu0  ;;  %v3534_v53 = vpop.f32.mrf.mxu1  ;;  %v301_v30 = vld [vmem:[#allocation2 + $0x7b0] sm:$0xff]  ;;  %v302_v10 = vld [vmem:[#allocation2 + $0x7b8] sm:$0xff] }
 0x277   :  { %3830 = vst [vmem:[#allocation8 + $0x20] sm:$0xff] %v3532_v0  ;;  %v3190_v9 = vadd.f32 %v3189_v21, %v4595_v13  ;;  %v4160_v21 = vcombine.high %v289_v60, %v293_v58 }
 0x278   :  { %v3191_v1 = vpop.f32.mrf.mxu0  ;;  %v3536_v25 = vpop.f32.mrf.mxu1 }
 0x279   :  { %v3535_v26 = vadd.f32 %v3534_v53, %v3190_v9 }
 0x27a   :  { %v3194_v45 = vpop.f32.mrf.mxu0  ;;  %3385 = vmatmul.mubr.bf16.gmra.mxu0 %v4143_v37  ;;  %v3539_v63 = vpop.f32.mrf.mxu1  ;;  %3730 = vmatmul.mubr.bf16.gmra.mxu1 %v4145_v40  ;;  %v4162_v37 = vcombine.high %v290_v33, %v294_v15 }
 0x27b   :  { %3831 = vst [vmem:[#allocation8 + $0x28] sm:$0xff] %v3535_v26  ;;  %v3195_v36 = vadd.f32 %v3194_v45, %v4598_v22  ;;  %3392 = vmatprep.mubr.bf16.mxu0 %v4152_v5  ;;  %3737 = vmatprep.mubr.bf16.mxu1 %v4154_v43  ;;  %v4159_v45 = vcombine.low %v289_v60, %v293_v58  ;;  %v305_v60 = vld [vmem:[#allocation2 + $0x7d0] sm:$0xff] }
 0x27c   :  { %v3196_v17 = vpop.f32.mrf.mxu0  ;;  %v3541_v54 = vpop.f32.mrf.mxu1  ;;  %v309_v58 = vld [vmem:[#allocation2 + $0x7f0] sm:$0xff] }
 0x27d   :  { %v3540_v13 = vadd.f32 %v3539_v63, %v3195_v36  ;;  %v4161_v17 = vcombine.low %v290_v33, %v294_v15  ;;  %v4170_v54 = vcombine.high %v298_v8, %v302_v10  ;;  %v306_v33 = vld [vmem:[#allocation2 + $0x7d8] sm:$0xff] }
 0x27e   :  { %v3197_v34 = vpop.f32.mrf.mxu0  ;;  %v3542_v0 = vpop.f32.mrf.mxu1  ;;  %v310_v15 = vld [vmem:[#allocation2 + $0x7f8] sm:$0xff] }
 0x27f   :  { %3832 = vst [vmem:[#allocation8 + $0x30] sm:$0xff] %v3540_v13  ;;  %v3198_v7 = vadd.f32 %v3197_v34, %v4601_v35  ;;  %v4168_v13 = vcombine.high %v297_v28, %v301_v30 }
 0x280   :  { %v3199_v22 = vpop.f32.mrf.mxu0  ;;  %v3544_v53 = vpop.f32.mrf.mxu1 }
 0x281   :  { %v3543_v9 = vadd.f32 %v3542_v0, %v3198_v7 }
 0x282   :  { %v3202_v40 = vpop.f32.mrf.mxu0  ;;  %3393 = vmatmul.mubr.bf16.gmra.mxu0 %v4151_v59  ;;  %v3547_v1 = vpop.f32.mrf.mxu1  ;;  %3738 = vmatmul.mubr.bf16.gmra.mxu1 %v4153_v19 }
 0x283   :  { %3833 = vst [vmem:[#allocation8 + $0x38] sm:$0xff] %v3543_v9  ;;  %v3203_v5 = vadd.f32 %v3202_v40, %v4604_v44  ;;  %3400 = vmatprep.mubr.bf16.mxu0 %v4160_v21  ;;  %3745 = vmatprep.mubr.bf16.mxu1 %v4162_v37  ;;  %v4167_v9 = vcombine.low %v297_v28, %v301_v30  ;;  %v313_v28 = vld [vmem:[#allocation2 + $0x810] sm:$0xff] }
 0x284   :  { %v3204_v43 = vpop.f32.mrf.mxu0  ;;  %v3549_v26 = vpop.f32.mrf.mxu1  ;;  %v317_v30 = vld [vmem:[#allocation2 + $0x830] sm:$0xff] }
 0x285   :  { %v3548_v35 = vadd.f32 %v3547_v1, %v3203_v5  ;;  %v4169_v5 = vcombine.low %v298_v8, %v302_v10  ;;  %v4176_v1 = vcombine.high %v305_v60, %v309_v58  ;;  %v4178_v43 = vcombine.high %v306_v33, %v310_v15  ;;  %v314_v8 = vld [vmem:[#allocation2 + $0x818] sm:$0xff] }
 0x286   :  { %v3205_v25 = vpop.f32.mrf.mxu0  ;;  %v3550_v63 = vpop.f32.mrf.mxu1  ;;  %v318_v10 = vld [vmem:[#allocation2 + $0x838] sm:$0xff] }
 0x287   :  { %3834 = vst [vmem:[#allocation8 + $0x40] sm:$0xff] %v3548_v35  ;;  %v3206_v36 = vadd.f32 %v3205_v25, %v4607_v57 }
 0x288   :  { %v3207_v44 = vpop.f32.mrf.mxu0  ;;  %v3552_v59 = vpop.f32.mrf.mxu1 }
 0x289   :  { %v3551_v34 = vadd.f32 %v3550_v63, %v3206_v36  ;;  %v4175_v44 = vcombine.low %v305_v60, %v309_v58  ;;  %v4177_v59 = vcombine.low %v306_v33, %v310_v15  ;;  %v321_v60 = vld [vmem:[#allocation2 + $0x850] sm:$0xff]  ;;  %v322_v33 = vld [vmem:[#allocation2 + $0x858] sm:$0xff] }
 0x28a   :  { %v3210_v7 = vpop.f32.mrf.mxu0  ;;  %3401 = vmatmul.mubr.bf16.gmra.mxu0 %v4159_v45  ;;  %v3555_v19 = vpop.f32.mrf.mxu1  ;;  %3746 = vmatmul.mubr.bf16.gmra.mxu1 %v4161_v17  ;;  %v325_v58 = vld [vmem:[#allocation2 + $0x870] sm:$0xff]  ;;  %v326_v15 = vld [vmem:[#allocation2 + $0x878] sm:$0xff] }
 0x28b   :  { %3835 = vst [vmem:[#allocation8 + $0x48] sm:$0xff] %v3551_v34  ;;  %v3211_v0 = vadd.f32 %v3210_v7, %v4610_v3  ;;  %3408 = vmatprep.mubr.bf16.mxu0 %v4168_v13  ;;  %3753 = vmatprep.mubr.bf16.mxu1 %v4170_v54  ;;  %v4184_v7 = vcombine.high %v313_v28, %v317_v30 }
 0x28c   :  { %v3212_v21 = vpop.f32.mrf.mxu0  ;;  %v3557_v22 = vpop.f32.mrf.mxu1 }
 0x28d   :  { %v3556_v57 = vadd.f32 %v3555_v19, %v3211_v0  ;;  %v4186_v0 = vcombine.high %v314_v8, %v318_v10 }
 0x28e   :  { %v3213_v37 = vpop.f32.mrf.mxu0  ;;  %v3558_v40 = vpop.f32.mrf.mxu1 }
 0x28f   :  { %3836 = vst [vmem:[#allocation8 + $0x50] sm:$0xff] %v3556_v57  ;;  %v3214_v53 = vadd.f32 %v3213_v37, %v4613_v16 }
 0x290   :  { %v3215_v3 = vpop.f32.mrf.mxu0  ;;  %v3560_v26 = vpop.f32.mrf.mxu1 }
 0x291   :  { %v3559_v35 = vadd.f32 %v3558_v40, %v3214_v53  ;;  %v4194_v26 = vcombine.high %v322_v33, %v326_v15 }
 0x292   :  { %v3218_v25 = vpop.f32.mrf.mxu0  ;;  %3409 = vmatmul.mubr.bf16.gmra.mxu0 %v4167_v9  ;;  %v3563_v36 = vpop.f32.mrf.mxu1  ;;  %3754 = vmatmul.mubr.bf16.gmra.mxu1 %v4169_v5  ;;  %v4183_v5 = vcombine.low %v313_v28, %v317_v30  ;;  %v329_v28 = vld [vmem:[#allocation2 + $0x890] sm:$0xff] }
 0x293   :  { %3837 = vst [vmem:[#allocation8 + $0x58] sm:$0xff] %v3559_v35  ;;  %v3219_v45 = vadd.f32 %v3218_v25, %v4616_v27  ;;  %3416 = vmatprep.mubr.bf16.mxu0 %v4176_v1  ;;  %3761 = vmatprep.mubr.bf16.mxu1 %v4178_v43  ;;  %v4185_v43 = vcombine.low %v314_v8, %v318_v10  ;;  %v333_v30 = vld [vmem:[#allocation2 + $0x8b0] sm:$0xff]  ;;  %v330_v8 = vld [vmem:[#allocation2 + $0x898] sm:$0xff] }
 0x294   :  { %v3220_v63 = vpop.f32.mrf.mxu0  ;;  %v3565_v17 = vpop.f32.mrf.mxu1  ;;  %v4192_v35 = vcombine.high %v321_v60, %v325_v58  ;;  %v334_v10 = vld [vmem:[#allocation2 + $0x8b8] sm:$0xff] }
 0x295   :  { %v3564_v16 = vadd.f32 %v3563_v36, %v3219_v45 }
 0x296   :  { %v3221_v13 = vpop.f32.mrf.mxu0  ;;  %v3566_v34 = vpop.f32.mrf.mxu1 }
 0x297   :  { %3838 = vst [vmem:[#allocation8 + $0x60] sm:$0xff] %v3564_v16  ;;  %v3222_v54 = vadd.f32 %v3221_v13, %v4619_v41 }
 0x298   :  { %v3223_v27 = vpop.f32.mrf.mxu0  ;;  %v3568_v21 = vpop.f32.mrf.mxu1 }
 0x299   :  { %v3567_v19 = vadd.f32 %v3566_v34, %v3222_v54  ;;  %v4191_v54 = vcombine.low %v321_v60, %v325_v58  ;;  %v4200_v27 = vcombine.high %v329_v28, %v333_v30  ;;  %v337_v60 = vld [vmem:[#allocation2 + $0x8d0] sm:$0xff] }
 0x29a   :  { %v3226_v57 = vpop.f32.mrf.mxu0  ;;  %3417 = vmatmul.mubr.bf16.gmra.mxu0 %v4175_v44  ;;  %v3571_v37 = vpop.f32.mrf.mxu1  ;;  %3762 = vmatmul.mubr.bf16.gmra.mxu1 %v4177_v59  ;;  %v341_v58 = vld [vmem:[#allocation2 + $0x8f0] sm:$0xff] }
 0x29b   :  { %3839 = vst [vmem:[#allocation8 + $0x68] sm:$0xff] %v3567_v19  ;;  %v3227_v22 = vadd.f32 %v3226_v57, %v4622_v51  ;;  %3424 = vmatprep.mubr.bf16.mxu0 %v4184_v7  ;;  %3769 = vmatprep.mubr.bf16.mxu1 %v4186_v0  ;;  %v4193_v7 = vcombine.low %v322_v33, %v326_v15  ;;  %v342_v33 = vld [vmem:[#allocation2 + $0x8f8] sm:$0xff] }
 0x29c   :  { %v3228_v9 = vpop.f32.mrf.mxu0  ;;  %v3573_v53 = vpop.f32.mrf.mxu1  ;;  %v4202_v0 = vcombine.high %v330_v8, %v334_v10 }
 0x29d   :  { %v3572_v41 = vadd.f32 %v3571_v37, %v3227_v22  ;;  %v338_v53 = vld [vmem:[#allocation2 + $0x8d8] sm:$0xff] }
 0x29e   :  { %v3229_v40 = vpop.f32.mrf.mxu0  ;;  %v3574_v3 = vpop.f32.mrf.mxu1 }
 0x29f   :  { %3840 = vst [vmem:[#allocation8 + $0x70] sm:$0xff] %v3572_v41  ;;  %v3230_v1 = vadd.f32 %v3229_v40, %v4625_v2  ;;  %v4199_v40 = vcombine.low %v329_v28, %v333_v30  ;;  %v346_v30 = vld [vmem:[#allocation2 + $0x918] sm:$0xff] }
 0x2a0   :  { %v3231_v51 = vpop.f32.mrf.mxu0  ;;  %v3576_v45 = vpop.f32.mrf.mxu1 }
 0x2a1   :  { %v3575_v25 = vadd.f32 %v3574_v3, %v3230_v1  ;;  %v4201_v3 = vcombine.low %v330_v8, %v334_v10  ;;  %v4207_v8 = vcombine.low %v337_v60, %v341_v58 }
 0x2a2   :  { %v3234_v36 = vpop.f32.mrf.mxu0  ;;  %3425 = vmatmul.mubr.bf16.gmra.mxu0 %v4183_v5  ;;  %v3579_v16 = vpop.f32.mrf.mxu1  ;;  %3770 = vmatmul.mubr.bf16.gmra.mxu1 %v4185_v43  ;;  %v4208_v43 = vcombine.high %v337_v60, %v341_v58  ;;  %v358_v60 = vld [vmem:[#allocation2 + $0x978] sm:$0xff] }
 0x2a3   :  { %3841 = vst [vmem:[#allocation8 + $0x78] sm:$0xff] %v3575_v25  ;;  %v3235_v63 = vadd.f32 %v3234_v36, %v4628_v11  ;;  %3432 = vmatprep.mubr.bf16.mxu0 %v4192_v35  ;;  %3777 = vmatprep.mubr.bf16.mxu1 %v4194_v26  ;;  %v4210_v35 = vcombine.high %v338_v53, %v342_v33 }
 0x2a4   :  { %v3236_v17 = vpop.f32.mrf.mxu0  ;;  %v3581_v13 = vpop.f32.mrf.mxu1 }
 0x2a5   :  { %v3580_v2 = vadd.f32 %v3579_v16, %v3235_v63  ;;  %v345_v16 = vld [vmem:[#allocation2 + $0x910] sm:$0xff] }
 0x2a6   :  { %v3237_v44 = vpop.f32.mrf.mxu0  ;;  %v3582_v59 = vpop.f32.mrf.mxu1  ;;  %v349_v17 = vld [vmem:[#allocation2 + $0x930] sm:$0xff] }
 0x2a7   :  { %3842 = vst [vmem:[#allocation8 + $0x80] sm:$0xff] %v3580_v2  ;;  %v3238_v34 = vadd.f32 %v3237_v44, %v4631_v29  ;;  %v350_v2 = vld [vmem:[#allocation2 + $0x938] sm:$0xff] }
 0x2a8   :  { %v3239_v11 = vpop.f32.mrf.mxu0  ;;  %v3584_v21 = vpop.f32.mrf.mxu1 }
 0x2a9   :  { %v3583_v19 = vadd.f32 %v3582_v59, %v3238_v34  ;;  %v4216_v34 = vcombine.high %v345_v16, %v349_v17  ;;  %v4218_v59 = vcombine.high %v346_v30, %v350_v2 }
 0x2aa   :  { %v3242_v57 = vpop.f32.mrf.mxu0  ;;  %3433 = vmatmul.mubr.bf16.gmra.mxu0 %v4191_v54  ;;  %v3587_v37 = vpop.f32.mrf.mxu1  ;;  %3778 = vmatmul.mubr.bf16.gmra.mxu1 %v4193_v7  ;;  %v4209_v54 = vcombine.low %v338_v53, %v342_v33  ;;  %v4217_v33 = vcombine.low %v346_v30, %v350_v2 }
 0x2ab   :  { %3843 = vst [vmem:[#allocation8 + $0x88] sm:$0xff] %v3583_v19  ;;  %v3243_v22 = vadd.f32 %v3242_v57, %v4634_v39  ;;  %3440 = vmatprep.mubr.bf16.mxu0 %v4200_v27  ;;  %3785 = vmatprep.mubr.bf16.mxu1 %v4202_v0  ;;  %v353_v57 = vld [vmem:[#allocation2 + $0x950] sm:$0xff] }
 0x2ac   :  { %v3244_v9 = vpop.f32.mrf.mxu0  ;;  %v3589_v41 = vpop.f32.mrf.mxu1 }
 0x2ad   :  { %v3588_v29 = vadd.f32 %v3587_v37, %v3243_v22  ;;  %v357_v22 = vld [vmem:[#allocation2 + $0x970] sm:$0xff]  ;;  %v354_v9 = vld [vmem:[#allocation2 + $0x958] sm:$0xff] }
 0x2ae   :  { %v3245_v15 = vpop.f32.mrf.mxu0  ;;  %v3590_v1 = vpop.f32.mrf.mxu1 }
 0x2af   :  { %3844 = vst [vmem:[#allocation8 + $0x90] sm:$0xff] %v3588_v29  ;;  %v3246_v5 = vadd.f32 %v3245_v15, %v4637_v55  ;;  %v4215_v29 = vcombine.low %v345_v16, %v349_v17  ;;  %v4224_v15 = vcombine.high %v353_v57, %v357_v22  ;;  %v4223_v16 = vcombine.low %v353_v57, %v357_v22 }
 0x2b0   :  { %v3247_v39 = vpop.f32.mrf.mxu0  ;;  %v3592_v26 = vpop.f32.mrf.mxu1 }
 0x2b1   :  { %v3591_v51 = vadd.f32 %v3590_v1, %v3246_v5  ;;  %v365_v26 = vld [vmem:[#allocation2 + $0x9b0] sm:$0xff] }
 0x2b2   :  { %v3250_v25 = vpop.f32.mrf.mxu0  ;;  %3441 = vmatmul.mubr.bf16.gmra.mxu0 %v4199_v40  ;;  %v3595_v36 = vpop.f32.mrf.mxu1  ;;  %3786 = vmatmul.mubr.bf16.gmra.mxu1 %v4201_v3  ;;  %v4226_v40 = vcombine.high %v354_v9, %v358_v60 }
 0x2b3   :  { %3845 = vst [vmem:[#allocation8 + $0x98] sm:$0xff] %v3591_v51  ;;  %v3251_v45 = vadd.f32 %v3250_v25, %v4640_v4  ;;  %3448 = vmatprep.mubr.bf16.mxu0 %v4208_v43  ;;  %3793 = vmatprep.mubr.bf16.mxu1 %v4210_v35  ;;  %v361_v51 = vld [vmem:[#allocation2 + $0x990] sm:$0xff] }
 0x2b4   :  { %v3252_v63 = vpop.f32.mrf.mxu0  ;;  %v3597_v28 = vpop.f32.mrf.mxu1  ;;  %v4232_v30 = vcombine.high %v361_v51, %v365_v26 }
 0x2b5   :  { %v3596_v55 = vadd.f32 %v3595_v36, %v3251_v45  ;;  %v362_v45 = vld [vmem:[#allocation2 + $0x998] sm:$0xff]  ;;  %v4225_v28 = vcombine.low %v354_v9, %v358_v60 }
 0x2b6   :  { %v3253_v13 = vpop.f32.mrf.mxu0  ;;  %v3598_v44 = vpop.f32.mrf.mxu1  ;;  %v366_v36 = vld [vmem:[#allocation2 + $0x9b8] sm:$0xff] }
 0x2b7   :  { %3846 = vst [vmem:[#allocation8 + $0xa0] sm:$0xff] %v3596_v55  ;;  %v3254_v10 = vadd.f32 %v3253_v13, %v4643_v20  ;;  %v4234_v2 = vcombine.high %v362_v45, %v366_v36 }
 0x2b8   :  { %v3255_v4 = vpop.f32.mrf.mxu0  ;;  %v3600_v27 = vpop.f32.mrf.mxu1 }
 0x2b9   :  { %v3599_v7 = vadd.f32 %v3598_v44, %v3254_v10 }
 0x2ba   :  { %v3258_v11 = vpop.f32.mrf.mxu0  ;;  %3449 = vmatmul.mubr.bf16.gmra.mxu0 %v4207_v8  ;;  %v3603_v19 = vpop.f32.mrf.mxu1  ;;  %3794 = vmatmul.mubr.bf16.gmra.mxu1 %v4209_v54 }
 0x2bb   :  { %3847 = vst [vmem:[#allocation8 + $0xa8] sm:$0xff] %v3599_v7  ;;  %v3259_v0 = vadd.f32 %v3258_v11, %v4646_v32  ;;  %3456 = vmatprep.mubr.bf16.mxu0 %v4216_v34  ;;  %3801 = vmatprep.mubr.bf16.mxu1 %v4218_v59  ;;  %v4231_v7 = vcombine.low %v361_v51, %v365_v26 }
 0x2bc   :  { %v3260_v21 = vpop.f32.mrf.mxu0  ;;  %v3605_v37 = vpop.f32.mrf.mxu1 }
 0x2bd   :  { %v3604_v20 = vadd.f32 %v3603_v19, %v3259_v0  ;;  %v4233_v0 = vcombine.low %v362_v45, %v366_v36 }
 0x2be   :  { %v3261_v58 = vpop.f32.mrf.mxu0  ;;  %v3606_v53 = vpop.f32.mrf.mxu1 }
 0x2bf   :  { %3848 = vst [vmem:[#allocation8 + $0xb0] sm:$0xff] %v3604_v20  ;;  %v3262_v41 = vadd.f32 %v3261_v58, %v4649_v50 }
 0x2c0   :  { %v3263_v32 = vpop.f32.mrf.mxu0  ;;  %v3608_v1 = vpop.f32.mrf.mxu1 }
 0x2c1   :  { %v3607_v5 = vadd.f32 %v3606_v53, %v3262_v41 }
 0x2c2   :  { %v3266_v3 = vpop.f32.mrf.mxu0  ;;  %3457 = vmatmul.mubr.bf16.gmra.mxu0 %v4215_v29  ;;  %v3611_v39 = vpop.f32.mrf.mxu1  ;;  %3802 = vmatmul.mubr.bf16.gmra.mxu1 %v4217_v33 }
 0x2c3   :  { %3849 = vst [vmem:[#allocation8 + $0xb8] sm:$0xff] %v3607_v5  ;;  %v3267_v43 = vadd.f32 %v3266_v3, %v4652_v61  ;;  %3464 = vmatprep.mubr.bf16.mxu0 %v4224_v15  ;;  %3809 = vmatprep.mubr.bf16.mxu1 %v4226_v40 }
 0x2c4   :  { %v3268_v35 = vpop.f32.mrf.mxu0  ;;  %v3613_v25 = vpop.f32.mrf.mxu1 }
 0x2c5   :  { %v3612_v50 = vadd.f32 %v3611_v39, %v3267_v43 }
 0x2c6   :  { %v3269_v63 = vpop.f32.mrf.mxu0  ;;  %v3614_v55 = vpop.f32.mrf.mxu1 }
 0x2c7   :  { %3850 = vst [vmem:[#allocation8 + $0xc0] sm:$0xff] %v3612_v50  ;;  %v3270_v17 = vadd.f32 %v3269_v63, %v4655_v18 }
 0x2c8   :  { %v3271_v61 = vpop.f32.mrf.mxu0  ;;  %v3616_v8 = vpop.f32.mrf.mxu1 }
 0x2c9   :  { %v3615_v13 = vadd.f32 %v3614_v55, %v3270_v17 }
 0x2ca   :  { %v3274_v10 = vpop.f32.mrf.mxu0  ;;  %3465 = vmatmul.mubr.bf16.gmra.mxu0 %v4223_v16  ;;  %v3619_v54 = vpop.f32.mrf.mxu1  ;;  %3810 = vmatmul.mubr.bf16.gmra.mxu1 %v4225_v28 }
 0x2cb   :  { %3851 = vst [vmem:[#allocation8 + $0xc8] sm:$0xff] %v3615_v13  ;;  %v3275_v44 = vadd.f32 %v3274_v10, %v4658_v31  ;;  %3472 = vmatprep.mubr.bf16.mxu0 %v4232_v30  ;;  %3817 = vmatprep.mubr.bf16.mxu1 %v4234_v2 }
 0x2cc   :  { %v3276_v34 = vpop.f32.mrf.mxu0  ;;  %v3621_v59 = vpop.f32.mrf.mxu1 }
 0x2cd   :  { %v3620_v4 = vadd.f32 %v3619_v54, %v3275_v44 }
 0x2ce   :  { %v3277_v18 = vpop.f32.mrf.mxu0  ;;  %v3622_v11 = vpop.f32.mrf.mxu1 }
 0x2cf   :  { %3852 = vst [vmem:[#allocation8 + $0xd0] sm:$0xff] %v3620_v4  ;;  %v3278_v27 = vadd.f32 %v3277_v18, %v4661_v52 }
 0x2d0   :  { %v3279_v19 = vpop.f32.mrf.mxu0  ;;  %v3624_v57 = vpop.f32.mrf.mxu1 }
 0x2d1   :  { %v3623_v21 = vadd.f32 %v3622_v11, %v3278_v27 }
 0x2d2   :  { %v3282_v22 = vpop.f32.mrf.mxu0  ;;  %3473 = vmatmul.mubr.bf16.gmra.mxu0 %v4231_v7  ;;  %v3627_v20 = vpop.f32.mrf.mxu1  ;;  %3818 = vmatmul.mubr.bf16.gmra.mxu1 %v4233_v0 }
 0x2d3   :  { %3853 = vst [vmem:[#allocation8 + $0xd8] sm:$0xff] %v3623_v21  ;;  %v3283_v31 = vadd.f32 %v3282_v22, %v4664_v6 }
 0x2d4   :  { %v3284_v37 = vpop.f32.mrf.mxu0  ;;  %v3629_v60 = vpop.f32.mrf.mxu1 }
 0x2d5   :  { %v3628_v9 = vadd.f32 %v3627_v20, %v3283_v31 }
 0x2d6   :  { %v3285_v58 = vpop.f32.mrf.mxu0  ;;  %v3630_v52 = vpop.f32.mrf.mxu1 }
 0x2d7   :  { %3854 = vst [vmem:[#allocation8 + $0xe0] sm:$0xff] %v3628_v9  ;;  %v3286_v29 = vadd.f32 %v3285_v58, %v4667_v23 }
 0x2d8   :  { %v3287_v41 = vpop.f32.mrf.mxu0  ;;  %v3632_v33 = vpop.f32.mrf.mxu1 }
 0x2d9   :  { %v3631_v53 = vadd.f32 %v3630_v52, %v3286_v29  ;;  %v4937_v29 = vld [vmem:[#allocation12_spill] sm:$0xff] }
 0x2da   :  { %v3290_v15 = vpop.f32.mrf.mxu0  ;;  %v3635_v40 = vpop.f32.mrf.mxu1 }
 0x2db   :  { %3855 = vst [vmem:[#allocation8 + $0xe8] sm:$0xff] %v3631_v53  ;;  %v3291_v32 = vadd.f32 %v3290_v15, %v4670_v42 }
 0x2dc   :  { %v3292_v5 = vpop.f32.mrf.mxu0  ;;  %v3637_v1 = vpop.f32.mrf.mxu1 }
 0x2dd   :  { %v3636_v6 = vadd.f32 %v3635_v40, %v3291_v32  ;;  %v4938_v32 = vld [vmem:[#allocation13_spill] sm:$0xff] }
 0x2de   :  { %v3293_v3 = vpop.f32.mrf.mxu0  ;;  %v3638_v39 = vpop.f32.mrf.mxu1 }
 0x2df   :  { %3856 = vst [vmem:[#allocation8 + $0xf0] sm:$0xff] %v3636_v6  ;;  %v3294_v43 = vadd.f32 %v3293_v3, %v4673_v62 }
 0x2e0   :  { %v3295_v35 = vpop.f32.mrf.mxu0  ;;  %v3640_v23 = vpop.f32.mrf.mxu1 }
 0x2e1   :  { %v3639_v51 = vadd.f32 %v3638_v39, %v3294_v43  ;;  %v4939_v43 = vld [vmem:[#allocation14_spill] sm:$0xff] }
 0x2e2   :  { %v3298_v26 = vpop.f32.mrf.mxu0  ;;  %v3643_v25 = vpop.f32.mrf.mxu1 }
 0x2e3   :  { %3857 = vst [vmem:[#allocation8 + $0xf8] sm:$0xff] %v3639_v51  ;;  %v3299_v50 = vadd.f32 %v3298_v26, %v4676_v14 }
 0x2e4   :  { %v3300_v45 = vpop.f32.mrf.mxu0  ;;  %v3645_v42 = vpop.f32.mrf.mxu1 }
 0x2e5   :  { %v3644_v36 = vadd.f32 %v3643_v25, %v3299_v50  ;;  %v4940_v25 = vld [vmem:[#allocation15_spill] sm:$0xff] }
 0x2e6   :  { %v3301_v63 = vpop.f32.mrf.mxu0  ;;  %v3646_v17 = vpop.f32.mrf.mxu1 }
 0x2e7   :  { %3858 = vst [vmem:[#allocation8 + $0x100] sm:$0xff] %v3644_v36  ;;  %v3302_v16 = vadd.f32 %v3301_v63, %v4679_v46 }
 0x2e8   :  { %v3303_v55 = vpop.f32.mrf.mxu0  ;;  %v3648_v62 = vpop.f32.mrf.mxu1 }
 0x2e9   :  { %v3647_v28 = vadd.f32 %v3646_v17, %v3302_v16  ;;  %v4941_v55 = vld [vmem:[#allocation16_spill] sm:$0xff] }
 0x2ea   :  { %v3306_v30 = vpop.f32.mrf.mxu0  ;;  %v3651_v2 = vpop.f32.mrf.mxu1 }
 0x2eb   :  { %3859 = vst [vmem:[#allocation8 + $0x108] sm:$0xff] %v3647_v28  ;;  %v3307_v61 = vadd.f32 %v3306_v30, %v4682_v56 }
 0x2ec   :  { %v3308_v13 = vpop.f32.mrf.mxu0  ;;  %v3653_v14 = vpop.f32.mrf.mxu1 }
 0x2ed   :  { %v3652_v8 = vadd.f32 %v3651_v2, %v3307_v61 }
 0x2ee   :  { %v3309_v10 = vpop.f32.mrf.mxu0  ;;  %v3654_v54 = vpop.f32.mrf.mxu1 }
 0x2ef   :  { %3860 = vst [vmem:[#allocation8 + $0x110] sm:$0xff] %v3652_v8  ;;  %v3310_v44 = vadd.f32 %v3309_v10, %v4685_v24  ;;  %v4942_v8 = vld [vmem:[#allocation17_spill] sm:$0xff] }
 0x2f0   :  { %v3311_v34 = vpop.f32.mrf.mxu0  ;;  %v3656_v46 = vpop.f32.mrf.mxu1 }
 0x2f1   :  { %v3655_v4 = vadd.f32 %v3654_v54, %v3310_v44  ;;  %v4943_v46 = vld [vmem:[#allocation18_spill] sm:$0xff] }
 0x2f2   :  { %v3314_v59 = vpop.f32.mrf.mxu0  ;;  %v3659_v7 = vpop.f32.mrf.mxu1 }
 0x2f3   :  { %3861 = vst [vmem:[#allocation8 + $0x118] sm:$0xff] %v3655_v4  ;;  %v3315_v18 = vadd.f32 %v3314_v59, %v4688_v47 }
 0x2f4   :  { %v3316_v27 = vpop.f32.mrf.mxu0  ;;  %v3661_v56 = vpop.f32.mrf.mxu1 }
 0x2f5   :  { %v3660_v11 = vadd.f32 %v3659_v7, %v3315_v18 }
 0x2f6   :  { %v3317_v0 = vpop.f32.mrf.mxu0  ;;  %v3662_v21 = vpop.f32.mrf.mxu1 }
 0x2f7   :  { %3862 = vst [vmem:[#allocation8 + $0x120] sm:$0xff] %v3660_v11  ;;  %v3318_v19 = vadd.f32 %v3317_v0, %v4691_v12  ;;  %v4944_v0 = vld [vmem:[#allocation19_spill] sm:$0xff] }
 0x2f8   :  { %v3319_v57 = vpop.f32.mrf.mxu0  ;;  %v3664_v24 = vpop.f32.mrf.mxu1 }
 0x2f9   :  { %v3663_v22 = vadd.f32 %v3662_v21, %v3318_v19 }
 0x2fa   :  { %v3322_v31 = vpop.f32.mrf.mxu0  ;;  %v3667_v37 = vpop.f32.mrf.mxu1 }
 0x2fb   :  { %3863 = vst [vmem:[#allocation8 + $0x128] sm:$0xff] %v3663_v22  ;;  %v3323_v20 = vadd.f32 %v3322_v31, %v4694_v38 }
 0x2fc   :  { %v3324_v9 = vpop.f32.mrf.mxu0  ;;  %v3669_v47 = vpop.f32.mrf.mxu1 }
 0x2fd   :  { %v3668_v60 = vadd.f32 %v3667_v37, %v3323_v20  ;;  %v4945_v20 = vld [vmem:[#allocation20_spill] sm:$0xff] }
 0x2fe   :  { %v3325_v58 = vpop.f32.mrf.mxu0  ;;  %v3670_v41 = vpop.f32.mrf.mxu1 }
 0x2ff   :  { %3864 = vst [vmem:[#allocation8 + $0x130] sm:$0xff] %v3668_v60  ;;  %v3326_v52 = vadd.f32 %v3325_v58, %v4937_v29 }
 0x300   :  { %v3327_v53 = vpop.f32.mrf.mxu0  ;;  %v3672_v12 = vpop.f32.mrf.mxu1 }
 0x301   :  { %v3671_v33 = vadd.f32 %v3670_v41, %v3326_v52  ;;  %v4946_v52 = vld [vmem:[#allocation21_spill] sm:$0xff] }
 0x302   :  { %v3330_v15 = vpop.f32.mrf.mxu0  ;;  %v3675_v5 = vpop.f32.mrf.mxu1 }
 0x303   :  { %3865 = vst [vmem:[#allocation8 + $0x138] sm:$0xff] %v3671_v33  ;;  %v3331_v40 = vadd.f32 %v3330_v15, %v4938_v32 }
 0x304   :  { %v3332_v6 = vpop.f32.mrf.mxu0  ;;  %v3677_v38 = vpop.f32.mrf.mxu1 }
 0x305   :  { %v3676_v1 = vadd.f32 %v3675_v5, %v3331_v40  ;;  %v4947_v40 = vld [vmem:[#allocation22_spill] sm:$0xff] }
 0x306   :  { %v3333_v3 = vpop.f32.mrf.mxu0  ;;  %v3678_v35 = vpop.f32.mrf.mxu1 }
 0x307   :  { %3866 = vst [vmem:[#allocation8 + $0x140] sm:$0xff] %v3676_v1  ;;  %v3334_v39 = vadd.f32 %v3333_v3, %v4939_v43 }
 0x308   :  { %v3335_v51 = vpop.f32.mrf.mxu0  ;;  %v3680_v26 = vpop.f32.mrf.mxu1 }
 0x309   :  { %v3679_v23 = vadd.f32 %v3678_v35, %v3334_v39  ;;  %v4948_v39 = vld [vmem:[#allocation23_spill] sm:$0xff] }
 0x30a   :  { %v3338_v50 = vpop.f32.mrf.mxu0  ;;  %v3683_v36 = vpop.f32.mrf.mxu1 }
 0x30b   :  { %3867 = vst [vmem:[#allocation8 + $0x148] sm:$0xff] %v3679_v23  ;;  %v3339_v45 = vadd.f32 %v3338_v50, %v4940_v25 }
 0x30c   :  { %v3340_v42 = vpop.f32.mrf.mxu0  ;;  %v3685_v16 = vpop.f32.mrf.mxu1 }
 0x30d   :  { %v3684_v63 = vadd.f32 %v3683_v36, %v3339_v45  ;;  %v4949_v45 = vld [vmem:[#allocation24_spill] sm:$0xff] }
 0x30e   :  { %v3341_v17 = vpop.f32.mrf.mxu0  ;;  %v3686_v62 = vpop.f32.mrf.mxu1 }
 0x30f   :  { %3868 = vst [vmem:[#allocation8 + $0x150] sm:$0xff] %v3684_v63  ;;  %v3342_v28 = vadd.f32 %v3341_v17, %v4941_v55 }
 0x310   :  { %v3343_v30 = vpop.f32.mrf.mxu0  ;;  %v3688_v2 = vpop.f32.mrf.mxu1 }
 0x311   :  { %v3687_v61 = vadd.f32 %v3686_v62, %v3342_v28  ;;  %v4950_v28 = vld [vmem:[#allocation25_spill] sm:$0xff] }
 0x312   :  { %v3346_v13 = vpop.f32.mrf.mxu0  ;;  %v3691_v10 = vpop.f32.mrf.mxu1 }
 0x313   :  { %3869 = vst [vmem:[#allocation8 + $0x158] sm:$0xff] %v3687_v61  ;;  %v3347_v14 = vadd.f32 %v3346_v13, %v4942_v8 }
 0x314   :  { %v3348_v44 = vpop.f32.mrf.mxu0  ;;  %v3693_v34 = vpop.f32.mrf.mxu1 }
 0x315   :  { %v3692_v54 = vadd.f32 %v3691_v10, %v3347_v14  ;;  %v4951_v14 = vld [vmem:[#allocation26_spill] sm:$0xff] }
 0x316   :  { %v3349_v4 = vpop.f32.mrf.mxu0  ;;  %v3694_v18 = vpop.f32.mrf.mxu1 }
 0x317   :  { %3870 = vst [vmem:[#allocation8 + $0x160] sm:$0xff] %v3692_v54  ;;  %v3350_v59 = vadd.f32 %v3349_v4, %v4943_v46 }
 0x318   :  { %v3351_v7 = vpop.f32.mrf.mxu0  ;;  %v3696_v11 = vpop.f32.mrf.mxu1 }
 0x319   :  { %v3695_v27 = vadd.f32 %v3694_v18, %v3350_v59  ;;  %v4952_v59 = vld [vmem:[#allocation27_spill] sm:$0xff] }
 0x31a   :  { %v3354_v56 = vpop.f32.mrf.mxu0  ;;  %v3699_v21 = vpop.f32.mrf.mxu1 }
 0x31b   :  { %3871 = vst [vmem:[#allocation8 + $0x168] sm:$0xff] %v3695_v27  ;;  %v3355_v19 = vadd.f32 %v3354_v56, %v4944_v0 }
 0x31c   :  { %v3356_v57 = vpop.f32.mrf.mxu0  ;;  %v3701_v24 = vpop.f32.mrf.mxu1 }
 0x31d   :  { %v3700_v22 = vadd.f32 %v3699_v21, %v3355_v19  ;;  %v4953_v19 = vld [vmem:[#allocation28_spill] sm:$0xff] }
 0x31e   :  { %v3357_v31 = vpop.f32.mrf.mxu0  ;;  %v3702_v9 = vpop.f32.mrf.mxu1 }
 0x31f   :  { %3872 = vst [vmem:[#allocation8 + $0x170] sm:$0xff] %v3700_v22  ;;  %v3358_v37 = vadd.f32 %v3357_v31, %v4945_v20 }
 0x320   :  { %v3359_v60 = vpop.f32.mrf.mxu0  ;;  %v3704_v58 = vpop.f32.mrf.mxu1 }
 0x321   :  { %v3703_v47 = vadd.f32 %v3702_v9, %v3358_v37  ;;  %v4954_v37 = vld [vmem:[#allocation29_spill] sm:$0xff] }
 0x322   :  { %v3362_v29 = vpop.f32.mrf.mxu0  ;;  %v3707_v53 = vpop.f32.mrf.mxu1 }
 0x323   :  { %3873 = vst [vmem:[#allocation8 + $0x178] sm:$0xff] %v3703_v47  ;;  %v3363_v41 = vadd.f32 %v3362_v29, %v4946_v52 }
 0x324   :  { %v3364_v33 = vpop.f32.mrf.mxu0  ;;  %v3709_v15 = vpop.f32.mrf.mxu1 }
 0x325   :  { %v3708_v12 = vadd.f32 %v3707_v53, %v3363_v41  ;;  %v4955_v41 = vld [vmem:[#allocation30_spill] sm:$0xff] }
 0x326   :  { %v3365_v32 = vpop.f32.mrf.mxu0  ;;  %v3710_v6 = vpop.f32.mrf.mxu1 }
 0x327   :  { %3874 = vst [vmem:[#allocation8 + $0x180] sm:$0xff] %v3708_v12  ;;  %v3366_v5 = vadd.f32 %v3365_v32, %v4947_v40 }
 0x328   :  { %v3367_v1 = vpop.f32.mrf.mxu0  ;;  %v3712_v3 = vpop.f32.mrf.mxu1 }
 0x329   :  { %v3711_v38 = vadd.f32 %v3710_v6, %v3366_v5  ;;  %v4956_v5 = vld [vmem:[#allocation31_spill] sm:$0xff] }
 0x32a   :  { %v3370_v43 = vpop.f32.mrf.mxu0  ;;  %v3715_v51 = vpop.f32.mrf.mxu1 }
 0x32b   :  { %3875 = vst [vmem:[#allocation8 + $0x188] sm:$0xff] %v3711_v38  ;;  %v3371_v35 = vadd.f32 %v3370_v43, %v4948_v39 }
 0x32c   :  { %v3372_v23 = vpop.f32.mrf.mxu0  ;;  %v3717_v50 = vpop.f32.mrf.mxu1 }
 0x32d   :  { %v3716_v26 = vadd.f32 %v3715_v51, %v3371_v35  ;;  %v4957_v35 = vld [vmem:[#allocation32_spill] sm:$0xff] }
 0x32e   :  { %v3373_v25 = vpop.f32.mrf.mxu0  ;;  %v3718_v42 = vpop.f32.mrf.mxu1 }
 0x32f   :  { %3876 = vst [vmem:[#allocation8 + $0x190] sm:$0xff] %v3716_v26  ;;  %v3374_v36 = vadd.f32 %v3373_v25, %v4949_v45 }
 0x330   :  { %v3375_v63 = vpop.f32.mrf.mxu0  ;;  %v3720_v17 = vpop.f32.mrf.mxu1 }
 0x331   :  { %v3719_v16 = vadd.f32 %v3718_v42, %v3374_v36  ;;  %v4958_v36 = vld [vmem:[#allocation33_spill] sm:$0xff] }
 0x332   :  { %v3378_v55 = vpop.f32.mrf.mxu0  ;;  %v3723_v30 = vpop.f32.mrf.mxu1 }
 0x333   :  { %3877 = vst [vmem:[#allocation8 + $0x198] sm:$0xff] %v3719_v16  ;;  %v3379_v62 = vadd.f32 %v3378_v55, %v4950_v28 }
 0x334   :  { %v3380_v61 = vpop.f32.mrf.mxu0  ;;  %v3725_v13 = vpop.f32.mrf.mxu1 }
 0x335   :  { %v3724_v2 = vadd.f32 %v3723_v30, %v3379_v62  ;;  %v4959_v62 = vld [vmem:[#allocation34_spill] sm:$0xff] }
 0x336   :  { %v3381_v8 = vpop.f32.mrf.mxu0  ;;  %v3726_v44 = vpop.f32.mrf.mxu1 }
 0x337   :  { %3878 = vst [vmem:[#allocation8 + $0x1a0] sm:$0xff] %v3724_v2  ;;  %v3382_v10 = vadd.f32 %v3381_v8, %v4951_v14 }
 0x338   :  { %v3383_v54 = vpop.f32.mrf.mxu0  ;;  %v3728_v4 = vpop.f32.mrf.mxu1 }
 0x339   :  { %v3727_v34 = vadd.f32 %v3726_v44, %v3382_v10  ;;  %v4960_v10 = vld [vmem:[#allocation35_spill] sm:$0xff] }
 0x33a   :  { %v3386_v46 = vpop.f32.mrf.mxu0  ;;  %v3731_v7 = vpop.f32.mrf.mxu1 }
 0x33b   :  { %3879 = vst [vmem:[#allocation8 + $0x1a8] sm:$0xff] %v3727_v34  ;;  %v3387_v18 = vadd.f32 %v3386_v46, %v4952_v59 }
 0x33c   :  { %v3388_v27 = vpop.f32.mrf.mxu0  ;;  %v3733_v56 = vpop.f32.mrf.mxu1 }
 0x33d   :  { %v3732_v11 = vadd.f32 %v3731_v7, %v3387_v18  ;;  %v4961_v18 = vld [vmem:[#allocation36_spill] sm:$0xff] }
 0x33e   :  { %v3389_v0 = vpop.f32.mrf.mxu0  ;;  %v3734_v57 = vpop.f32.mrf.mxu1 }
 0x33f   :  { %3880 = vst [vmem:[#allocation8 + $0x1b0] sm:$0xff] %v3732_v11  ;;  %v3390_v21 = vadd.f32 %v3389_v0, %v4953_v19 }
 0x340   :  { %v3391_v22 = vpop.f32.mrf.mxu0  ;;  %v3736_v31 = vpop.f32.mrf.mxu1 }
 0x341   :  { %v3735_v24 = vadd.f32 %v3734_v57, %v3390_v21  ;;  %v4962_v21 = vld [vmem:[#allocation37_spill] sm:$0xff] }
 0x342   :  { %v3394_v20 = vpop.f32.mrf.mxu0  ;;  %v3739_v60 = vpop.f32.mrf.mxu1 }
 0x343   :  { %3881 = vst [vmem:[#allocation8 + $0x1b8] sm:$0xff] %v3735_v24  ;;  %v3395_v9 = vadd.f32 %v3394_v20, %v4954_v37 }
 0x344   :  { %v3396_v47 = vpop.f32.mrf.mxu0  ;;  %v3741_v29 = vpop.f32.mrf.mxu1 }
 0x345   :  { %v3740_v58 = vadd.f32 %v3739_v60, %v3395_v9  ;;  %v4963_v9 = vld [vmem:[#allocation38_spill] sm:$0xff] }
 0x346   :  { %v3397_v52 = vpop.f32.mrf.mxu0  ;;  %v3742_v33 = vpop.f32.mrf.mxu1 }
 0x347   :  { %3882 = vst [vmem:[#allocation8 + $0x1c0] sm:$0xff] %v3740_v58  ;;  %v3398_v53 = vadd.f32 %v3397_v52, %v4955_v41 }
 0x348   :  { %v3399_v12 = vpop.f32.mrf.mxu0  ;;  %v3744_v32 = vpop.f32.mrf.mxu1 }
 0x349   :  { %v3743_v15 = vadd.f32 %v3742_v33, %v3398_v53  ;;  %v4964_v53 = vld [vmem:[#allocation39_spill] sm:$0xff] }
 0x34a   :  { %v3402_v40 = vpop.f32.mrf.mxu0  ;;  %v3747_v1 = vpop.f32.mrf.mxu1 }
 0x34b   :  { %3883 = vst [vmem:[#allocation8 + $0x1c8] sm:$0xff] %v3743_v15  ;;  %v3403_v6 = vadd.f32 %v3402_v40, %v4956_v5 }
 0x34c   :  { %v3404_v38 = vpop.f32.mrf.mxu0  ;;  %v3749_v43 = vpop.f32.mrf.mxu1 }
 0x34d   :  { %v3748_v3 = vadd.f32 %v3747_v1, %v3403_v6  ;;  %v4965_v6 = vld [vmem:[#allocation40_spill] sm:$0xff] }
 0x34e   :  { %v3405_v39 = vpop.f32.mrf.mxu0  ;;  %v3750_v23 = vpop.f32.mrf.mxu1 }
 0x34f   :  { %3884 = vst [vmem:[#allocation8 + $0x1d0] sm:$0xff] %v3748_v3  ;;  %v3406_v51 = vadd.f32 %v3405_v39, %v4957_v35 }
 0x350   :  { %v3407_v26 = vpop.f32.mrf.mxu0  ;;  %v3752_v25 = vpop.f32.mrf.mxu1 }
 0x351   :  { %v3751_v50 = vadd.f32 %v3750_v23, %v3406_v51  ;;  %v4966_v51 = vld [vmem:[#allocation41_spill] sm:$0xff] }
 0x352   :  { %v3410_v45 = vpop.f32.mrf.mxu0  ;;  %v3755_v63 = vpop.f32.mrf.mxu1 }
 0x353   :  { %3885 = vst [vmem:[#allocation8 + $0x1d8] sm:$0xff] %v3751_v50  ;;  %v3411_v42 = vadd.f32 %v3410_v45, %v4958_v36 }
 0x354   :  { %v3412_v16 = vpop.f32.mrf.mxu0  ;;  %v3757_v55 = vpop.f32.mrf.mxu1 }
 0x355   :  { %v3756_v17 = vadd.f32 %v3755_v63, %v3411_v42  ;;  %v4967_v42 = vld [vmem:[#allocation42_spill] sm:$0xff] }
 0x356   :  { %v3413_v28 = vpop.f32.mrf.mxu0  ;;  %v3758_v61 = vpop.f32.mrf.mxu1 }
 0x357   :  { %3886 = vst [vmem:[#allocation8 + $0x1e0] sm:$0xff] %v3756_v17  ;;  %v3414_v30 = vadd.f32 %v3413_v28, %v4959_v62 }
 0x358   :  { %v3415_v2 = vpop.f32.mrf.mxu0  ;;  %v3760_v8 = vpop.f32.mrf.mxu1 }
 0x359   :  { %v3759_v13 = vadd.f32 %v3758_v61, %v3414_v30  ;;  %v4968_v30 = vld [vmem:[#allocation43_spill] sm:$0xff] }
 0x35a   :  { %v3418_v14 = vpop.f32.mrf.mxu0  ;;  %v3763_v54 = vpop.f32.mrf.mxu1 }
 0x35b   :  { %3887 = vst [vmem:[#allocation8 + $0x1e8] sm:$0xff] %v3759_v13  ;;  %v3419_v44 = vadd.f32 %v3418_v14, %v4960_v10 }
 0x35c   :  { %v3420_v34 = vpop.f32.mrf.mxu0  ;;  %v3765_v46 = vpop.f32.mrf.mxu1 }
 0x35d   :  { %v3764_v4 = vadd.f32 %v3763_v54, %v3419_v44  ;;  %v4969_v44 = vld [vmem:[#allocation44_spill] sm:$0xff] }
 0x35e   :  { %v3421_v59 = vpop.f32.mrf.mxu0  ;;  %v3766_v27 = vpop.f32.mrf.mxu1 }
 0x35f   :  { %3888 = vst [vmem:[#allocation8 + $0x1f0] sm:$0xff] %v3764_v4  ;;  %v3422_v7 = vadd.f32 %v3421_v59, %v4961_v18 }
 0x360   :  { %v3423_v11 = vpop.f32.mrf.mxu0  ;;  %v3768_v0 = vpop.f32.mrf.mxu1 }
 0x361   :  { %v3767_v56 = vadd.f32 %v3766_v27, %v3422_v7  ;;  %v4970_v7 = vld [vmem:[#allocation45_spill] sm:$0xff] }
 0x362   :  { %v3426_v19 = vpop.f32.mrf.mxu0  ;;  %v3771_v22 = vpop.f32.mrf.mxu1 }
 0x363   :  { %3889 = vst [vmem:[#allocation8 + $0x1f8] sm:$0xff] %v3767_v56  ;;  %v3427_v57 = vadd.f32 %v3426_v19, %v4962_v21 }
 0x364   :  { %v3428_v24 = vpop.f32.mrf.mxu0  ;;  %v3773_v20 = vpop.f32.mrf.mxu1 }
 0x365   :  { %v3772_v31 = vadd.f32 %v3771_v22, %v3427_v57  ;;  %v4971_v57 = vld [vmem:[#allocation46_spill] sm:$0xff] }
 0x366   :  { %v3429_v37 = vpop.f32.mrf.mxu0  ;;  %v3774_v47 = vpop.f32.mrf.mxu1 }
 0x367   :  { %3890 = vst [vmem:[#allocation8 + $0x200] sm:$0xff] %v3772_v31  ;;  %v3430_v60 = vadd.f32 %v3429_v37, %v4963_v9 }
 0x368   :  { %v3431_v58 = vpop.f32.mrf.mxu0  ;;  %v3776_v52 = vpop.f32.mrf.mxu1 }
 0x369   :  { %v3775_v29 = vadd.f32 %v3774_v47, %v3430_v60  ;;  %v4972_v60 = vld [vmem:[#allocation47_spill] sm:$0xff] }
 0x36a   :  { %v3434_v41 = vpop.f32.mrf.mxu0  ;;  %v3779_v12 = vpop.f32.mrf.mxu1 }
 0x36b   :  { %3891 = vst [vmem:[#allocation8 + $0x208] sm:$0xff] %v3775_v29  ;;  %v3435_v33 = vadd.f32 %v3434_v41, %v4964_v53 }
 0x36c   :  { %v3436_v15 = vpop.f32.mrf.mxu0  ;;  %v3781_v40 = vpop.f32.mrf.mxu1 }
 0x36d   :  { %v3780_v32 = vadd.f32 %v3779_v12, %v3435_v33  ;;  %v4973_v33 = vld [vmem:[#allocation48_spill] sm:$0xff] }
 0x36e   :  { %v3437_v5 = vpop.f32.mrf.mxu0  ;;  %v3782_v38 = vpop.f32.mrf.mxu1 }
 0x36f   :  { %3892 = vst [vmem:[#allocation8 + $0x210] sm:$0xff] %v3780_v32  ;;  %v3438_v1 = vadd.f32 %v3437_v5, %v4965_v6 }
 0x370   :  { %v3439_v3 = vpop.f32.mrf.mxu0  ;;  %v3784_v39 = vpop.f32.mrf.mxu1 }
 0x371   :  { %v3783_v43 = vadd.f32 %v3782_v38, %v3438_v1 }
 0x372   :  { %v3442_v35 = vpop.f32.mrf.mxu0  ;;  %v3787_v26 = vpop.f32.mrf.mxu1 }
 0x373   :  { %3893 = vst [vmem:[#allocation8 + $0x218] sm:$0xff] %v3783_v43  ;;  %v3443_v23 = vadd.f32 %v3442_v35, %v4966_v51 }
 0x374   :  { %v3444_v50 = vpop.f32.mrf.mxu0  ;;  %v3789_v45 = vpop.f32.mrf.mxu1 }
 0x375   :  { %v3788_v25 = vadd.f32 %v3787_v26, %v3443_v23 }
 0x376   :  { %v3445_v36 = vpop.f32.mrf.mxu0  ;;  %v3790_v16 = vpop.f32.mrf.mxu1 }
 0x377   :  { %3894 = vst [vmem:[#allocation8 + $0x220] sm:$0xff] %v3788_v25  ;;  %v3446_v63 = vadd.f32 %v3445_v36, %v4967_v42 }
 0x378   :  { %v3447_v17 = vpop.f32.mrf.mxu0  ;;  %v3792_v28 = vpop.f32.mrf.mxu1 }
 0x379   :  { %v3791_v55 = vadd.f32 %v3790_v16, %v3446_v63 }
 0x37a   :  { %v3450_v62 = vpop.f32.mrf.mxu0  ;;  %v3795_v2 = vpop.f32.mrf.mxu1 }
 0x37b   :  { %3895 = vst [vmem:[#allocation8 + $0x228] sm:$0xff] %v3791_v55  ;;  %v3451_v61 = vadd.f32 %v3450_v62, %v4968_v30 }
 0x37c   :  { %v3452_v13 = vpop.f32.mrf.mxu0  ;;  %v3797_v14 = vpop.f32.mrf.mxu1 }
 0x37d   :  { %v3796_v8 = vadd.f32 %v3795_v2, %v3451_v61 }
 0x37e   :  { %v3453_v10 = vpop.f32.mrf.mxu0  ;;  %v3798_v34 = vpop.f32.mrf.mxu1 }
 0x37f   :  { %3896 = vst [vmem:[#allocation8 + $0x230] sm:$0xff] %v3796_v8  ;;  %v3454_v54 = vadd.f32 %v3453_v10, %v4969_v44 }
 0x380   :  { %v3455_v4 = vpop.f32.mrf.mxu0  ;;  %v3800_v59 = vpop.f32.mrf.mxu1 }
 0x381   :  { %v3799_v46 = vadd.f32 %v3798_v34, %v3454_v54 }
 0x382   :  { %v3458_v18 = vpop.f32.mrf.mxu0  ;;  %v3803_v11 = vpop.f32.mrf.mxu1 }
 0x383   :  { %3897 = vst [vmem:[#allocation8 + $0x238] sm:$0xff] %v3799_v46  ;;  %v3459_v27 = vadd.f32 %v3458_v18, %v4970_v7 }
 0x384   :  { %v3460_v56 = vpop.f32.mrf.mxu0  ;;  %v3805_v19 = vpop.f32.mrf.mxu1 }
 0x385   :  { %v3804_v0 = vadd.f32 %v3803_v11, %v3459_v27 }
 0x386   :  { %v3461_v21 = vpop.f32.mrf.mxu0  ;;  %v3806_v24 = vpop.f32.mrf.mxu1 }
 0x387   :  { %3898 = vst [vmem:[#allocation8 + $0x240] sm:$0xff] %v3804_v0  ;;  %v3462_v22 = vadd.f32 %v3461_v21, %v4971_v57 }
 0x388   :  { %v3463_v31 = vpop.f32.mrf.mxu0  ;;  %v3808_v37 = vpop.f32.mrf.mxu1 }
 0x389   :  { %v3807_v20 = vadd.f32 %v3806_v24, %v3462_v22 }
 0x38a   :  { %v3466_v9 = vpop.f32.mrf.mxu0  ;;  %v3811_v58 = vpop.f32.mrf.mxu1 }
 0x38b   :  { %3899 = vst [vmem:[#allocation8 + $0x248] sm:$0xff] %v3807_v20  ;;  %v3467_v47 = vadd.f32 %v3466_v9, %v4972_v60 }
 0x38c   :  { %v3468_v29 = vpop.f32.mrf.mxu0  ;;  %v3813_v41 = vpop.f32.mrf.mxu1 }
 0x38d   :  { %v3812_v52 = vadd.f32 %v3811_v58, %v3467_v47 }
 0x38e   :  { %v3469_v53 = vpop.f32.mrf.mxu0  ;;  %v3814_v15 = vpop.f32.mrf.mxu1 }
 0x38f   :  { %3900 = vst [vmem:[#allocation8 + $0x250] sm:$0xff] %v3812_v52  ;;  %v3470_v12 = vadd.f32 %v3469_v53, %v4973_v33 }
 0x390   :  { %v3471_v32 = vpop.f32.mrf.mxu0  ;;  %v3816_v5 = vpop.f32.mrf.mxu1 }
 0x391   :  { %v3815_v40 = vadd.f32 %v3814_v15, %v3470_v12 }
 0x392   :  { %v3474_v6 = vpop.f32.mrf.mxu0  ;;  %v3819_v38 = vpop.f32.mrf.mxu1 }
 0x393   :  { %3901 = vst [vmem:[#allocation8 + $0x258] sm:$0xff] %v3815_v40  ;;  %v3475_v1 = vadd.f32 %v3474_v6, %v4810_v48 }
 0x394   :  { %v3476_v3 = vpop.f32.mrf.mxu0  ;;  %v3821_v39 = vpop.f32.mrf.mxu1 }
 0x395   :  { %v3820_v43 = vadd.f32 %v3819_v38, %v3475_v1 }
 0x396   :  { %v3477_v35 = vpop.f32.mrf.mxu0  ;;  %v3822_v23 = vpop.f32.mrf.mxu1 }
 0x397   :  { %3902 = vst [vmem:[#allocation8 + $0x260] sm:$0xff] %v3820_v43  ;;  %v3478_v51 = vadd.f32 %v3477_v35, %v4813_v49 }
 0x398   :  { %v3479_v26 = vpop.f32.mrf.mxu0  ;;  %v3824_v25 = vpop.f32.mrf.mxu1 }
 0x399   :  { %v3823_v50 = vadd.f32 %v3822_v23, %v3478_v51 }
 0x39b   :  { %3903 = vst [vmem:[#allocation8 + $0x268] sm:$0xff] %v3823_v50 }
 0x39c   :  { %4446 = shalt.err (!%p4443_p5)
}
 0x39d   :  { %s4470_s5 = smov 128   ;;  %s4471_s6 = smov 8  }
 0x39e   :  { %3915 = dma.vmem_to_hbm [thread:$0]  %s3910_s2, 9984, %s4899_s3, [#allocation4], %s4470_s5, %s4470_s5, %s4471_s6  }
 0x39f   :  { %4459 = dma.done.wait [#allocation4], 9984  }
 0x3a0   :  { %4460 = vsyncadd [#allocation4], 4294957312 }
 0x3a1   :  { %3919 = vsyncpa [#allocation3], 1 }
 0x3a2   :  { %3920 = vsyncpa [#allocation6], 1 }
 0x3a3   :  { %3921 = vsyncpa [#allocation4], 1 }

</bundles_post_ra>
